<compile_context>
chip_gen: v5e
topology: v5e:2x2
jax: 0.10.0
libtpu: 0.0.40
codegen_flags: <defaults>
</compile_context>

<pallas_src>
import functools

import jax
import jax.numpy as jnp
from jax.experimental import pallas as pl
from jax.experimental.pallas import tpu as pltpu

# Fixed architecture sizes (defaults from the module's __init__).
CARD_IN, JOKER_IN, STATE_IN = 52 * 4, 150 * 8, 50
MEM_DIM = 128                         # memgraph_embedding_dim
HIDDEN = 512                          # hidden_size
CARD_H1, CARD_OUT = 256, 128
JOKER_H1, JOKER_OUT = 512, 256
STATE_H1, STATE_OUT = 128, 64
COMBINED = CARD_OUT + JOKER_OUT + STATE_OUT + MEM_DIM   # 576

PARAM_ORDER = [
    "cw1", "cb1", "cw2", "cb2",
    "jw1", "jb1", "jw2", "jb2",
    "sw1", "sb1", "sw2", "sb2",
    "hw1", "hb1", "hw2", "hb2",
    "pw", "pb", "vw", "vb",
]


def _round_up(x, m):
    return ((x + m - 1) // m) * m


def _pick_vmem_limit_bytes():
    """96 MiB on 128-MiB-VMEM chips (v5e/v6e), 48 MiB otherwise (v7x-safe)."""
    try:
        info = pltpu.get_tpu_info()
        phys = int(getattr(info, "vmem_capacity_bytes", 64 << 20))
    except Exception:
        phys = 64 << 20
    return (96 << 20) if phys >= (128 << 20) else (48 << 20)


_VMEM_LIMIT_BYTES = _pick_vmem_limit_bytes()


def _balatro_kernel(cards_ref, jokers_ref, gstate_ref, mem_ref, mask_ref,
                    cw1, cb1, cw2, cb2,
                    jw1, jb1, jw2, jb2,
                    sw1, sb1, sw2, sb2,
                    hw1c, hw1j, hw1sm, hb1,
                    hw2, hb2,
                    hdw, hdb,
                    out_ref):
    bf16 = jnp.bfloat16
    relu = lambda z: jnp.maximum(z, 0.0)

    def lin(x_f32, w_ref, b_ref):
        # bf16 MXU inputs (cast in-kernel), f32 accumulation, f32 bias.
        return jnp.dot(x_f32.astype(bf16), w_ref[...],
                       preferred_element_type=jnp.float32) + b_ref[...]

    # Card / joker encoders (Linear+ReLU, Linear+ReLU).
    c = relu(lin(relu(lin(cards_ref[...], cw1, cb1)), cw2, cb2))     # (T, 128)
    j = relu(lin(relu(lin(jokers_ref[...], jw1, jb1)), jw2, jb2))    # (T, 256)
    # Game-state encoder: first layer kept f32 (K=50 is odd and tiny FLOPs).
    s0 = relu(jnp.dot(gstate_ref[...], sw1[...],
                      preferred_element_type=jnp.float32) + sb1[...])
    s = relu(lin(s0, sw2, sb2))                                      # (T, 64)

    # Shared trunk layer 1: concat([c, j, s, m]) @ hw1 + hb1, as split matmuls
    # against per-encoder weight slabs with [s|m] fused into one K=192 pass.
    sm = jnp.concatenate([s, mem_ref[...]], axis=-1).astype(bf16)    # (T, 192)
    h = (jnp.dot(c.astype(bf16), hw1c[...], preferred_element_type=jnp.float32)
         + jnp.dot(j.astype(bf16), hw1j[...], preferred_element_type=jnp.float32)
         + jnp.dot(sm, hw1sm[...], preferred_element_type=jnp.float32)
         + hb1[...])
    h = relu(h)
    h = relu(lin(h, hw2, hb2))                                       # (T, 512)

    # Fused policy+value head -> single lane-dense (T, head_pad) f32 store.
    head = lin(h, hdw, hdb)

    # Additive mask penalty, widened in VMEM to head width (zeros cover the
    # value slot and lane padding).
    pen = jnp.where(mask_ref[...] > 0.0, jnp.float32(0.0), jnp.float32(-1e10))
    pad_cols = head.shape[1] - pen.shape[1]
    if pad_cols:
        pen = jnp.concatenate(
            [pen, jnp.zeros((pen.shape[0], pad_cols), jnp.float32)], axis=-1)
    out_ref[...] = head + pen


def init_params(key, num_outputs):
    """Deterministic synthetic parameters (weights stored as (in, out), f32)."""
    shapes = {
        "cw1": (CARD_IN, CARD_H1), "cb1": (1, CARD_H1),
        "cw2": (CARD_H1, CARD_OUT), "cb2": (1, CARD_OUT),
        "jw1": (JOKER_IN, JOKER_H1), "jb1": (1, JOKER_H1),
        "jw2": (JOKER_H1, JOKER_OUT), "jb2": (1, JOKER_OUT),
        "sw1": (STATE_IN, STATE_H1), "sb1": (1, STATE_H1),
        "sw2": (STATE_H1, STATE_OUT), "sb2": (1, STATE_OUT),
        "hw1": (COMBINED, HIDDEN), "hb1": (1, HIDDEN),
        "hw2": (HIDDEN, HIDDEN), "hb2": (1, HIDDEN),
        "pw": (HIDDEN, num_outputs), "pb": (1, num_outputs),
        "vw": (HIDDEN, 1), "vb": (1, 1),
    }
    params = {}
    keys = jax.random.split(key, len(PARAM_ORDER))
    for k, name in zip(keys, PARAM_ORDER):
        fan_in = shapes[name][0]
        is_bias = name.endswith("b1") or name.endswith("b2") or name in ("pb", "vb")
        if is_bias:
            params[name] = 0.1 * jax.random.normal(k, shapes[name], jnp.float32)
        else:
            scale = 0.01 if name == "pw" else (1.0 / jnp.sqrt(jnp.float32(fan_in)))
            params[name] = scale * jax.random.normal(k, shapes[name], jnp.float32)
    return params


def _prepare_params(p, head_pad):
    """Cast weights to bf16, split hw1 per encoder (s+m fused), fuse pw|vw head."""
    num_outputs = p["pw"].shape[1]
    bf16, f32 = jnp.bfloat16, jnp.float32

    # Shared-trunk weight pre-split: card slab, joker slab, fused [state|mem] slab.
    hw1c = p["hw1"][:CARD_OUT]
    hw1j = p["hw1"][CARD_OUT:CARD_OUT + JOKER_OUT]
    hw1sm = p["hw1"][CARD_OUT + JOKER_OUT:]                 # (192, 512)

    # Fused, lane-padded policy+value head: [0:num_outputs]=policy,
    # [num_outputs]=value, rest zero.
    hdw = jnp.zeros((HIDDEN, head_pad), f32)
    hdw = hdw.at[:, :num_outputs].set(p["pw"])
    hdw = hdw.at[:, num_outputs:num_outputs + 1].set(p["vw"])
    hdb = jnp.zeros((1, head_pad), f32)
    hdb = hdb.at[:, :num_outputs].set(p["pb"])
    hdb = hdb.at[:, num_outputs:num_outputs + 1].set(p["vb"])

    # TODO(synk): cache this bf16 pack and keep it VMEM-resident across calls
    # (cross-pallas_call prefetch, P10) instead of re-preparing/re-DMAing.
    return [
        p["cw1"].astype(bf16), p["cb1"].astype(f32),
        p["cw2"].astype(bf16), p["cb2"].astype(f32),
        p["jw1"].astype(bf16), p["jb1"].astype(f32),
        p["jw2"].astype(bf16), p["jb2"].astype(f32),
        p["sw1"].astype(f32), p["sb1"].astype(f32),        # K=50 layer stays f32
        p["sw2"].astype(bf16), p["sb2"].astype(f32),
        hw1c.astype(bf16), hw1j.astype(bf16), hw1sm.astype(bf16),
        p["hb1"].astype(f32),
        p["hw2"].astype(bf16), p["hb2"].astype(f32),
        hdw.astype(bf16), hdb.astype(f32),
    ]


@functools.partial(jax.jit, static_argnames=("batch_tile",))
def balatro_forward(cards, jokers, game_state, memgraph, action_mask, params,
                    batch_tile=None):
    B = cards.shape[0]
    num_outputs = params["pw"].shape[1]
    head_pad = max(128, _round_up(num_outputs + 1, 128))

    # Adaptive batch tile.  B < 32: single full-array block.  B >= 32: at least
    # two grid steps (both v7x TCs), 16-row multiples, cap 256 / 512.
    if batch_tile is None:
        if B < 32:
            batch_tile = B
        else:
            cap = 512 if B >= 2048 else 256
            batch_tile = min(cap, _round_up((B + 1) // 2, 16))
    grid = (pl.cdiv(B, batch_tile),)    # ragged last block: no wrapper padding

    # Activations stream at source dtype; bf16 cast happens inside the kernel.
    cards_flat = cards.reshape(B, -1)          # (B, 208)  contiguous -> free
    jokers_flat = jokers.reshape(B, -1)        # (B, 1200) contiguous -> free
    data = [cards_flat, jokers_flat, game_state, memgraph, action_mask]
    weights = _prepare_params(params, head_pad)

    dspec = lambda feat: pl.BlockSpec((batch_tile, feat), lambda i: (i, 0))
    wspec = lambda w: pl.BlockSpec(w.shape, lambda i: (0, 0))

    out = pl.pallas_call(
        _balatro_kernel,
        grid=grid,
        in_specs=[dspec(x.shape[1]) for x in data] + [wspec(w) for w in weights],
        out_specs=dspec(head_pad),
        out_shape=jax.ShapeDtypeStruct((B, head_pad), jnp.float32),
        compiler_params=pltpu.CompilerParams(
            dimension_semantics=("parallel",),
            vmem_limit_bytes=_VMEM_LIMIT_BYTES,
        ),
    )(*data, *weights)

    logits = out[:, :num_outputs]
    value = out[:, num_outputs:num_outputs + 1]
    return logits, value


def reference_forward(cards, jokers, game_state, memgraph, action_mask, p):
    """Pure-JAX f32 reference replicating the PyTorch forward exactly."""
    B = cards.shape[0]
    relu = lambda z: jnp.maximum(z, 0.0)
    lin = lambda x, w, b: x @ w + b
    c = relu(lin(relu(lin(cards.reshape(B, -1), p["cw1"], p["cb1"])), p["cw2"], p["cb2"]))
    j = relu(lin(relu(lin(jokers.reshape(B, -1), p["jw1"], p["jb1"])), p["jw2"], p["jb2"]))
    s = relu(lin(relu(lin(game_state, p["sw1"], p["sb1"])), p["sw2"], p["sb2"]))
    comb = jnp.concatenate([c, j, s, memgraph], axis=1)
    h = relu(lin(comb, p["hw1"], p["hb1"]))
    h = relu(lin(h, p["hw2"], p["hb2"]))
    logits = lin(h, p["pw"], p["pb"]) + jnp.maximum(jnp.log(action_mask), -1e10)
    value = lin(h, p["vw"], p["vb"])
    return logits, value


def _check(B, num_outputs, params, key, atol=5e-2, rtol=5e-2):
    kc, kj, kg, km, ka = jax.random.split(key, 5)
    cards = jax.random.normal(kc, (B, 52, 4), jnp.float32)
    jokers = jax.random.normal(kj, (B, 150, 8), jnp.float32)
    game_state = jax.random.normal(kg, (B, STATE_IN), jnp.float32)
    memgraph = jax.random.normal(km, (B, MEM_DIM), jnp.float32)
    action_mask = jax.random.bernoulli(ka, 0.7, (B, num_outputs)).astype(jnp.float32)
    action_mask = action_mask.at[:, 0].set(1.0)   # >=1 legal action per row

    logits, value = balatro_forward(cards, jokers, game_state, memgraph,
                                    action_mask, params)
    jax.block_until_ready((logits, value))

    ref_logits, ref_value = reference_forward(cards, jokers, game_state,
                                              memgraph, action_mask, params)
    assert logits.shape == (B, num_outputs) and value.shape == (B, 1)
    # Compare only unmasked logits (masked entries are ~-1e10 on both sides and
    # would trivially pass any rtol); check masked entries are heavily penalized.
    legal = action_mask > 0
    assert jnp.allclose(jnp.where(legal, logits, 0.0),
                        jnp.where(legal, ref_logits, 0.0),
                        atol=atol, rtol=rtol), "unmasked logits mismatch"
    assert bool(jnp.all(jnp.where(legal, True, logits < -1e9))), "mask penalty missing"
    assert jnp.allclose(value, ref_value, atol=atol, rtol=rtol), "value mismatch"
    _ = value[:, 0]  # value_function() equivalent: squeeze(1)


if __name__ == "__main__":
    NUM_OUTPUTS = 32
    key = jax.random.PRNGKey(0)
    kp, k1, k2 = jax.random.split(key, 3)
    params = init_params(kp, NUM_OUTPUTS)

    # Small-batch check: single full-array block, grid=1.
    _check(8, NUM_OUTPUTS, params, k1)
    # Multi-tile check: B=40 -> tile 32, grid 2 with a ragged last block.
    _check(40, NUM_OUTPUTS, params, k2)

    print("KERNEL_OK")
</pallas_src>

<mosaic_0001>
module attributes {stable_mosaic.version = 11 : i64} {
  func.func @_balatro_kernel(%arg0: i32, %arg1: memref<8x208xf32, #tpu.memory_space<vmem>>, %arg2: memref<8x1200xf32, #tpu.memory_space<vmem>>, %arg3: memref<8x50xf32, #tpu.memory_space<vmem>>, %arg4: memref<8x128xf32, #tpu.memory_space<vmem>>, %arg5: memref<8x32xf32, #tpu.memory_space<vmem>>, %arg6: memref<208x256xbf16, #tpu.memory_space<vmem>>, %arg7: memref<1x256xf32, #tpu.memory_space<vmem>>, %arg8: memref<256x128xbf16, #tpu.memory_space<vmem>>, %arg9: memref<1x128xf32, #tpu.memory_space<vmem>>, %arg10: memref<1200x512xbf16, #tpu.memory_space<vmem>>, %arg11: memref<1x512xf32, #tpu.memory_space<vmem>>, %arg12: memref<512x256xbf16, #tpu.memory_space<vmem>>, %arg13: memref<1x256xf32, #tpu.memory_space<vmem>>, %arg14: memref<50x128xf32, #tpu.memory_space<vmem>>, %arg15: memref<1x128xf32, #tpu.memory_space<vmem>>, %arg16: memref<128x64xbf16, #tpu.memory_space<vmem>>, %arg17: memref<1x64xf32, #tpu.memory_space<vmem>>, %arg18: memref<128x512xbf16, #tpu.memory_space<vmem>>, %arg19: memref<256x512xbf16, #tpu.memory_space<vmem>>, %arg20: memref<192x512xbf16, #tpu.memory_space<vmem>>, %arg21: memref<1x512xf32, #tpu.memory_space<vmem>>, %arg22: memref<512x512xbf16, #tpu.memory_space<vmem>>, %arg23: memref<1x512xf32, #tpu.memory_space<vmem>>, %arg24: memref<512x128xbf16, #tpu.memory_space<vmem>>, %arg25: memref<1x128xf32, #tpu.memory_space<vmem>>, %arg26: memref<8x128xf32, #tpu.memory_space<vmem>>) attributes {dimension_semantics = [#tpu.dimension_semantics<parallel>], iteration_bounds = array<i64: 1>, scalar_prefetch = 0 : i64, scratch_operands = 0 : i64, tpu.core_type = #tpu.core_type<tc>, window_params = [{transform_indices = @transform_0, window_bounds = array<i64: 8, 208>}, {transform_indices = @transform_1, window_bounds = array<i64: 8, 1200>}, {transform_indices = @transform_2, window_bounds = array<i64: 8, 50>}, {transform_indices = @transform_3, window_bounds = array<i64: 8, 128>}, {transform_indices = @transform_4, window_bounds = array<i64: 8, 32>}, {pipeline_mode = #tpu.pipeline_mode<synchronous>, transform_indices = @transform_5, window_bounds = array<i64: 208, 256>}, {pipeline_mode = #tpu.pipeline_mode<synchronous>, transform_indices = @transform_6, window_bounds = array<i64: 1, 256>}, {pipeline_mode = #tpu.pipeline_mode<synchronous>, transform_indices = @transform_7, window_bounds = array<i64: 256, 128>}, {pipeline_mode = #tpu.pipeline_mode<synchronous>, transform_indices = @transform_8, window_bounds = array<i64: 1, 128>}, {pipeline_mode = #tpu.pipeline_mode<synchronous>, transform_indices = @transform_9, window_bounds = array<i64: 1200, 512>}, {pipeline_mode = #tpu.pipeline_mode<synchronous>, transform_indices = @transform_10, window_bounds = array<i64: 1, 512>}, {pipeline_mode = #tpu.pipeline_mode<synchronous>, transform_indices = @transform_11, window_bounds = array<i64: 512, 256>}, {pipeline_mode = #tpu.pipeline_mode<synchronous>, transform_indices = @transform_12, window_bounds = array<i64: 1, 256>}, {pipeline_mode = #tpu.pipeline_mode<synchronous>, transform_indices = @transform_13, window_bounds = array<i64: 50, 128>}, {pipeline_mode = #tpu.pipeline_mode<synchronous>, transform_indices = @transform_14, window_bounds = array<i64: 1, 128>}, {pipeline_mode = #tpu.pipeline_mode<synchronous>, transform_indices = @transform_15, window_bounds = array<i64: 128, 64>}, {pipeline_mode = #tpu.pipeline_mode<synchronous>, transform_indices = @transform_16, window_bounds = array<i64: 1, 64>}, {pipeline_mode = #tpu.pipeline_mode<synchronous>, transform_indices = @transform_17, window_bounds = array<i64: 128, 512>}, {pipeline_mode = #tpu.pipeline_mode<synchronous>, transform_indices = @transform_18, window_bounds = array<i64: 256, 512>}, {pipeline_mode = #tpu.pipeline_mode<synchronous>, transform_indices = @transform_19, window_bounds = array<i64: 192, 512>}, {pipeline_mode = #tpu.pipeline_mode<synchronous>, transform_indices = @transform_20, window_bounds = array<i64: 1, 512>}, {pipeline_mode = #tpu.pipeline_mode<synchronous>, transform_indices = @transform_21, window_bounds = array<i64: 512, 512>}, {pipeline_mode = #tpu.pipeline_mode<synchronous>, transform_indices = @transform_22, window_bounds = array<i64: 1, 512>}, {pipeline_mode = #tpu.pipeline_mode<synchronous>, transform_indices = @transform_23, window_bounds = array<i64: 512, 128>}, {pipeline_mode = #tpu.pipeline_mode<synchronous>, transform_indices = @transform_24, window_bounds = array<i64: 1, 128>}, {transform_indices = @transform_25, window_bounds = array<i64: 8, 128>}]} {
    %c0 = arith.constant 0 : index
    %c0_0 = arith.constant 0 : index
    %0 = vector.load %arg1[%c0, %c0_0] : memref<8x208xf32, #tpu.memory_space<vmem>>, vector<8x208xf32>
    %1 = arith.truncf %0 : vector<8x208xf32> to vector<8x208xbf16>
    %c0_1 = arith.constant 0 : index
    %c0_2 = arith.constant 0 : index
    %2 = vector.load %arg6[%c0_1, %c0_2] : memref<208x256xbf16, #tpu.memory_space<vmem>>, vector<208x256xbf16>
    %cst = arith.constant dense<0.000000e+00> : vector<8x256xf32>
    %3 = tpu.matmul %1, %2, %cst {dimension_numbers = #tpu.dot_dimension_numbers<[1], [0], [0], [1], [0, 0, 1, 1], [], []>} : vector<8x208xbf16>, vector<208x256xbf16>, vector<8x256xf32> -> vector<8x256xf32>
    %c0_3 = arith.constant 0 : index
    %c0_4 = arith.constant 0 : index
    %4 = vector.load %arg7[%c0_3, %c0_4] : memref<1x256xf32, #tpu.memory_space<vmem>>, vector<1x256xf32>
    %5 = vector.broadcast %4 : vector<1x256xf32> to vector<8x256xf32>
    %6 = arith.addf %3, %5 : vector<8x256xf32>
    %cst_5 = arith.constant 0.000000e+00 : f32
    %7 = vector.broadcast %cst_5 : f32 to vector<8x256xf32>
    %8 = arith.maximumf %6, %7 : vector<8x256xf32>
    %9 = arith.truncf %8 : vector<8x256xf32> to vector<8x256xbf16>
    %c0_6 = arith.constant 0 : index
    %c0_7 = arith.constant 0 : index
    %10 = vector.load %arg8[%c0_6, %c0_7] : memref<256x128xbf16, #tpu.memory_space<vmem>>, vector<256x128xbf16>
    %cst_8 = arith.constant dense<0.000000e+00> : vector<8x128xf32>
    %11 = tpu.matmul %9, %10, %cst_8 {dimension_numbers = #tpu.dot_dimension_numbers<[1], [0], [0], [1], [0, 0, 1, 1], [], []>} : vector<8x256xbf16>, vector<256x128xbf16>, vector<8x128xf32> -> vector<8x128xf32>
    %c0_9 = arith.constant 0 : index
    %c0_10 = arith.constant 0 : index
    %12 = vector.load %arg9[%c0_9, %c0_10] : memref<1x128xf32, #tpu.memory_space<vmem>>, vector<1x128xf32>
    %13 = vector.broadcast %12 : vector<1x128xf32> to vector<8x128xf32>
    %14 = arith.addf %11, %13 : vector<8x128xf32>
    %cst_11 = arith.constant 0.000000e+00 : f32
    %15 = vector.broadcast %cst_11 : f32 to vector<8x128xf32>
    %16 = arith.maximumf %14, %15 : vector<8x128xf32>
    %c0_12 = arith.constant 0 : index
    %c0_13 = arith.constant 0 : index
    %17 = vector.load %arg2[%c0_12, %c0_13] : memref<8x1200xf32, #tpu.memory_space<vmem>>, vector<8x1200xf32>
    %18 = arith.truncf %17 : vector<8x1200xf32> to vector<8x1200xbf16>
    %c0_14 = arith.constant 0 : index
    %c0_15 = arith.constant 0 : index
    %19 = vector.load %arg10[%c0_14, %c0_15] : memref<1200x512xbf16, #tpu.memory_space<vmem>>, vector<1200x512xbf16>
    %cst_16 = arith.constant dense<0.000000e+00> : vector<8x512xf32>
    %20 = tpu.matmul %18, %19, %cst_16 {dimension_numbers = #tpu.dot_dimension_numbers<[1], [0], [0], [1], [0, 0, 1, 1], [], []>} : vector<8x1200xbf16>, vector<1200x512xbf16>, vector<8x512xf32> -> vector<8x512xf32>
    %c0_17 = arith.constant 0 : index
    %c0_18 = arith.constant 0 : index
    %21 = vector.load %arg11[%c0_17, %c0_18] : memref<1x512xf32, #tpu.memory_space<vmem>>, vector<1x512xf32>
    %22 = vector.broadcast %21 : vector<1x512xf32> to vector<8x512xf32>
    %23 = arith.addf %20, %22 : vector<8x512xf32>
    %cst_19 = arith.constant 0.000000e+00 : f32
    %24 = vector.broadcast %cst_19 : f32 to vector<8x512xf32>
    %25 = arith.maximumf %23, %24 : vector<8x512xf32>
    %26 = arith.truncf %25 : vector<8x512xf32> to vector<8x512xbf16>
    %c0_20 = arith.constant 0 : index
    %c0_21 = arith.constant 0 : index
    %27 = vector.load %arg12[%c0_20, %c0_21] : memref<512x256xbf16, #tpu.memory_space<vmem>>, vector<512x256xbf16>
    %cst_22 = arith.constant dense<0.000000e+00> : vector<8x256xf32>
    %28 = tpu.matmul %26, %27, %cst_22 {dimension_numbers = #tpu.dot_dimension_numbers<[1], [0], [0], [1], [0, 0, 1, 1], [], []>} : vector<8x512xbf16>, vector<512x256xbf16>, vector<8x256xf32> -> vector<8x256xf32>
    %c0_23 = arith.constant 0 : index
    %c0_24 = arith.constant 0 : index
    %29 = vector.load %arg13[%c0_23, %c0_24] : memref<1x256xf32, #tpu.memory_space<vmem>>, vector<1x256xf32>
    %30 = vector.broadcast %29 : vector<1x256xf32> to vector<8x256xf32>
    %31 = arith.addf %28, %30 : vector<8x256xf32>
    %cst_25 = arith.constant 0.000000e+00 : f32
    %32 = vector.broadcast %cst_25 : f32 to vector<8x256xf32>
    %33 = arith.maximumf %31, %32 : vector<8x256xf32>
    %c0_26 = arith.constant 0 : index
    %c0_27 = arith.constant 0 : index
    %34 = vector.load %arg3[%c0_26, %c0_27] : memref<8x50xf32, #tpu.memory_space<vmem>>, vector<8x50xf32>
    %c0_28 = arith.constant 0 : index
    %c0_29 = arith.constant 0 : index
    %35 = vector.load %arg14[%c0_28, %c0_29] : memref<50x128xf32, #tpu.memory_space<vmem>>, vector<50x128xf32>
    %cst_30 = arith.constant dense<0.000000e+00> : vector<8x128xf32>
    %36 = tpu.matmul %34, %35, %cst_30 {dimension_numbers = #tpu.dot_dimension_numbers<[1], [0], [0], [1], [0, 0, 1, 1], [], []>} : vector<8x50xf32>, vector<50x128xf32>, vector<8x128xf32> -> vector<8x128xf32>
    %c0_31 = arith.constant 0 : index
    %c0_32 = arith.constant 0 : index
    %37 = vector.load %arg15[%c0_31, %c0_32] : memref<1x128xf32, #tpu.memory_space<vmem>>, vector<1x128xf32>
    %38 = vector.broadcast %37 : vector<1x128xf32> to vector<8x128xf32>
    %39 = arith.addf %36, %38 : vector<8x128xf32>
    %cst_33 = arith.constant 0.000000e+00 : f32
    %40 = vector.broadcast %cst_33 : f32 to vector<8x128xf32>
    %41 = arith.maximumf %39, %40 : vector<8x128xf32>
    %42 = arith.truncf %41 : vector<8x128xf32> to vector<8x128xbf16>
    %c0_34 = arith.constant 0 : index
    %c0_35 = arith.constant 0 : index
    %43 = vector.load %arg16[%c0_34, %c0_35] : memref<128x64xbf16, #tpu.memory_space<vmem>>, vector<128x64xbf16>
    %cst_36 = arith.constant dense<0.000000e+00> : vector<8x64xf32>
    %44 = tpu.matmul %42, %43, %cst_36 {dimension_numbers = #tpu.dot_dimension_numbers<[1], [0], [0], [1], [0, 0, 1, 1], [], []>} : vector<8x128xbf16>, vector<128x64xbf16>, vector<8x64xf32> -> vector<8x64xf32>
    %c0_37 = arith.constant 0 : index
    %c0_38 = arith.constant 0 : index
    %45 = vector.load %arg17[%c0_37, %c0_38] : memref<1x64xf32, #tpu.memory_space<vmem>>, vector<1x64xf32>
    %46 = vector.broadcast %45 : vector<1x64xf32> to vector<8x64xf32>
    %47 = arith.addf %44, %46 : vector<8x64xf32>
    %cst_39 = arith.constant 0.000000e+00 : f32
    %48 = vector.broadcast %cst_39 : f32 to vector<8x64xf32>
    %49 = arith.maximumf %47, %48 : vector<8x64xf32>
    %c0_40 = arith.constant 0 : index
    %c0_41 = arith.constant 0 : index
    %50 = vector.load %arg4[%c0_40, %c0_41] : memref<8x128xf32, #tpu.memory_space<vmem>>, vector<8x128xf32>
    %51 = tpu.concatenate %49, %50 in 1 : vector<8x64xf32>, vector<8x128xf32> -> vector<8x192xf32>
    %52 = arith.truncf %51 : vector<8x192xf32> to vector<8x192xbf16>
    %53 = arith.truncf %16 : vector<8x128xf32> to vector<8x128xbf16>
    %c0_42 = arith.constant 0 : index
    %c0_43 = arith.constant 0 : index
    %54 = vector.load %arg18[%c0_42, %c0_43] : memref<128x512xbf16, #tpu.memory_space<vmem>>, vector<128x512xbf16>
    %cst_44 = arith.constant dense<0.000000e+00> : vector<8x512xf32>
    %55 = tpu.matmul %53, %54, %cst_44 {dimension_numbers = #tpu.dot_dimension_numbers<[1], [0], [0], [1], [0, 0, 1, 1], [], []>} : vector<8x128xbf16>, vector<128x512xbf16>, vector<8x512xf32> -> vector<8x512xf32>
    %56 = arith.truncf %33 : vector<8x256xf32> to vector<8x256xbf16>
    %c0_45 = arith.constant 0 : index
    %c0_46 = arith.constant 0 : index
    %57 = vector.load %arg19[%c0_45, %c0_46] : memref<256x512xbf16, #tpu.memory_space<vmem>>, vector<256x512xbf16>
    %cst_47 = arith.constant dense<0.000000e+00> : vector<8x512xf32>
    %58 = tpu.matmul %56, %57, %cst_47 {dimension_numbers = #tpu.dot_dimension_numbers<[1], [0], [0], [1], [0, 0, 1, 1], [], []>} : vector<8x256xbf16>, vector<256x512xbf16>, vector<8x512xf32> -> vector<8x512xf32>
    %59 = arith.addf %55, %58 : vector<8x512xf32>
    %c0_48 = arith.constant 0 : index
    %c0_49 = arith.constant 0 : index
    %60 = vector.load %arg20[%c0_48, %c0_49] : memref<192x512xbf16, #tpu.memory_space<vmem>>, vector<192x512xbf16>
    %cst_50 = arith.constant dense<0.000000e+00> : vector<8x512xf32>
    %61 = tpu.matmul %52, %60, %cst_50 {dimension_numbers = #tpu.dot_dimension_numbers<[1], [0], [0], [1], [0, 0, 1, 1], [], []>} : vector<8x192xbf16>, vector<192x512xbf16>, vector<8x512xf32> -> vector<8x512xf32>
    %62 = arith.addf %59, %61 : vector<8x512xf32>
    %c0_51 = arith.constant 0 : index
    %c0_52 = arith.constant 0 : index
    %63 = vector.load %arg21[%c0_51, %c0_52] : memref<1x512xf32, #tpu.memory_space<vmem>>, vector<1x512xf32>
    %64 = vector.broadcast %63 : vector<1x512xf32> to vector<8x512xf32>
    %65 = arith.addf %62, %64 : vector<8x512xf32>
    %cst_53 = arith.constant 0.000000e+00 : f32
    %66 = vector.broadcast %cst_53 : f32 to vector<8x512xf32>
    %67 = arith.maximumf %65, %66 : vector<8x512xf32>
    %68 = arith.truncf %67 : vector<8x512xf32> to vector<8x512xbf16>
    %c0_54 = arith.constant 0 : index
    %c0_55 = arith.constant 0 : index
    %69 = vector.load %arg22[%c0_54, %c0_55] : memref<512x512xbf16, #tpu.memory_space<vmem>>, vector<512x512xbf16>
    %cst_56 = arith.constant dense<0.000000e+00> : vector<8x512xf32>
    %70 = tpu.matmul %68, %69, %cst_56 {dimension_numbers = #tpu.dot_dimension_numbers<[1], [0], [0], [1], [0, 0, 1, 1], [], []>} : vector<8x512xbf16>, vector<512x512xbf16>, vector<8x512xf32> -> vector<8x512xf32>
    %c0_57 = arith.constant 0 : index
    %c0_58 = arith.constant 0 : index
    %71 = vector.load %arg23[%c0_57, %c0_58] : memref<1x512xf32, #tpu.memory_space<vmem>>, vector<1x512xf32>
    %72 = vector.broadcast %71 : vector<1x512xf32> to vector<8x512xf32>
    %73 = arith.addf %70, %72 : vector<8x512xf32>
    %cst_59 = arith.constant 0.000000e+00 : f32
    %74 = vector.broadcast %cst_59 : f32 to vector<8x512xf32>
    %75 = arith.maximumf %73, %74 : vector<8x512xf32>
    %76 = arith.truncf %75 : vector<8x512xf32> to vector<8x512xbf16>
    %c0_60 = arith.constant 0 : index
    %c0_61 = arith.constant 0 : index
    %77 = vector.load %arg24[%c0_60, %c0_61] : memref<512x128xbf16, #tpu.memory_space<vmem>>, vector<512x128xbf16>
    %cst_62 = arith.constant dense<0.000000e+00> : vector<8x128xf32>
    %78 = tpu.matmul %76, %77, %cst_62 {dimension_numbers = #tpu.dot_dimension_numbers<[1], [0], [0], [1], [0, 0, 1, 1], [], []>} : vector<8x512xbf16>, vector<512x128xbf16>, vector<8x128xf32> -> vector<8x128xf32>
    %c0_63 = arith.constant 0 : index
    %c0_64 = arith.constant 0 : index
    %79 = vector.load %arg25[%c0_63, %c0_64] : memref<1x128xf32, #tpu.memory_space<vmem>>, vector<1x128xf32>
    %80 = vector.broadcast %79 : vector<1x128xf32> to vector<8x128xf32>
    %81 = arith.addf %78, %80 : vector<8x128xf32>
    %c0_65 = arith.constant 0 : index
    %c0_66 = arith.constant 0 : index
    %82 = vector.load %arg5[%c0_65, %c0_66] : memref<8x32xf32, #tpu.memory_space<vmem>>, vector<8x32xf32>
    %cst_67 = arith.constant 0.000000e+00 : f32
    %83 = vector.broadcast %cst_67 : f32 to vector<8x32xf32>
    %84 = arith.cmpf ogt, %82, %83 : vector<8x32xf32>
    %cst_68 = arith.constant 0.000000e+00 : f32
    %cst_69 = arith.constant -1.000000e+10 : f32
    %85 = vector.broadcast %cst_68 : f32 to vector<8x32xf32>
    %86 = vector.broadcast %cst_69 : f32 to vector<8x32xf32>
    %87 = arith.select %84, %85, %86 : vector<8x32xi1>, vector<8x32xf32>
    %cst_70 = arith.constant 0.000000e+00 : f32
    %88 = vector.broadcast %cst_70 : f32 to vector<8x96xf32>
    %89 = tpu.concatenate %87, %88 in 1 : vector<8x32xf32>, vector<8x96xf32> -> vector<8x128xf32>
    %90 = arith.addf %81, %89 : vector<8x128xf32>
    %c0_71 = arith.constant 0 : index
    %c0_72 = arith.constant 0 : index
    %91 = vector.load %arg26[%c0_71, %c0_72] : memref<8x128xf32, #tpu.memory_space<vmem>>, vector<8x128xf32>
    tpu.vector_store %arg26[%c0_71, %c0_72], %90 {strides = array<i32>} : memref<8x128xf32, #tpu.memory_space<vmem>>, vector<8x128xf32>,
    return
  }
  func.func @transform_0(%arg0: i32) -> (i32, i32) {
    %c0_i32 = arith.constant 0 : i32
    %c0_i32_0 = arith.constant 0 : i32
    return %arg0, %c0_i32 : i32, i32
  }
  func.func @transform_1(%arg0: i32) -> (i32, i32) {
    %c0_i32 = arith.constant 0 : i32
    %c0_i32_0 = arith.constant 0 : i32
    return %arg0, %c0_i32 : i32, i32
  }
  func.func @transform_2(%arg0: i32) -> (i32, i32) {
    %c0_i32 = arith.constant 0 : i32
    %c0_i32_0 = arith.constant 0 : i32
    return %arg0, %c0_i32 : i32, i32
  }
  func.func @transform_3(%arg0: i32) -> (i32, i32) {
    %c0_i32 = arith.constant 0 : i32
    %c0_i32_0 = arith.constant 0 : i32
    return %arg0, %c0_i32 : i32, i32
  }
  func.func @transform_4(%arg0: i32) -> (i32, i32) {
    %c0_i32 = arith.constant 0 : i32
    %c0_i32_0 = arith.constant 0 : i32
    return %arg0, %c0_i32 : i32, i32
  }
  func.func @transform_5(%arg0: i32) -> (i32, i32) {
    %c0_i32 = arith.constant 0 : i32
    %c0_i32_0 = arith.constant 0 : i32
    %c0_i32_1 = arith.constant 0 : i32
    return %c0_i32, %c0_i32_0 : i32, i32
  }
  func.func @transform_6(%arg0: i32) -> (i32, i32) {
    %c0_i32 = arith.constant 0 : i32
    %c0_i32_0 = arith.constant 0 : i32
    %c0_i32_1 = arith.constant 0 : i32
    return %c0_i32, %c0_i32_0 : i32, i32
  }
  func.func @transform_7(%arg0: i32) -> (i32, i32) {
    %c0_i32 = arith.constant 0 : i32
    %c0_i32_0 = arith.constant 0 : i32
    %c0_i32_1 = arith.constant 0 : i32
    return %c0_i32, %c0_i32_0 : i32, i32
  }
  func.func @transform_8(%arg0: i32) -> (i32, i32) {
    %c0_i32 = arith.constant 0 : i32
    %c0_i32_0 = arith.constant 0 : i32
    %c0_i32_1 = arith.constant 0 : i32
    return %c0_i32, %c0_i32_0 : i32, i32
  }
  func.func @transform_9(%arg0: i32) -> (i32, i32) {
    %c0_i32 = arith.constant 0 : i32
    %c0_i32_0 = arith.constant 0 : i32
    %c0_i32_1 = arith.constant 0 : i32
    return %c0_i32, %c0_i32_0 : i32, i32
  }
  func.func @transform_10(%arg0: i32) -> (i32, i32) {
    %c0_i32 = arith.constant 0 : i32
    %c0_i32_0 = arith.constant 0 : i32
    %c0_i32_1 = arith.constant 0 : i32
    return %c0_i32, %c0_i32_0 : i32, i32
  }
  func.func @transform_11(%arg0: i32) -> (i32, i32) {
    %c0_i32 = arith.constant 0 : i32
    %c0_i32_0 = arith.constant 0 : i32
    %c0_i32_1 = arith.constant 0 : i32
    return %c0_i32, %c0_i32_0 : i32, i32
  }
  func.func @transform_12(%arg0: i32) -> (i32, i32) {
    %c0_i32 = arith.constant 0 : i32
    %c0_i32_0 = arith.constant 0 : i32
    %c0_i32_1 = arith.constant 0 : i32
    return %c0_i32, %c0_i32_0 : i32, i32
  }
  func.func @transform_13(%arg0: i32) -> (i32, i32) {
    %c0_i32 = arith.constant 0 : i32
    %c0_i32_0 = arith.constant 0 : i32
    %c0_i32_1 = arith.constant 0 : i32
    return %c0_i32, %c0_i32_0 : i32, i32
  }
  func.func @transform_14(%arg0: i32) -> (i32, i32) {
    %c0_i32 = arith.constant 0 : i32
    %c0_i32_0 = arith.constant 0 : i32
    %c0_i32_1 = arith.constant 0 : i32
    return %c0_i32, %c0_i32_0 : i32, i32
  }
  func.func @transform_15(%arg0: i32) -> (i32, i32) {
    %c0_i32 = arith.constant 0 : i32
    %c0_i32_0 = arith.constant 0 : i32
    %c0_i32_1 = arith.constant 0 : i32
    return %c0_i32, %c0_i32_0 : i32, i32
  }
  func.func @transform_16(%arg0: i32) -> (i32, i32) {
    %c0_i32 = arith.constant 0 : i32
    %c0_i32_0 = arith.constant 0 : i32
    %c0_i32_1 = arith.constant 0 : i32
    return %c0_i32, %c0_i32_0 : i32, i32
  }
  func.func @transform_17(%arg0: i32) -> (i32, i32) {
    %c0_i32 = arith.constant 0 : i32
    %c0_i32_0 = arith.constant 0 : i32
    %c0_i32_1 = arith.constant 0 : i32
    return %c0_i32, %c0_i32_0 : i32, i32
  }
  func.func @transform_18(%arg0: i32) -> (i32, i32) {
    %c0_i32 = arith.constant 0 : i32
    %c0_i32_0 = arith.constant 0 : i32
    %c0_i32_1 = arith.constant 0 : i32
    return %c0_i32, %c0_i32_0 : i32, i32
  }
  func.func @transform_19(%arg0: i32) -> (i32, i32) {
    %c0_i32 = arith.constant 0 : i32
    %c0_i32_0 = arith.constant 0 : i32
    %c0_i32_1 = arith.constant 0 : i32
    return %c0_i32, %c0_i32_0 : i32, i32
  }
  func.func @transform_20(%arg0: i32) -> (i32, i32) {
    %c0_i32 = arith.constant 0 : i32
    %c0_i32_0 = arith.constant 0 : i32
    %c0_i32_1 = arith.constant 0 : i32
    return %c0_i32, %c0_i32_0 : i32, i32
  }
  func.func @transform_21(%arg0: i32) -> (i32, i32) {
    %c0_i32 = arith.constant 0 : i32
    %c0_i32_0 = arith.constant 0 : i32
    %c0_i32_1 = arith.constant 0 : i32
    return %c0_i32, %c0_i32_0 : i32, i32
  }
  func.func @transform_22(%arg0: i32) -> (i32, i32) {
    %c0_i32 = arith.constant 0 : i32
    %c0_i32_0 = arith.constant 0 : i32
    %c0_i32_1 = arith.constant 0 : i32
    return %c0_i32, %c0_i32_0 : i32, i32
  }
  func.func @transform_23(%arg0: i32) -> (i32, i32) {
    %c0_i32 = arith.constant 0 : i32
    %c0_i32_0 = arith.constant 0 : i32
    %c0_i32_1 = arith.constant 0 : i32
    return %c0_i32, %c0_i32_0 : i32, i32
  }
  func.func @transform_24(%arg0: i32) -> (i32, i32) {
    %c0_i32 = arith.constant 0 : i32
    %c0_i32_0 = arith.constant 0 : i32
    %c0_i32_1 = arith.constant 0 : i32
    return %c0_i32, %c0_i32_0 : i32, i32
  }
  func.func @transform_25(%arg0: i32) -> (i32, i32) {
    %c0_i32 = arith.constant 0 : i32
    %c0_i32_0 = arith.constant 0 : i32
    return %arg0, %c0_i32 : i32, i32
  }
}

</mosaic_0001>

<bundles_post_ra>
// kernel: balatro_forward.1
= control target key start
LH: loop header
LB: loop body
LE: loop exit
PB: predicated region body
PF: predicated region fallthrough
CT: control target
= control target key end

     0   :  { %vm247_vm0 = vcmask 654336   ;;  %vm2296_vm1 = vcmask 392192   ;;  %vm3340_vm2 = vcmask 1041408   ;;  %vm3336_vm3 = vcmask 408576   ;;  %s14201_s5 = inlined_call_operand.vmem [shape: bf16[208,256], index: 5, kind: input, shape index: {}]   ;;  %s14202_s0 = inlined_call_operand.vmem [shape: f32[8,208], index: 0, kind: input, shape index: {}]   ;;  %s14203_s9 = inlined_call_operand.vmem [shape: bf16[1200,512], index: 9, kind: input, shape index: {}]   ;;  %s14204_s1 = inlined_call_operand.vmem [shape: f32[8,1200], index: 1, kind: input, shape index: {}]   ;;  %s14205_s7 = inlined_call_operand.vmem [shape: bf16[256,128], index: 7, kind: input, shape index: {}]   ;;  %s14206_s6 = inlined_call_operand.vmem [shape: f32[1,256], index: 6, kind: input, shape index: {}]   ;;  %s14207_s8 = inlined_call_operand.vmem [shape: f32[1,128], index: 8, kind: input, shape index: {}]   ;;  %s14208_s11 = inlined_call_operand.vmem [shape: bf16[512,256], index: 11, kind: input, shape index: {}]   ;;  %s14209_s10 = inlined_call_operand.vmem [shape: f32[1,512], index: 10, kind: input, shape index: {}]   ;;  %s14210_s13 = inlined_call_operand.vmem [shape: f32[50,128], index: 13, kind: input, shape index: {}]   ;;  %s14211_s2 = inlined_call_operand.vmem [shape: f32[8,50], index: 2, kind: input, shape index: {}]   ;;  %s14212_s14 = inlined_call_operand.vmem [shape: f32[1,128], index: 14, kind: input, shape index: {}]   ;;  %s14213_s15 = inlined_call_operand.vmem [shape: bf16[128,64], index: 15, kind: input, shape index: {}]   ;;  %s14214_s18 = inlined_call_operand.vmem [shape: bf16[256,512], index: 18, kind: input, shape index: {}]   ;;  %s14215_s3 = inlined_call_operand.vmem [shape: f32[8,128], index: 3, kind: input, shape index: {}]   ;;  %s14216_s16 = inlined_call_operand.vmem [shape: f32[1,64], index: 16, kind: input, shape index: {}]   ;;  %s14217_s12 = inlined_call_operand.vmem [shape: f32[1,256], index: 12, kind: input, shape index: {}]   ;;  %s14218_s17 = inlined_call_operand.vmem [shape: bf16[128,512], index: 17, kind: input, shape index: {}]   ;;  %s14219_s19 = inlined_call_operand.vmem [shape: bf16[192,512], index: 19, kind: input, shape index: {}]   ;;  %s14220_s21 = inlined_call_operand.vmem [shape: bf16[512,512], index: 21, kind: input, shape index: {}]   ;;  %s14221_s20 = inlined_call_operand.vmem [shape: f32[1,512], index: 20, kind: input, shape index: {}]   ;;  %s14222_s23 = inlined_call_operand.vmem [shape: bf16[512,128], index: 23, kind: input, shape index: {}]   ;;  %s14223_s24 = inlined_call_operand.vmem [shape: f32[1,128], index: 24, kind: input, shape index: {}]   ;;  %s14224_s22 = inlined_call_operand.vmem [shape: f32[1,512], index: 22, kind: input, shape index: {}]   ;;  %s14225_s4 = inlined_call_operand.vmem [shape: f32[8,32], index: 4, kind: input, shape index: {}]   ;;  %s14226_s25 = inlined_call_operand.vmem [shape: f32[8,128], index: 25, kind: output, shape index: {}]  }
   0x1   :  { %14235 = sst [smem:[#allocation2_spill]] %s14201_s5  ;;  %vm3453_vm4 = vcmask 523264   ;;  %vm5922_vm6 = vcmask 261120  }
   0x2   :  { %14236 = sst [smem:[#allocation3_spill]] %s14202_s0 }
   0x3   :  { %14237 = sst [smem:[#allocation4_spill]] %s14203_s9 }
   0x4   :  { %14238 = sst [smem:[#allocation5_spill]] %s14204_s1 }
   0x5   :  { %14239 = sst [smem:[#allocation6_spill]] %s14205_s7 }
   0x6   :  { %14240 = sst [smem:[#allocation7_spill]] %s14206_s6 }
   0x7   :  { %14241 = sst [smem:[#allocation8_spill]] %s14207_s8 }
   0x8   :  { %14242 = sst [smem:[#allocation9_spill]] %s14208_s11 }
   0x9   :  { %14243 = sst [smem:[#allocation10_spill]] %s14209_s10 }
   0xa   :  { %14244 = sst [smem:[#allocation11_spill]] %s14210_s13 }
   0xb   :  { %s14245_s9 = sld [smem:[#allocation2_spill]] }
   0xc   :  { %s14246_s0 = sld [smem:[#allocation3_spill]] }
   0xd   :  { %s14247_s6 = sld [smem:[#allocation4_spill]] }
   0xe   :  { %s14249_s1 = sld [smem:[#allocation6_spill]] }
   0xf   :  { %s14251_s29 = sld [smem:[#allocation9_spill]] }
  0x10   :  { %s14252_s26 = sld [smem:[#allocation8_spill]] }
  0x11   :  { %v5988_v0 = vld [vmem:[%s14245_s9 + $0x70] sm:$0xf]  ;;  %v8829_v1 = vld [vmem:[%s14245_s9 + $0x74] sm:$0xf0]  ;;  %v8828_v2 = vld [vmem:[%s14245_s9 + $0x74] sm:$0xf] }
  0x12   :  { %v5989_v3 = vor.u32 %v8829_v1, %v5988_v0  ;;  %v5990_v4 = vld [vmem:[%s14245_s9 + $0x78] sm:$0xf0]  ;;  %v5980_v5 = vld [vmem:[%s14245_s9 + $0x60] sm:$0xf]  ;;  %v8827_v6 = vld [vmem:[%s14245_s9 + $0x64] sm:$0xf0] }
  0x13   :  { %v5993_v7 = vor.u32 %v8828_v2, %v5990_v4  ;;  %v8826_v8 = vld [vmem:[%s14245_s9 + $0x64] sm:$0xf]  ;;  %v5982_v9 = vld [vmem:[%s14245_s9 + $0x68] sm:$0xf0]  ;;  %v5981_v11 = vor.u32 %v8827_v6, %v5980_v5  ;;  %v5972_v13 = vld [vmem:[%s14245_s9 + $0x50] sm:$0xf] }
  0x14   :  { %v8838_v10 = vld [vmem:[%s14245_s9 + $0xc4] sm:$0xf]  ;;  %251 = vmatpush.bf16.msra.mxu0 %v5989_v3  ;;  %v6030_v12 = vld [vmem:[%s14245_s9 + $0xc8] sm:$0xf0]  ;;  %v8825_v14 = vld [vmem:[%s14245_s9 + $0x54] sm:$0xf0]  ;;  %v5985_v15 = vor.u32 %v8826_v8, %v5982_v9 }
  0x15   :  { %277 = vmatpush.bf16.msra.mxu2 %v5993_v7  ;;  %v6033_v16 = vor.u32 %v8838_v10, %v6030_v12  ;;  %v8824_v17 = vld [vmem:[%s14245_s9 + $0x54] sm:$0xf]  ;;  %v5974_v18 = vld [vmem:[%s14245_s9 + $0x58] sm:$0xf0]  ;;  %v6028_v21 = vld [vmem:[%s14245_s9 + $0xc0] sm:$0xf]  ;;  %v5973_v25 = vor.u32 %v8825_v14, %v5972_v13 }
  0x16   :  { %v8836_v19 = vld [vmem:[%s14245_s9 + $0xb4] sm:$0xf]  ;;  %v6022_v20 = vld [vmem:[%s14245_s9 + $0xb8] sm:$0xf0]  ;;  %v8839_v22 = vld [vmem:[%s14245_s9 + $0xc4] sm:$0xf0]  ;;  %v5977_v29 = vor.u32 %v8824_v17, %v5974_v18 }
  0x17   :  { %293 = vmatpush.bf16.msra.mxu3 %v6033_v16  ;;  %v6025_v23 = vor.u32 %v8836_v19, %v6022_v20  ;;  %v6029_v24 = vor.u32 %v8839_v22, %v6028_v21  ;;  %v5964_v26 = vld [vmem:[%s14245_s9 + $0x40] sm:$0xf]  ;;  %v8834_v27 = vld [vmem:[%s14245_s9 + $0xa4] sm:$0xf]  ;;  %v6014_v28 = vld [vmem:[%s14245_s9 + $0xa8] sm:$0xf0] }
  0x18   :  { %252 = vmatpush.bf16.msra.mxu0 %v5981_v11  ;;  %v8823_v30 = vld [vmem:[%s14245_s9 + $0x44] sm:$0xf0]  ;;  %v6020_v31 = vld [vmem:[%s14245_s9 + $0xb0] sm:$0xf]  ;;  %v8837_v32 = vld [vmem:[%s14245_s9 + $0xb4] sm:$0xf0]  ;;  %v6017_v36 = vor.u32 %v8834_v27, %v6014_v28 }
  0x19   :  { %278 = vmatpush.bf16.msra.mxu2 %v5985_v15  ;;  %267 = vmatpush.bf16.msra.mxu1 %v6029_v24  ;;  %v8822_v33 = vld [vmem:[%s14245_s9 + $0x44] sm:$0xf]  ;;  %v5966_v34 = vld [vmem:[%s14245_s9 + $0x48] sm:$0xf0]  ;;  %v6021_v35 = vor.u32 %v8837_v32, %v6020_v31  ;;  %v6012_v37 = vld [vmem:[%s14245_s9 + $0xa0] sm:$0xf]  ;;  %v5965_v38 = vor.u32 %v8823_v30, %v5964_v26 }
  0x1a   :  { %v8832_v39 = vld [vmem:[%s14245_s9 + $0x94] sm:$0xf]  ;;  %v6006_v40 = vld [vmem:[%s14245_s9 + $0x98] sm:$0xf0]  ;;  %v8835_v41 = vld [vmem:[%s14245_s9 + $0xa4] sm:$0xf0]  ;;  %v5969_v42 = vor.u32 %v8822_v33, %v5966_v34 }
  0x1b   :  { %294 = vmatpush.bf16.msra.mxu3 %v6025_v23  ;;  %v5956_v43 = vld [vmem:[%s14245_s9 + $0x30] sm:$0xf]  ;;  %v8821_v44 = vld [vmem:[%s14245_s9 + $0x34] sm:$0xf0]  ;;  %v8820_v45 = vld [vmem:[%s14245_s9 + $0x34] sm:$0xf]  ;;  %v6013_v46 = vor.u32 %v8835_v41, %v6012_v37  ;;  %v6009_v50 = vor.u32 %v8832_v39, %v6006_v40 }
  0x1c   :  { %253 = vmatpush.bf16.msra.mxu0 %v5973_v25  ;;  %v5958_v47 = vld [vmem:[%s14245_s9 + $0x38] sm:$0xf0]  ;;  %v6004_v48 = vld [vmem:[%s14245_s9 + $0x90] sm:$0xf]  ;;  %v8833_v49 = vld [vmem:[%s14245_s9 + $0x94] sm:$0xf0]  ;;  %v5957_v51 = vor.u32 %v8821_v44, %v5956_v43 }
  0x1d   :  { %279 = vmatpush.bf16.msra.mxu2 %v5977_v29  ;;  %268 = vmatpush.bf16.msra.mxu1 %v6021_v35  ;;  %v8830_v52 = vld [vmem:[%s14245_s9 + $0x84] sm:$0xf]  ;;  %v5998_v53 = vld [vmem:[%s14245_s9 + $0x88] sm:$0xf0]  ;;  %v5961_v54 = vor.u32 %v8820_v45, %v5958_v47  ;;  %v5948_v55 = vld [vmem:[%s14245_s9 + $0x20] sm:$0xf]  ;;  %v6005_v58 = vor.u32 %v8833_v49, %v6004_v48 }
  0x1e   :  { %v8819_v56 = vld [vmem:[%s14245_s9 + $0x24] sm:$0xf0]  ;;  %v8818_v57 = vld [vmem:[%s14245_s9 + $0x24] sm:$0xf]  ;;  %v5950_v59 = vld [vmem:[%s14245_s9 + $0x28] sm:$0xf0]  ;;  %v6001_v62 = vor.u32 %v8830_v52, %v5998_v53 }
  0x1f   :  { %295 = vmatpush.bf16.msra.mxu3 %v6017_v36  ;;  %v5996_v60 = vld [vmem:[%s14245_s9 + $0x80] sm:$0xf]  ;;  %v8831_v61 = vld [vmem:[%s14245_s9 + $0x84] sm:$0xf0]  ;;  %v5949_v0 = vor.u32 %v8819_v56, %v5948_v55  ;;  %v5953_v1 = vor.u32 %v8818_v57, %v5950_v59  ;;  %v5940_v2 = vld [vmem:[%s14245_s9 + $0x10] sm:$0xf] }
  0x20   :  { %254 = vmatpush.bf16.msra.mxu0 %v5965_v38  ;;  %v82_v63 = vld [vmem:[%s14246_s0 + $0x8] sm:$0xff]  ;;  %v8817_v3 = vld [vmem:[%s14245_s9 + $0x14] sm:$0xf0]  ;;  %v5997_v4 = vor.u32 %v8831_v61, %v5996_v60  ;;  %v8816_v5 = vld [vmem:[%s14245_s9 + $0x14] sm:$0xf]  ;;  %s14253_s28 = sld [smem:[#allocation10_spill]] }
  0x21   :  { %280 = vmatpush.bf16.msra.mxu2 %v5969_v42  ;;  %269 = vmatpush.bf16.msra.mxu1 %v6013_v46  ;;  %v5942_v6 = vld [vmem:[%s14245_s9 + $0x18] sm:$0xf0]  ;;  %v84_v7 = vpack.c.bf16 %v82_v63, %v82_v63  ;;  %v5941_v8 = vor.u32 %v8817_v3, %v5940_v2  ;;  %v5932_v10 = vld [vmem:[%s14245_s9] sm:$0xf]  ;;  %v8815_v11 = vld [vmem:[%s14245_s9 + $0x4] sm:$0xf0] }
  0x22   :  { %v5945_v9 = vor.u32 %v8816_v5, %v5942_v6  ;;  %v8814_v12 = vld [vmem:[%s14245_s9 + $0x4] sm:$0xf]  ;;  %v5934_v13 = vld [vmem:[%s14245_s9 + $0x8] sm:$0xf0]  ;;  %v6342_v14 = vld [vmem:[%s14247_s6 + $0x1e0] sm:$0xf]  ;;  %v5933_v16 = vor.u32 %v8815_v11, %v5932_v10 }
  0x23   :  { %296 = vmatpush.bf16.msra.mxu3 %v6009_v50  ;;  %v8918_v15 = vld [vmem:[%s14247_s6 + $0x1ec] sm:$0xf0]  ;;  %v81_v17 = vld [vmem:[%s14246_s0] sm:$0xff]  ;;  %v5937_v18 = vor.u32 %v8814_v12, %v5934_v13  ;;  %s14248_s0 = sld [smem:[#allocation5_spill]]  ;;  %v8847_v61 = vld [vmem:[%s14249_s1 + $0x38] sm:$0xff] }
  0x24   :  { %255 = vmatpush.bf16.msra.mxu0 %v5957_v51  ;;  %v6343_v19 = vor.u32 %v8918_v15, %v6342_v14  ;;  %v83_v20 = vpack.c.bf16 %v81_v17, %v81_v17  ;;  %v6326_v21 = vld [vmem:[%s14247_s6 + $0x1c0] sm:$0xf]  ;;  %v8914_v22 = vld [vmem:[%s14247_s6 + $0x1cc] sm:$0xf0]  ;;  %v8855_v2 = vld [vmem:[%s14249_s1 + $0x78] sm:$0xff]  ;;  %s14250_s9 = sld [smem:[#allocation7_spill]] }
  0x25   :  { %281 = vmatpush.bf16.msra.mxu2 %v5961_v54  ;;  %270 = vmatpush.bf16.msra.mxu1 %v6005_v58  ;;  %v6327_v23 = vor.u32 %v8914_v22, %v6326_v21  ;;  %v6310_v24 = vld [vmem:[%s14247_s6 + $0x1a0] sm:$0xf]  ;;  %v8910_v25 = vld [vmem:[%s14247_s6 + $0x1ac] sm:$0xf0] }
  0x26   :  { %v6311_v26 = vor.u32 %v8910_v25, %v6310_v24  ;;  %v6294_v27 = vld [vmem:[%s14247_s6 + $0x180] sm:$0xf]  ;;  %v8906_v28 = vld [vmem:[%s14247_s6 + $0x18c] sm:$0xf0]  ;;  %v8843_v24 = vld [vmem:[%s14249_s1 + $0x18] sm:$0xff] }
  0x27   :  { %297 = vmatpush.bf16.msra.mxu3 %v6001_v62  ;;  %v6295_v29 = vor.u32 %v8906_v28, %v6294_v27  ;;  %v6278_v30 = vld [vmem:[%s14247_s6 + $0x160] sm:$0xf]  ;;  %v8902_v31 = vld [vmem:[%s14247_s6 + $0x16c] sm:$0xf0]  ;;  %v8884_v27 = vld [vmem:[%s14247_s6 + $0xe4] sm:$0xf] }
  0x28   :  { %256 = vmatpush.bf16.msra.mxu0 %v5949_v0  ;;  %v6279_v32 = vor.u32 %v8902_v31, %v6278_v30  ;;  %v6262_v33 = vld [vmem:[%s14247_s6 + $0x140] sm:$0xf]  ;;  %v8898_v34 = vld [vmem:[%s14247_s6 + $0x14c] sm:$0xf0]  ;;  %v6216_v28 = vld [vmem:[%s14247_s6 + $0xf0] sm:$0xf0] }
  0x29   :  { %282 = vmatpush.bf16.msra.mxu2 %v5953_v1  ;;  %271 = vmatpush.bf16.msra.mxu1 %v5997_v4  ;;  %v6263_v35 = vor.u32 %v8898_v34, %v6262_v33  ;;  %v6246_v36 = vld [vmem:[%s14247_s6 + $0x120] sm:$0xf]  ;;  %v8894_v37 = vld [vmem:[%s14247_s6 + $0x12c] sm:$0xf0]  ;;  %v467_v44 = vld [vmem:[%s14248_s0 + $0x8] sm:$0xff] }
  0x2a   :  { %6035 = vmatmul.msk.bf16.vlgmr.msra.gmra.mxu3 %vm247_vm0, %v84_v7  ;;  %v6247_v38 = vor.u32 %v8894_v37, %v6246_v36  ;;  %v6230_v39 = vld [vmem:[%s14247_s6 + $0x100] sm:$0xf]  ;;  %v8890_v40 = vld [vmem:[%s14247_s6 + $0x10c] sm:$0xf0]  ;;  %v9898_v48 = vpack.c.bf16 %v467_v44, %v467_v44  ;;  %v471_v11 = vld [vmem:[%s14248_s0 + $0x28] sm:$0xff] }
  0x2b   :  { %v6854_v41 = vld [vmem:[%s14247_s6 + $0x5e0] sm:$0xf]  ;;  %v9046_v42 = vld [vmem:[%s14247_s6 + $0x5ec] sm:$0xf0]  ;;  %v6231_v43 = vor.u32 %v8890_v40, %v6230_v39  ;;  %452 = vmatpush.bf16.msrb.mxu3 %v8855_v2  ;;  %v8880_v36 = vld [vmem:[%s14247_s6 + $0xc4] sm:$0xf] }
  0x2c   :  { %257 = vmatpush.bf16.msra.mxu0 %v5941_v8  ;;  %6034 = vmatmul.msk.bf16.vlgmr.msra.gmra.mxu1 %vm247_vm0, %v84_v7  ;;  %v6855_v45 = vor.u32 %v9046_v42, %v6854_v41  ;;  %v6838_v46 = vld [vmem:[%s14247_s6 + $0x5c0] sm:$0xf]  ;;  %v9042_v47 = vld [vmem:[%s14247_s6 + $0x5cc] sm:$0xf0]  ;;  %v8845_v8 = vld [vmem:[%s14249_s1 + $0x28] sm:$0xff] }
  0x2d   :  { %283 = vmatpush.bf16.msra.mxu2 %v5945_v9  ;;  %v6839_v49 = vor.u32 %v9042_v47, %v6838_v46  ;;  %v6822_v50 = vld [vmem:[%s14247_s6 + $0x5a0] sm:$0xf]  ;;  %v9038_v51 = vld [vmem:[%s14247_s6 + $0x5ac] sm:$0xf0]  ;;  %439 = vmatpush.bf16.msrb.mxu1 %v8847_v61  ;;  %v6200_v37 = vld [vmem:[%s14247_s6 + $0xd0] sm:$0xf0] }
  0x2e   :  { %v6823_v52 = vor.u32 %v9038_v51, %v6822_v50  ;;  %v6806_v53 = vld [vmem:[%s14247_s6 + $0x580] sm:$0xf]  ;;  %v9034_v54 = vld [vmem:[%s14247_s6 + $0x58c] sm:$0xf0]  ;;  %v8851_v39 = vld [vmem:[%s14249_s1 + $0x58] sm:$0xff] }
  0x2f   :  { %v6807_v55 = vor.u32 %v9034_v54, %v6806_v53  ;;  %v6790_v56 = vld [vmem:[%s14247_s6 + $0x560] sm:$0xf]  ;;  %v9030_v57 = vld [vmem:[%s14247_s6 + $0x56c] sm:$0xf0]  ;;  %v8841_v40 = vld [vmem:[%s14249_s1 + $0x8] sm:$0xff] }
  0x30   :  { %258 = vmatpush.bf16.msra.mxu0 %v5933_v16  ;;  %v6791_v58 = vor.u32 %v9030_v57, %v6790_v56  ;;  %v6774_v59 = vld [vmem:[%s14247_s6 + $0x540] sm:$0xf]  ;;  %v9026_v60 = vld [vmem:[%s14247_s6 + $0x54c] sm:$0xf0]  ;;  %v8876_v44 = vld [vmem:[%s14247_s6 + $0xa4] sm:$0xf] }
  0x31   :  { %284 = vmatpush.bf16.msra.mxu2 %v5937_v18  ;;  %v6775_v62 = vor.u32 %v9026_v60, %v6774_v59  ;;  %v6758_v63 = vld [vmem:[%s14247_s6 + $0x520] sm:$0xf]  ;;  %v9022_v0 = vld [vmem:[%s14247_s6 + $0x52c] sm:$0xf0]  ;;  %v9976_v18 = vpack.c.bf16 %v471_v11, %v471_v11  ;;  %v6184_v46 = vld [vmem:[%s14247_s6 + $0xb0] sm:$0xf0] }
  0x32   :  { %v8846_v1 = vld [vmem:[%s14249_s1 + $0x30] sm:$0xff]  ;;  %v6759_v3 = vor.u32 %v9022_v0, %v6758_v63  ;;  %v6742_v4 = vld [vmem:[%s14247_s6 + $0x500] sm:$0xf]  ;;  %v475_v50 = vld [vmem:[%s14248_s0 + $0x48] sm:$0xff]  ;;  %v6187_v54 = vor.u32 %v8876_v44, %v6184_v46 }
  0x33   :  { %259 = vmatmul.bf16.vlgmr.msra.gmra.mxu0 %v83_v20  ;;  %440 = vmatpush.bf16.msrb.mxu1 %v8846_v1  ;;  %v9018_v5 = vld [vmem:[%s14247_s6 + $0x50c] sm:$0xf0]  ;;  %v7286_v6 = vld [vmem:[%s14247_s6 + $0x940] sm:$0xf]  ;;  %v6168_v56 = vld [vmem:[%s14247_s6 + $0x90] sm:$0xf0]  ;;  %v10060_v57 = vpack.c.bf16 %v475_v50, %v475_v50 }
  0x34   :  { %285 = vmatmul.bf16.vlgmr.msra.gmra.mxu2 %v83_v20  ;;  %v9154_v7 = vld [vmem:[%s14247_s6 + $0x94c] sm:$0xf0]  ;;  %v6743_v10 = vor.u32 %v9018_v5, %v6742_v4  ;;  %v7270_v13 = vld [vmem:[%s14247_s6 + $0x920] sm:$0xf]  ;;  %v8853_v20 = vld [vmem:[%s14249_s1 + $0x68] sm:$0xff] }
  0x35   :  { %2313 = vmatpush.bf16.msrb.mxu2 %v6343_v19  ;;  %v8854_v9 = vld [vmem:[%s14249_s1 + $0x70] sm:$0xff]  ;;  %v7287_v12 = vor.u32 %v9154_v7, %v7286_v6  ;;  %v8844_v15 = vld [vmem:[%s14249_s1 + $0x20] sm:$0xff]  ;;  %v8849_v60 = vld [vmem:[%s14249_s1 + $0x48] sm:$0xff] }
  0x36   :  { %v9150_v14 = vld [vmem:[%s14247_s6 + $0x92c] sm:$0xf0]  ;;  %453 = vmatpush.bf16.msrb.mxu3 %v8854_v9  ;;  %v6214_v16 = vld [vmem:[%s14247_s6 + $0xe0] sm:$0xf]  ;;  %v8868_v2 = vld [vmem:[%s14247_s6 + $0x64] sm:$0xf] }
  0x37   :  { %441 = vmatpush.bf16.msrb.mxu1 %v8845_v8  ;;  %v8886_v17 = vld [vmem:[%s14247_s6 + $0xec] sm:$0xf0]  ;;  %v7271_v21 = vor.u32 %v9150_v14, %v7270_v13  ;;  %v7254_v22 = vld [vmem:[%s14247_s6 + $0x900] sm:$0xf]  ;;  %v8864_v14 = vld [vmem:[%s14247_s6 + $0x44] sm:$0xf] }
  0x38   :  { %v6215_v19 = vor.u32 %v8886_v17, %v6214_v16  ;;  %v6198_v25 = vld [vmem:[%s14247_s6 + $0xc0] sm:$0xf]  ;;  %v8842_v33 = vld [vmem:[%s14249_s1 + $0x10] sm:$0xff] }
  0x39   :  { %2314 = vmatpush.bf16.msrb.mxu2 %v6327_v23  ;;  %v9146_v23 = vld [vmem:[%s14247_s6 + $0x90c] sm:$0xf0]  ;;  %v8852_v30 = vld [vmem:[%s14249_s1 + $0x60] sm:$0xff] }
  0x3a   :  { %2300 = vmatpush.bf16.msrb.mxu0 %v6215_v19  ;;  %454 = vmatpush.bf16.msrb.mxu3 %v8853_v20  ;;  %v7255_v31 = vor.u32 %v9146_v23, %v7254_v22  ;;  %v6182_v34 = vld [vmem:[%s14247_s6 + $0xa0] sm:$0xf]  ;;  %v8874_v42 = vld [vmem:[%s14247_s6 + $0x8c] sm:$0xf0] }
  0x3b   :  { %442 = vmatpush.bf16.msrb.mxu1 %v8844_v15  ;;  %v6166_v41 = vld [vmem:[%s14247_s6 + $0x80] sm:$0xf]  ;;  %v8850_v47 = vld [vmem:[%s14249_s1 + $0x50] sm:$0xff] }
  0x3c   :  { %v8840_v51 = vld [vmem:[%s14249_s1] sm:$0xff]  ;;  %v8950_v59 = vld [vmem:[%s14247_s6 + $0x2ec] sm:$0xf0]  ;;  %v6136_v15 = vld [vmem:[%s14247_s6 + $0x50] sm:$0xf0] }
  0x3d   :  { %2315 = vmatpush.bf16.msrb.mxu2 %v6311_v26  ;;  %v8882_v26 = vld [vmem:[%s14247_s6 + $0xcc] sm:$0xf0]  ;;  %v6454_v4 = vld [vmem:[%s14247_s6 + $0x2c0] sm:$0xf] }
  0x3e   :  { %455 = vmatpush.bf16.msrb.mxu3 %v8852_v30  ;;  %v8866_v63 = vld [vmem:[%s14247_s6 + $0x4c] sm:$0xf0]  ;;  %v8848_v6 = vld [vmem:[%s14249_s1 + $0x40] sm:$0xff] }
  0x3f   :  { %443 = vmatpush.bf16.msrb.mxu1 %v8843_v24  ;;  %v8946_v5 = vld [vmem:[%s14247_s6 + $0x2cc] sm:$0xf0]  ;;  %v6598_v8 = vld [vmem:[%s14247_s6 + $0x3e0] sm:$0xf] }
  0x40   :  { %v6455_v7 = vor.u32 %v8946_v5, %v6454_v4  ;;  %v8982_v9 = vld [vmem:[%s14247_s6 + $0x3ec] sm:$0xf0]  ;;  %v6438_v17 = vld [vmem:[%s14247_s6 + $0x2a0] sm:$0xf] }
  0x41   :  { %2316 = vmatpush.bf16.msrb.mxu2 %v6295_v29  ;;  %v6199_v29 = vor.u32 %v8882_v26, %v6198_v25  ;;  %v6599_v11 = vor.u32 %v8982_v9, %v6598_v8  ;;  %v8942_v19 = vld [vmem:[%s14247_s6 + $0x2ac] sm:$0xf0]  ;;  %v6582_v20 = vld [vmem:[%s14247_s6 + $0x3c0] sm:$0xf] }
  0x42   :  { %456 = vmatpush.bf16.msrb.mxu3 %v8851_v39  ;;  %v8978_v22 = vld [vmem:[%s14247_s6 + $0x3cc] sm:$0xf0]  ;;  %v6102_v23 = vld [vmem:[%s14247_s6] sm:$0xf] }
  0x43   :  { %2301 = vmatpush.bf16.msrb.mxu0 %v6199_v29  ;;  %444 = vmatpush.bf16.msrb.mxu1 %v8842_v33  ;;  %v8858_v24 = vld [vmem:[%s14247_s6 + $0xc] sm:$0xf0]  ;;  %v6583_v25 = vor.u32 %v8978_v22, %v6582_v20  ;;  %v6120_v29 = vld [vmem:[%s14247_s6 + $0x30] sm:$0xf0]  ;;  %v6422_v30 = vld [vmem:[%s14247_s6 + $0x280] sm:$0xf] }
  0x44   :  { %v6103_v26 = vor.u32 %v8858_v24, %v6102_v23  ;;  %v6406_v44 = vld [vmem:[%s14247_s6 + $0x260] sm:$0xf]  ;;  %v8966_v4 = vld [vmem:[%s14247_s6 + $0x36c] sm:$0xf0]  ;;  %v9000_v20 = vld [vmem:[%s14247_s6 + $0x484] sm:$0xf] }
  0x45   :  { %2317 = vmatpush.bf16.msrb.mxu2 %v6279_v32  ;;  %v6219_v32 = vor.u32 %v8884_v27, %v6216_v28  ;;  %v6139_v27 = vor.u32 %v8864_v14, %v6136_v15  ;;  %v8860_v28 = vld [vmem:[%s14247_s6 + $0x24] sm:$0xf]  ;;  %v6710_v46 = vld [vmem:[%s14247_s6 + $0x4c0] sm:$0xf]  ;;  %v8926_v8 = vld [vmem:[%s14247_s6 + $0x22c] sm:$0xf0] }
  0x46   :  { %457 = vmatpush.bf16.msrb.mxu3 %v8850_v47  ;;  %v6550_v50 = vld [vmem:[%s14247_s6 + $0x380] sm:$0xf]  ;;  %v8922_v22 = vld [vmem:[%s14247_s6 + $0x20c] sm:$0xf0]  ;;  %v6680_v23 = vld [vmem:[%s14247_s6 + $0x490] sm:$0xf0] }
  0x47   :  { %445 = vmatpush.bf16.msrb.mxu1 %v8841_v40  ;;  %v6123_v40 = vor.u32 %v8860_v28, %v6120_v29  ;;  %v6678_v9 = vld [vmem:[%s14247_s6 + $0x480] sm:$0xf]  ;;  %v8958_v29 = vld [vmem:[%s14247_s6 + $0x32c] sm:$0xf0] }
  0x48   :  { %v6518_v15 = vld [vmem:[%s14247_s6 + $0x340] sm:$0xf] }
  0x49   :  { %2318 = vmatpush.bf16.msrb.mxu2 %v6263_v35  ;;  %v8878_v35 = vld [vmem:[%s14247_s6 + $0xac] sm:$0xf0]  ;;  %v6502_v28 = vld [vmem:[%s14247_s6 + $0x320] sm:$0xf] }
  0x4a   :  { %458 = vmatpush.bf16.msrb.mxu3 %v8849_v60  ;;  %v8930_v60 = vld [vmem:[%s14247_s6 + $0x24c] sm:$0xf0] }
  0x4b   :  { %446 = vmatpush.bf16.msrb.mxu1 %v8840_v51  ;;  %v8970_v51 = vld [vmem:[%s14247_s6 + $0x38c] sm:$0xf0] }
  0x4d   :  { %2319 = vmatpush.bf16.msrb.mxu2 %v6247_v38  ;;  %v6183_v38 = vor.u32 %v8878_v35, %v6182_v34  ;;  %v9014_v34 = vld [vmem:[%s14247_s6 + $0x4ec] sm:$0xf0]  ;;  %v6566_v35 = vld [vmem:[%s14247_s6 + $0x3a0] sm:$0xf] }
  0x4e   :  { %459 = vmatpush.bf16.msrb.mxu3 %v8848_v6 }
  0x4f   :  { %2302 = vmatpush.bf16.msrb.mxu0 %v6183_v38 }
  0x51   :  { %2320 = vmatpush.bf16.msrb.mxu2 %v6231_v43  ;;  %v6203_v43 = vor.u32 %v8880_v36, %v6200_v37  ;;  %v8974_v36 = vld [vmem:[%s14247_s6 + $0x3ac] sm:$0xf0]  ;;  %v8856_v37 = vld [vmem:[%s14247_s6 + $0x4] sm:$0xf] }
  0x52   :  { %2339 = vmatpush.bf16.msra.mxu3 %v6599_v11  ;;  %v6567_v39 = vor.u32 %v8974_v36, %v6566_v35  ;;  %v6696_v11 = vld [vmem:[%s14247_s6 + $0x4b0] sm:$0xf0] }
  0x53   :  { %v6664_v35 = vld [vmem:[%s14247_s6 + $0x470] sm:$0xf0] }
  0x54   :  { %2321 = vmatmul.bf16.vlgmr.msrb.gmra.mxu2 %v9898_v48 }
  0x55   :  { %2365 = vmatpush.bf16.msra.mxu2 %v6855_v45  ;;  %v6167_v45 = vor.u32 %v8874_v42, %v6166_v41  ;;  %v6104_v41 = vld [vmem:[%s14247_s6 + $0x10] sm:$0xf0]  ;;  %v9012_v42 = vld [vmem:[%s14247_s6 + $0x4e4] sm:$0xf] }
  0x56   :  { %2340 = vmatpush.bf16.msra.mxu3 %v6583_v25  ;;  %v6662_v25 = vld [vmem:[%s14247_s6 + $0x460] sm:$0xf] }
  0x57   :  { %2303 = vmatpush.bf16.msrb.mxu0 %v6167_v45  ;;  %v8934_v45 = vld [vmem:[%s14247_s6 + $0x26c] sm:$0xf0] }
  0x58   :  { %v6407_v47 = vor.u32 %v8934_v45, %v6406_v44  ;;  %v8990_v44 = vld [vmem:[%s14247_s6 + $0x42c] sm:$0xf0] }
  0x59   :  { %2366 = vmatpush.bf16.msra.mxu2 %v6839_v49  ;;  %v6150_v49 = vld [vmem:[%s14247_s6 + $0x60] sm:$0xf] }
  0x5a   :  { %2341 = vmatpush.bf16.msra.mxu3 %v6567_v39 }
  0x5d   :  { %2367 = vmatpush.bf16.msra.mxu2 %v6823_v52  ;;  %v8870_v52 = vld [vmem:[%s14247_s6 + $0x6c] sm:$0xf0] }
  0x5e   :  { %v6151_v53 = vor.u32 %v8870_v52, %v6150_v49  ;;  %v9010_v49 = vld [vmem:[%s14247_s6 + $0x4cc] sm:$0xf0] }
  0x5f   :  { %v6711_v52 = vor.u32 %v9010_v49, %v6710_v46  ;;  %v6632_v49 = vld [vmem:[%s14247_s6 + $0x430] sm:$0xf0] }
  0x60   :  { %2304 = vmatpush.bf16.msrb.mxu0 %v6151_v53  ;;  %v6551_v53 = vor.u32 %v8970_v51, %v6550_v50  ;;  %v6614_v50 = vld [vmem:[%s14247_s6 + $0x400] sm:$0xf]  ;;  %v8986_v51 = vld [vmem:[%s14247_s6 + $0x40c] sm:$0xf0] }
  0x61   :  { %2368 = vmatpush.bf16.msra.mxu2 %v6807_v55  ;;  %v8872_v55 = vld [vmem:[%s14247_s6 + $0x84] sm:$0xf] }
  0x62   :  { %v6171_v1 = vor.u32 %v8872_v55, %v6168_v56  ;;  %v9008_v55 = vld [vmem:[%s14247_s6 + $0x4c4] sm:$0xf]  ;;  %2342 = vmatpush.bf16.msra.mxu3 %v6551_v53  ;;  %v7238_v53 = vld [vmem:[%s14247_s6 + $0x8e0] sm:$0xf] }
  0x65   :  { %2369 = vmatpush.bf16.msra.mxu2 %v6791_v58  ;;  %v6470_v58 = vld [vmem:[%s14247_s6 + $0x2e0] sm:$0xf] }
  0x66   :  { %v6471_v61 = vor.u32 %v8950_v59, %v6470_v58  ;;  %v6712_v58 = vld [vmem:[%s14247_s6 + $0x4d0] sm:$0xf0]  ;;  %v6390_v59 = vld [vmem:[%s14247_s6 + $0x240] sm:$0xf] }
  0x67   :  { %v6715_v5 = vor.u32 %v9008_v55, %v6712_v58  ;;  %v8984_v58 = vld [vmem:[%s14247_s6 + $0x404] sm:$0xf] }
  0x68   :  { %2326 = vmatpush.bf16.msra.mxu1 %v6471_v61  ;;  %v6391_v61 = vor.u32 %v8930_v60, %v6390_v59  ;;  %v6616_v59 = vld [vmem:[%s14247_s6 + $0x410] sm:$0xf0]  ;;  %v9140_v60 = vld [vmem:[%s14247_s6 + $0x8e4] sm:$0xf] }
  0x69   :  { %2370 = vmatpush.bf16.msra.mxu2 %v6775_v62  ;;  %v6134_v62 = vld [vmem:[%s14247_s6 + $0x40] sm:$0xf] }
  0x6a   :  { %v6135_v0 = vor.u32 %v8866_v63, %v6134_v62  ;;  %v6694_v62 = vld [vmem:[%s14247_s6 + $0x4a0] sm:$0xf]  ;;  %v9006_v63 = vld [vmem:[%s14247_s6 + $0x4ac] sm:$0xf0] }
  0x6c   :  { %2305 = vmatpush.bf16.msrb.mxu0 %v6135_v0  ;;  %2327 = vmatpush.bf16.msra.mxu1 %v6455_v7  ;;  %v466_v0 = vld [vmem:[%s14248_s0] sm:$0xff] }
  0x6d   :  { %2371 = vmatpush.bf16.msra.mxu2 %v6759_v3  ;;  %v6152_v3 = vld [vmem:[%s14247_s6 + $0x70] sm:$0xf0]  ;;  %v6374_v7 = vld [vmem:[%s14247_s6 + $0x220] sm:$0xf] }
  0x6e   :  { %v6155_v13 = vor.u32 %v8868_v2, %v6152_v3  ;;  %v10205_v2 = vpack.c.bf16 %v466_v0, %v466_v0  ;;  %v6534_v3 = vld [vmem:[%s14247_s6 + $0x360] sm:$0xf]  ;;  %v9138_v0 = vld [vmem:[%s14247_s6 + $0x8cc] sm:$0xf0] }
  0x6f   :  { %v6535_v6 = vor.u32 %v8966_v4, %v6534_v3  ;;  %v111_v3 = vld [vmem:[%s14250_s9] sm:$0x3]  ;;  %s9539_s9 = smov 64  }
  0x71   :  { %2372 = vmatpush.bf16.msra.mxu2 %v6743_v10  ;;  %v6118_v10 = vld [vmem:[%s14247_s6 + $0x20] sm:$0xf]  ;;  %2343 = vmatpush.bf16.msra.mxu3 %v6535_v6  ;;  %v9136_v6 = vld [vmem:[%s14247_s6 + $0x8c4] sm:$0xf] }
  0x74   :  { %2373 = vmatmul.bf16.vlgmr.msra.gmra.mxu2 %v9976_v18 }
  0x75   :  { %2422 = vmatpush.bf16.msrb.mxu2 %v7287_v12  ;;  %v8862_v12 = vld [vmem:[%s14247_s6 + $0x2c] sm:$0xf0] }
  0x76   :  { %v6119_v16 = vor.u32 %v8862_v12, %v6118_v10  ;;  %v9004_v10 = vld [vmem:[%s14247_s6 + $0x4a4] sm:$0xf]  ;;  %v6375_v12 = vor.u32 %v8926_v8, %v6374_v7  ;;  %v7224_v7 = vld [vmem:[%s14247_s6 + $0x8d0] sm:$0xf0]  ;;  %v7206_v8 = vld [vmem:[%s14247_s6 + $0x8a0] sm:$0xf] }
  0x78   :  { %2306 = vmatpush.bf16.msrb.mxu0 %v6119_v16  ;;  %v8962_v16 = vld [vmem:[%s14247_s6 + $0x34c] sm:$0xf0] }
  0x79   :  { %2423 = vmatpush.bf16.msrb.mxu2 %v7271_v21  ;;  %v6439_v21 = vor.u32 %v8942_v19, %v6438_v17  ;;  %v6519_v17 = vor.u32 %v8962_v16, %v6518_v15  ;;  %v6699_v19 = vor.u32 %v9004_v10, %v6696_v11  ;;  %v9134_v11 = vld [vmem:[%s14247_s6 + $0x8ac] sm:$0xf0]  ;;  %v7227_v15 = vor.u32 %v9136_v6, %v7224_v7 }
  0x7a   :  { %v9106_v6 = vld [vmem:[%s14247_s6 + $0x7cc] sm:$0xf0] }
  0x7b   :  { %2328 = vmatpush.bf16.msra.mxu1 %v6439_v21  ;;  %v6358_v21 = vld [vmem:[%s14247_s6 + $0x200] sm:$0xf]  ;;  %2344 = vmatpush.bf16.msra.mxu3 %v6519_v17  ;;  %v9132_v17 = vld [vmem:[%s14247_s6 + $0x8a4] sm:$0xf] }
  0x7c   :  { %2307 = vmatpush.bf16.msrb.mxu0 %v6103_v26  ;;  %v6359_v24 = vor.u32 %v8922_v22, %v6358_v21  ;;  %v8998_v26 = vld [vmem:[%s14247_s6 + $0x46c] sm:$0xf0] }
  0x7d   :  { %2424 = vmatpush.bf16.msrb.mxu2 %v7255_v31  ;;  %v8938_v31 = vld [vmem:[%s14247_s6 + $0x28c] sm:$0xf0] }
  0x7e   :  { %v6423_v33 = vor.u32 %v8938_v31, %v6422_v30  ;;  %v6683_v30 = vor.u32 %v9000_v20, %v6680_v23  ;;  %v6503_v31 = vor.u32 %v8958_v29, %v6502_v28  ;;  %v7190_v20 = vld [vmem:[%s14247_s6 + $0x880] sm:$0xf]  ;;  %v9130_v23 = vld [vmem:[%s14247_s6 + $0x88c] sm:$0xf0] }
  0x7f   :  { %2308 = vmatmul.bf16.vlgmr.msrb.gmra.mxu0 %v10205_v2  ;;  %v6982_v28 = vld [vmem:[%s14247_s6 + $0x6e0] sm:$0xf]  ;;  %v9078_v29 = vld [vmem:[%s14247_s6 + $0x6ec] sm:$0xf0] }
  0x80   :  { %2329 = vmatpush.bf16.msra.mxu1 %v6423_v33  ;;  %v8994_v33 = vld [vmem:[%s14247_s6 + $0x44c] sm:$0xf0]  ;;  %2345 = vmatpush.bf16.msra.mxu3 %v6503_v31  ;;  %v7192_v31 = vld [vmem:[%s14247_s6 + $0x890] sm:$0xf0] }
  0x81   :  { %2430 = vmatpush.bf16.msra.mxu2 %v6219_v32  ;;  %v6726_v32 = vld [vmem:[%s14247_s6 + $0x4e0] sm:$0xf] }
  0x82   :  { %v6727_v38 = vor.u32 %v9014_v34, %v6726_v32  ;;  %v6646_v32 = vld [vmem:[%s14247_s6 + $0x440] sm:$0xf]  ;;  %v8996_v34 = vld [vmem:[%s14247_s6 + $0x464] sm:$0xf] }
  0x83   :  { %v6647_v36 = vor.u32 %v8994_v33, %v6646_v32  ;;  %v7174_v32 = vld [vmem:[%s14247_s6 + $0x860] sm:$0xf] }
  0x84   :  { %7300 = vmatmul.msk.bf16.vlgmr.msrb.gmra.mxu2 %vm2296_vm1, %v10060_v57  ;;  %2352 = vmatpush.bf16.msra.mxu0 %v6727_v38  ;;  %v8954_v38 = vld [vmem:[%s14247_s6 + $0x30c] sm:$0xf0] }
  0x85   :  { %2431 = vmatpush.bf16.msra.mxu2 %v6203_v43  ;;  %v6728_v43 = vld [vmem:[%s14247_s6 + $0x4f0] sm:$0xf0]  ;;  %2330 = vmatpush.bf16.msra.mxu1 %v6407_v47  ;;  %v8988_v47 = vld [vmem:[%s14247_s6 + $0x424] sm:$0xf] }
  0x86   :  { %v6731_v56 = vor.u32 %v9012_v42, %v6728_v43  ;;  %v6648_v42 = vld [vmem:[%s14247_s6 + $0x450] sm:$0xf0]  ;;  %v6630_v43 = vld [vmem:[%s14247_s6 + $0x420] sm:$0xf]  ;;  %v6635_v55 = vor.u32 %v8988_v47, %v6632_v49  ;;  %v9122_v49 = vld [vmem:[%s14247_s6 + $0x84c] sm:$0xf0] }
  0x87   :  { %v6631_v45 = vor.u32 %v8990_v44, %v6630_v43  ;;  %v9124_v43 = vld [vmem:[%s14247_s6 + $0x864] sm:$0xf]  ;;  %v7158_v47 = vld [vmem:[%s14247_s6 + $0x840] sm:$0xf] }
  0x88   :  { %2353 = vmatpush.bf16.msra.mxu0 %v6711_v52  ;;  %v6615_v52 = vor.u32 %v8986_v51, %v6614_v50  ;;  %v7159_v50 = vor.u32 %v9122_v49, %v7158_v47  ;;  %v469_v47 = vld [vmem:[%s14248_s0 + $0x18] sm:$0xff] }
  0x89   :  { %2432 = vmatpush.bf16.msra.mxu2 %v6187_v54  ;;  %v6107_v54 = vor.u32 %v8856_v37, %v6104_v41  ;;  %2331 = vmatpush.bf16.msra.mxu1 %v6391_v61  ;;  %v6486_v37 = vld [vmem:[%s14247_s6 + $0x300] sm:$0xf]  ;;  %v8992_v41 = vld [vmem:[%s14247_s6 + $0x444] sm:$0xf]  ;;  %v7240_v61 = vld [vmem:[%s14247_s6 + $0x8f0] sm:$0xf0] }
  0x8a   :  { %v6487_v39 = vor.u32 %v8954_v38, %v6486_v37  ;;  %v6651_v46 = vor.u32 %v8992_v41, %v6648_v42  ;;  %v6966_v37 = vld [vmem:[%s14247_s6 + $0x6c0] sm:$0xf]  ;;  %v9074_v42 = vld [vmem:[%s14247_s6 + $0x6cc] sm:$0xf0] }
  0x8c   :  { %2346 = vmatpush.bf16.msra.mxu3 %v6487_v39 }
  0x8d   :  { %2433 = vmatpush.bf16.msra.mxu2 %v6171_v1  ;;  %v6695_v1 = vor.u32 %v9006_v63, %v6694_v62  ;;  %2332 = vmatpush.bf16.msra.mxu1 %v6375_v12  ;;  %v7222_v62 = vld [vmem:[%s14247_s6 + $0x8c0] sm:$0xf] }
  0x8e   :  { %v7223_v4 = vor.u32 %v9138_v0, %v7222_v62  ;;  %v470_v12 = vld [vmem:[%s14248_s0 + $0x20] sm:$0xff] }
  0x8f   :  { %2354 = vmatpush.bf16.msra.mxu0 %v6695_v1  ;;  %v6619_v1 = vor.u32 %v8984_v58, %v6616_v59  ;;  %v9070_v58 = vld [vmem:[%s14247_s6 + $0x6ac] sm:$0xf0]  ;;  %v9120_v59 = vld [vmem:[%s14247_s6 + $0x844] sm:$0xf]  ;;  %v7142_v62 = vld [vmem:[%s14247_s6 + $0x820] sm:$0xf] }
  0x91   :  { %2434 = vmatpush.bf16.msra.mxu2 %v6155_v13  ;;  %v9002_v13 = vld [vmem:[%s14247_s6 + $0x48c] sm:$0xf0]  ;;  %2333 = vmatpush.bf16.msra.mxu1 %v6359_v24  ;;  %v7191_v24 = vor.u32 %v9130_v23, %v7190_v20  ;;  %v8980_v23 = vld [vmem:[%s14247_s6 + $0x3e4] sm:$0xf] }
  0x92   :  { %v6679_v14 = vor.u32 %v9002_v13, %v6678_v9  ;;  %v113_v9 = vperm.slane %v111_v3, 0  ;;  %v7207_v13 = vor.u32 %v9134_v11, %v7206_v8  ;;  %v9116_v11 = vld [vmem:[%s14247_s6 + $0x824] sm:$0xf] }
  0x94   :  { %2355 = vmatpush.bf16.msra.mxu0 %v6679_v14  ;;  %v10347_v14 = vpack.c.bf16 %v470_v12, %v470_v12  ;;  %v7144_v12 = vld [vmem:[%s14247_s6 + $0x830] sm:$0xf0] }
  0x95   :  { %2435 = vmatpush.bf16.msra.mxu2 %v6139_v27  ;;  %v6663_v27 = vor.u32 %v8998_v26, %v6662_v25  ;;  %v114_v26 = vperm.slane %v111_v3, 1 }
  0x98   :  { %2356 = vmatpush.bf16.msra.mxu0 %v6663_v27 }
  0x99   :  { %2436 = vmatpush.bf16.msra.mxu2 %v6123_v40  ;;  %v6667_v40 = vor.u32 %v8996_v34, %v6664_v35  ;;  %v9126_v35 = vld [vmem:[%s14247_s6 + $0x86c] sm:$0xf0] }
  0x9a   :  { %v7175_v38 = vor.u32 %v9126_v35, %v7174_v32  ;;  %v8983_v35 = vld [vmem:[%s14247_s6 + $0x3f4] sm:$0xf0] }
  0x9c   :  { %2357 = vmatpush.bf16.msra.mxu0 %v6647_v36  ;;  %v6983_v36 = vor.u32 %v9078_v29, %v6982_v28  ;;  %v7062_v29 = vld [vmem:[%s14247_s6 + $0x780] sm:$0xf] }
  0x9d   :  { %2437 = vmatpush.bf16.msra.mxu2 %v6107_v54  ;;  %v9142_v54 = vld [vmem:[%s14247_s6 + $0x8ec] sm:$0xf0] }
  0xa0   :  { %2438 = vmatmul.bf16.vlgmr.msra.gmra.mxu2 %v10205_v2  ;;  %2358 = vmatpush.bf16.msra.mxu0 %v6631_v45 }
  0xa1   :  { %2482 = vmatpush.bf16.msrb.mxu2 %v6731_v56  ;;  %v7239_v56 = vor.u32 %v9142_v54, %v7238_v53  ;;  %v7110_v53 = vld [vmem:[%s14247_s6 + $0x7e0] sm:$0xf]  ;;  %v9110_v54 = vld [vmem:[%s14247_s6 + $0x7ec] sm:$0xf0] }
  0xa2   :  { %v7111_v0 = vor.u32 %v9110_v54, %v7110_v53  ;;  %v7046_v54 = vld [vmem:[%s14247_s6 + $0x760] sm:$0xf] }
  0xa4   :  { %2359 = vmatpush.bf16.msra.mxu0 %v6615_v52  ;;  %v6967_v52 = vor.u32 %v9074_v42, %v6966_v37  ;;  %v6902_v42 = vld [vmem:[%s14247_s6 + $0x640] sm:$0xf] }
  0xa5   :  { %2483 = vmatpush.bf16.msrb.mxu2 %v6715_v5  ;;  %v7243_v5 = vor.u32 %v9140_v60, %v7240_v61  ;;  %v7160_v60 = vld [vmem:[%s14247_s6 + $0x850] sm:$0xf0] }
  0xa6   :  { %v7163_v8 = vor.u32 %v9120_v59, %v7160_v60  ;;  %v9054_v59 = vld [vmem:[%s14247_s6 + $0x62c] sm:$0xf0] }
  0xa7   :  { %2360 = vmatmul.bf16.vlgmr.msra.gmra.mxu0 %v10347_v14 }
  0xa8   :  { %2404 = vmatpush.bf16.msrb.mxu0 %v7239_v56 }
  0xa9   :  { %2484 = vmatpush.bf16.msrb.mxu2 %v6699_v19  ;;  %v273_v63 = vpop.f32.mrf.mxu1  ;;  %v7208_v19 = vld [vmem:[%s14247_s6 + $0x8b0] sm:$0xf0] }
  0xaa   :  { %v7211_v27 = vor.u32 %v9132_v17, %v7208_v19  ;;  %v7078_v17 = vld [vmem:[%s14247_s6 + $0x7a0] sm:$0xf]  ;;  %v9102_v19 = vld [vmem:[%s14247_s6 + $0x7ac] sm:$0xf0] }
  0xab   :  { %v7079_v32 = vor.u32 %v9102_v19, %v7078_v17  ;;  %v6558_v17 = vld [vmem:[%s14247_s6 + $0x388] sm:$0xf]  ;;  %v8971_v19 = vld [vmem:[%s14247_s6 + $0x394] sm:$0xf0] }
  0xac   :  { %2405 = vmatpush.bf16.msrb.mxu0 %v7223_v4 }
  0xad   :  { %2485 = vmatpush.bf16.msrb.mxu2 %v6683_v30  ;;  %v299_v10 = vpop.f32.mrf.mxu3  ;;  %v9128_v30 = vld [vmem:[%s14247_s6 + $0x884] sm:$0xf] }
  0xae   :  { %v7195_v41 = vor.u32 %v9128_v30, %v7192_v31  ;;  %v9112_v30 = vld [vmem:[%s14247_s6 + $0x804] sm:$0xf]  ;;  %v7128_v31 = vld [vmem:[%s14247_s6 + $0x810] sm:$0xf0] }
  0xb0   :  { %v260_v16 = vpop.f32.mrf.mxu0  ;;  %2406 = vmatpush.bf16.msrb.mxu0 %v7207_v13  ;;  %v7126_v13 = vld [vmem:[%s14247_s6 + $0x800] sm:$0xf] }
  0xb1   :  { %2486 = vmatpush.bf16.msrb.mxu2 %v6667_v40  ;;  %v261_v21 = vadd.f32 %v260_v16, %v113_v9  ;;  %v275_v22 = vpop.f32.mrf.mxu1  ;;  %v6934_v9 = vld [vmem:[%s14247_s6 + $0x680] sm:$0xf] }
  0xb2   :  { %v468_v22 = vld [vmem:[%s14248_s0 + $0x10] sm:$0xff] }
  0xb3   :  { %v274_v25 = vadd.f32 %v273_v63, %v261_v21  ;;  %v9118_v63 = vld [vmem:[%s14247_s6 + $0x82c] sm:$0xf0] }
  0xb4   :  { %2407 = vmatpush.bf16.msrb.mxu0 %v7191_v24  ;;  %v6600_v24 = vld [vmem:[%s14247_s6 + $0x3f0] sm:$0xf0] }
  0xb5   :  { %2487 = vmatpush.bf16.msrb.mxu2 %v6651_v46  ;;  %v303_v33 = vmax.f32 %v274_v25, 0.0  ;;  %v301_v34 = vpop.f32.mrf.mxu3  ;;  %v7176_v46 = vld [vmem:[%s14247_s6 + $0x870] sm:$0xf0]  ;;  %v7147_v25 = vor.u32 %v9116_v11, %v7144_v12  ;;  %v6603_v28 = vor.u32 %v8980_v23, %v6600_v24  ;;  %v8916_v12 = vld [vmem:[%s14247_s6 + $0x1e4] sm:$0xf] }
  0xb6   :  { %v7179_v56 = vor.u32 %v9124_v43, %v7176_v46  ;;  %v6606_v34 = vld [vmem:[%s14247_s6 + $0x3e8] sm:$0xf]  ;;  %v9058_v43 = vld [vmem:[%s14247_s6 + $0x64c] sm:$0xf0]  ;;  %v6536_v24 = vld [vmem:[%s14247_s6 + $0x370] sm:$0xf0] }
  0xb7   :  { %v305_v39 = vpack.c.bf16 %v303_v33, %v303_v33  ;;  %v286_v40 = vpop.f32.mrf.mxu2  ;;  %v10477_v33 = vpack.c.bf16 %v468_v22, %v468_v22  ;;  %v6607_v46 = vor.u32 %v8983_v35, %v6606_v34  ;;  %v6903_v53 = vor.u32 %v9058_v43, %v6902_v42  ;;  %v9086_v22 = vld [vmem:[%s14247_s6 + $0x72c] sm:$0xf0]  ;;  %v8967_v34 = vld [vmem:[%s14247_s6 + $0x374] sm:$0xf0]  ;;  %v8960_v35 = vld [vmem:[%s14247_s6 + $0x344] sm:$0xf] }
  0xb8   :  { %v287_v44 = vadd.f32 %v286_v40, %v114_v26  ;;  %v262_v45 = vpop.f32.mrf.mxu0  ;;  %2408 = vmatpush.bf16.msrb.mxu0 %v7175_v38  ;;  %v6918_v26 = vld [vmem:[%s14247_s6 + $0x660] sm:$0xf]  ;;  %v9098_v38 = vld [vmem:[%s14247_s6 + $0x78c] sm:$0xf0]  ;;  %v6472_v42 = vld [vmem:[%s14247_s6 + $0x2f0] sm:$0xf0] }
  0xb9   :  { %2488 = vmatpush.bf16.msrb.mxu2 %v6635_v55  ;;  %447 = vmatmul.bf16.vlgmr.msrb.gmra.mxu1 %v305_v39  ;;  %v6950_v55 = vld [vmem:[%s14247_s6 + $0x6a0] sm:$0xf]  ;;  %v6584_v39 = vld [vmem:[%s14247_s6 + $0x3d0] sm:$0xf0]  ;;  %v7063_v49 = vor.u32 %v9098_v38, %v7062_v29  ;;  %v9082_v38 = vld [vmem:[%s14247_s6 + $0x70c] sm:$0xf0] }
  0xba   :  { %v300_v51 = vadd.f32 %v299_v10, %v287_v44  ;;  %2378 = vmatpush.bf16.msrb.mxu1 %v6983_v36  ;;  %v6951_v4 = vor.u32 %v9070_v58, %v6950_v55  ;;  %v9066_v10 = vld [vmem:[%s14247_s6 + $0x68c] sm:$0xf0]  ;;  %v8976_v36 = vld [vmem:[%s14247_s6 + $0x3c4] sm:$0xf]  ;;  %v6886_v58 = vld [vmem:[%s14247_s6 + $0x620] sm:$0xf] }
  0xbb   :  { %v6935_v21 = vor.u32 %v9066_v10, %v6934_v9  ;;  %v474_v40 = vld [vmem:[%s14248_s0 + $0x40] sm:$0xff]  ;;  %v6587_v44 = vor.u32 %v8976_v36, %v6584_v39  ;;  %v9094_v55 = vld [vmem:[%s14247_s6 + $0x76c] sm:$0xf0]  ;;  %v6328_v29 = vld [vmem:[%s14247_s6 + $0x1d0] sm:$0xf0] }
  0xbc   :  { %v304_v61 = vmax.f32 %v300_v51, 0.0  ;;  %2409 = vmatpush.bf16.msrb.mxu0 %v7159_v50  ;;  %v10503_v45 = vpack.c.bf16 %v474_v40, %v474_v40  ;;  %v6590_v50 = vld [vmem:[%s14247_s6 + $0x3c8] sm:$0xf]  ;;  %v8979_v51 = vld [vmem:[%s14247_s6 + $0x3d4] sm:$0xf0]  ;;  %v472_v23 = vld [vmem:[%s14248_s0 + $0x30] sm:$0xff] }
  0xbd   :  { %2489 = vmatpush.bf16.msrb.mxu2 %v6619_v1  ;;  %v7143_v1 = vor.u32 %v9118_v63, %v7142_v62  ;;  %v6591_v62 = vor.u32 %v8979_v51, %v6590_v50  ;;  %v7047_v63 = vor.u32 %v9094_v55, %v7046_v54  ;;  %v9050_v9 = vld [vmem:[%s14247_s6 + $0x60c] sm:$0xf0]  ;;  %v6520_v36 = vld [vmem:[%s14247_s6 + $0x350] sm:$0xf0]  ;;  %v8908_v43 = vld [vmem:[%s14247_s6 + $0x1a4] sm:$0xf] }
  0xbe   :  { %v306_v3 = vpack.c.bf16 %v304_v61, %v304_v61  ;;  %2379 = vmatpush.bf16.msrb.mxu1 %v6967_v52  ;;  %v8972_v52 = vld [vmem:[%s14247_s6 + $0x3a4] sm:$0xf]  ;;  %v10534_v61 = vpack.c.bf16 %v469_v47, %v469_v47  ;;  %v6523_v39 = vor.u32 %v8960_v35, %v6520_v36  ;;  %v473_v47 = vld [vmem:[%s14248_s0 + $0x38] sm:$0xff] }
  0xbf   :  { %v288_v7 = vpop.f32.mrf.mxu2  ;;  %v8963_v51 = vld [vmem:[%s14247_s6 + $0x354] sm:$0xf0] }
  0xc0   :  { %2490 = vmatmul.bf16.vlgmr.msrb.gmra.mxu2 %v10347_v14  ;;  %460 = vmatmul.bf16.vlgmr.msrb.gmra.mxu3 %v306_v3  ;;  %v8968_v3 = vld [vmem:[%s14247_s6 + $0x384] sm:$0xf]  ;;  %v6552_v7 = vld [vmem:[%s14247_s6 + $0x390] sm:$0xf0] }
  0xc1   :  { %2534 = vmatpush.bf16.msra.mxu2 %v7243_v5  ;;  %v7094_v5 = vld [vmem:[%s14247_s6 + $0x7c0] sm:$0xf]  ;;  %2410 = vmatpush.bf16.msrb.mxu0 %v7143_v1  ;;  %v8975_v1 = vld [vmem:[%s14247_s6 + $0x3b4] sm:$0xf0]  ;;  %v6555_v10 = vor.u32 %v8968_v3, %v6552_v7  ;;  %v8940_v7 = vld [vmem:[%s14247_s6 + $0x2a4] sm:$0xf] }
  0xc2   :  { %2391 = vmatpush.bf16.msrb.mxu3 %v7111_v0  ;;  %v7095_v16 = vor.u32 %v9106_v6, %v7094_v5  ;;  %2380 = vmatpush.bf16.msrb.mxu1 %v6951_v4  ;;  %v6574_v0 = vld [vmem:[%s14247_s6 + $0x3a8] sm:$0xf]  ;;  %v6887_v4 = vor.u32 %v9054_v59, %v6886_v58  ;;  %v7030_v5 = vld [vmem:[%s14247_s6 + $0x740] sm:$0xf]  ;;  %v9090_v6 = vld [vmem:[%s14247_s6 + $0x74c] sm:$0xf0] }
  0xc3   :  { %v6575_v11 = vor.u32 %v8975_v1, %v6574_v0  ;;  %v8944_v58 = vld [vmem:[%s14247_s6 + $0x2c4] sm:$0xf]  ;;  %v6456_v59 = vld [vmem:[%s14247_s6 + $0x2d0] sm:$0xf0]  ;;  %v6510_v1 = vld [vmem:[%s14247_s6 + $0x328] sm:$0xf] }
  0xc4   :  { %v6296_v0 = vld [vmem:[%s14247_s6 + $0x190] sm:$0xf0]  ;;  %v8959_v3 = vld [vmem:[%s14247_s6 + $0x334] sm:$0xf0] }
  0xc5   :  { %2535 = vmatpush.bf16.msra.mxu2 %v7227_v15  ;;  %v9114_v15 = vld [vmem:[%s14247_s6 + $0x80c] sm:$0xf0] }
  0xc6   :  { %v7127_v20 = vor.u32 %v9114_v15, %v7126_v13  ;;  %2392 = vmatpush.bf16.msrb.mxu3 %v7095_v16  ;;  %2381 = vmatpush.bf16.msrb.mxu1 %v6935_v21  ;;  %v6344_v13 = vld [vmem:[%s14247_s6 + $0x1f0] sm:$0xf0]  ;;  %v7014_v15 = vld [vmem:[%s14247_s6 + $0x720] sm:$0xf]  ;;  %v7031_v16 = vor.u32 %v9090_v6, %v7030_v5  ;;  %v6459_v6 = vor.u32 %v8944_v58, %v6456_v59  ;;  %v8888_v59 = vld [vmem:[%s14247_s6 + $0x104] sm:$0xf] }
  0xc7   :  { %v6488_v5 = vld [vmem:[%s14247_s6 + $0x310] sm:$0xf0] }
  0xc8   :  { %2411 = vmatpush.bf16.msrb.mxu0 %v7127_v20  ;;  %v8964_v20 = vld [vmem:[%s14247_s6 + $0x364] sm:$0xf]  ;;  %v7064_v58 = vld [vmem:[%s14247_s6 + $0x790] sm:$0xf0] }
  0xc9   :  { %2536 = vmatpush.bf16.msra.mxu2 %v7211_v27  ;;  %v9062_v27 = vld [vmem:[%s14247_s6 + $0x66c] sm:$0xf0]  ;;  %2334 = vmatmul.bf16.vlgmr.msra.gmra.mxu1 %v10477_v33 }
  0xca   :  { %v6919_v37 = vor.u32 %v9062_v27, %v6918_v26  ;;  %2393 = vmatpush.bf16.msrb.mxu3 %v7079_v32  ;;  %v6539_v26 = vor.u32 %v8964_v20, %v6536_v24  ;;  %v6559_v27 = vor.u32 %v8971_v19, %v6558_v17  ;;  %v10598_v32 = vpack.c.bf16 %v472_v23, %v472_v23  ;;  %v6494_v19 = vld [vmem:[%s14247_s6 + $0x308] sm:$0xf]  ;;  %v8955_v20 = vld [vmem:[%s14247_s6 + $0x314] sm:$0xf0]  ;;  %v9104_v24 = vld [vmem:[%s14247_s6 + $0x7c4] sm:$0xf] }
  0xcb   :  { %2412 = vmatmul.bf16.vlgmr.msrb.gmra.mxu0 %v10503_v45  ;;  %v9111_v23 = vld [vmem:[%s14247_s6 + $0x7f4] sm:$0xf0] }
  0xcc   :  { %2469 = vmatpush.bf16.msra.mxu0 %v6603_v28  ;;  %2382 = vmatpush.bf16.msrb.mxu1 %v6919_v37  ;;  %v8912_v28 = vld [vmem:[%s14247_s6 + $0x1c4] sm:$0xf]  ;;  %v6998_v37 = vld [vmem:[%s14247_s6 + $0x700] sm:$0xf] }
  0xcd   :  { %2537 = vmatpush.bf16.msra.mxu2 %v7195_v41  ;;  %v7131_v41 = vor.u32 %v9112_v30, %v7128_v31  ;;  %v6542_v30 = vld [vmem:[%s14247_s6 + $0x368] sm:$0xf]  ;;  %v7015_v31 = vor.u32 %v9086_v22, %v7014_v15  ;;  %v6331_v40 = vor.u32 %v8912_v28, %v6328_v29  ;;  %v6999_v50 = vor.u32 %v9082_v38, %v6998_v37  ;;  %v8900_v15 = vld [vmem:[%s14247_s6 + $0x164] sm:$0xf]  ;;  %v7096_v28 = vld [vmem:[%s14247_s6 + $0x7d0] sm:$0xf0] }
  0xce   :  { %2394 = vmatpush.bf16.msrb.mxu3 %v7063_v49  ;;  %v6526_v49 = vld [vmem:[%s14247_s6 + $0x348] sm:$0xf]  ;;  %v6495_v29 = vor.u32 %v8955_v20, %v6494_v19  ;;  %v9107_v38 = vld [vmem:[%s14247_s6 + $0x7d4] sm:$0xf0] }
  0xcf   :  { %v7118_v22 = vld [vmem:[%s14247_s6 + $0x7e8] sm:$0xf] }
  0xd0   :  { %2470 = vmatpush.bf16.msra.mxu0 %v6587_v44  ;;  %2383 = vmatpush.bf16.msrb.mxu1 %v6903_v53  ;;  %v6543_v44 = vor.u32 %v8967_v34, %v6542_v30  ;;  %v6504_v53 = vld [vmem:[%s14247_s6 + $0x330] sm:$0xf0]  ;;  %v8896_v30 = vld [vmem:[%s14247_s6 + $0x144] sm:$0xf]  ;;  %v7099_v34 = vor.u32 %v9104_v24, %v7096_v28  ;;  %v7119_v35 = vor.u32 %v9111_v23, %v7118_v22  ;;  %v7102_v37 = vld [vmem:[%s14247_s6 + $0x7c8] sm:$0xf] }
  0xd1   :  { %2538 = vmatpush.bf16.msra.mxu2 %v7179_v56  ;;  %v6568_v56 = vld [vmem:[%s14247_s6 + $0x3b0] sm:$0xf0]  ;;  %2347 = vmatmul.bf16.vlgmr.msra.gmra.mxu3 %v10534_v61  ;;  %v7054_v19 = vld [vmem:[%s14247_s6 + $0x768] sm:$0xf]  ;;  %v9088_v22 = vld [vmem:[%s14247_s6 + $0x744] sm:$0xf] }
  0xd2   :  { %v6571_v60 = vor.u32 %v8972_v52, %v6568_v56  ;;  %2395 = vmatpush.bf16.msrb.mxu3 %v7047_v63  ;;  %v8956_v52 = vld [vmem:[%s14247_s6 + $0x324] sm:$0xf]  ;;  %v7032_v23 = vld [vmem:[%s14247_s6 + $0x750] sm:$0xf0] }
  0xd3   :  { %v6507_v55 = vor.u32 %v8956_v52, %v6504_v53  ;;  %v8904_v63 = vld [vmem:[%s14247_s6 + $0x184] sm:$0xf]  ;;  %v9103_v52 = vld [vmem:[%s14247_s6 + $0x7b4] sm:$0xf0] }
  0xd4   :  { %2471 = vmatpush.bf16.msra.mxu0 %v6571_v60  ;;  %2384 = vmatpush.bf16.msrb.mxu1 %v6887_v4  ;;  %v10649_v60 = vpack.c.bf16 %v473_v47, %v473_v47  ;;  %v8952_v4 = vld [vmem:[%s14247_s6 + $0x304] sm:$0xf] }
  0xd5   :  { %2539 = vmatpush.bf16.msra.mxu2 %v7163_v8  ;;  %v6870_v8 = vld [vmem:[%s14247_s6 + $0x600] sm:$0xf]  ;;  %v9096_v53 = vld [vmem:[%s14247_s6 + $0x784] sm:$0xf] }
  0xd6   :  { %v6871_v21 = vor.u32 %v9050_v9, %v6870_v8  ;;  %2396 = vmatpush.bf16.msrb.mxu3 %v7031_v16  ;;  %v6491_v8 = vor.u32 %v8952_v4, %v6488_v5  ;;  %v6299_v9 = vor.u32 %v8904_v63, %v6296_v0  ;;  %v6280_v16 = vld [vmem:[%s14247_s6 + $0x170] sm:$0xf0]  ;;  %v7067_v63 = vor.u32 %v9096_v53, %v7064_v58  ;;  %v7070_v5 = vld [vmem:[%s14247_s6 + $0x788] sm:$0xf]  ;;  %v8920_v24 = vld [vmem:[%s14247_s6 + $0x204] sm:$0xf] }
  0xd7   :  { %v9076_v28 = vld [vmem:[%s14247_s6 + $0x6e4] sm:$0xf]  ;;  %v7000_v53 = vld [vmem:[%s14247_s6 + $0x710] sm:$0xf0]  ;;  %v8919_v58 = vld [vmem:[%s14247_s6 + $0x1f4] sm:$0xf0] }
  0xd8   :  { %2472 = vmatpush.bf16.msra.mxu0 %v6555_v10  ;;  %2385 = vmatpush.bf16.msrb.mxu1 %v6871_v21  ;;  %v6440_v10 = vld [vmem:[%s14247_s6 + $0x2b0] sm:$0xf0] }
  0xd9   :  { %2540 = vmatpush.bf16.msra.mxu2 %v7147_v25  ;;  %v6347_v25 = vor.u32 %v8916_v12, %v6344_v13  ;;  %v7112_v12 = vld [vmem:[%s14247_s6 + $0x7f0] sm:$0xf0]  ;;  %v6511_v13 = vor.u32 %v8959_v3, %v6510_v1  ;;  %v6443_v21 = vor.u32 %v8940_v7, %v6440_v10  ;;  %v9044_v1 = vld [vmem:[%s14247_s6 + $0x5e4] sm:$0xf] }
  0xda   :  { %2397 = vmatpush.bf16.msrb.mxu3 %v7015_v31  ;;  %v6264_v31 = vld [vmem:[%s14247_s6 + $0x150] sm:$0xf0]  ;;  %v9092_v7 = vld [vmem:[%s14247_s6 + $0x764] sm:$0xf] }
  0xdb   :  { %2386 = vmatmul.bf16.vlgmr.msrb.gmra.mxu1 %v10598_v32  ;;  %v6856_v3 = vld [vmem:[%s14247_s6 + $0x5f0] sm:$0xf0] }
  0xdc   :  { %2473 = vmatpush.bf16.msra.mxu0 %v6539_v26  ;;  %2443 = vmatpush.bf16.msra.mxu1 %v6347_v25  ;;  %v6283_v25 = vor.u32 %v8900_v15, %v6280_v16  ;;  %v8936_v26 = vld [vmem:[%s14247_s6 + $0x284] sm:$0xf]  ;;  %v6376_v10 = vld [vmem:[%s14247_s6 + $0x230] sm:$0xf0] }
  0xdd   :  { %2541 = vmatpush.bf16.msra.mxu2 %v7131_v41  ;;  %v8948_v41 = vld [vmem:[%s14247_s6 + $0x2e4] sm:$0xf] }
  0xde   :  { %v6475_v54 = vor.u32 %v8948_v41, %v6472_v42  ;;  %2398 = vmatpush.bf16.msrb.mxu3 %v6999_v50  ;;  %v8932_v41 = vld [vmem:[%s14247_s6 + $0x264] sm:$0xf]  ;;  %v6408_v42 = vld [vmem:[%s14247_s6 + $0x270] sm:$0xf0] }
  0xdf   :  { %v6411_v50 = vor.u32 %v8932_v41, %v6408_v42  ;;  %v9040_v16 = vld [vmem:[%s14247_s6 + $0x5c4] sm:$0xf] }
  0xe0   :  { %2542 = vmatmul.bf16.vlgmr.msra.gmra.mxu2 %v10503_v45  ;;  %2474 = vmatpush.bf16.msra.mxu0 %v6523_v39  ;;  %v9100_v39 = vld [vmem:[%s14247_s6 + $0x7a4] sm:$0xf] }
  0xe1   :  { %2599 = vmatpush.bf16.msrb.mxu2 %v6607_v46  ;;  %v6312_v46 = vld [vmem:[%s14247_s6 + $0x1b0] sm:$0xf0]  ;;  %2444 = vmatpush.bf16.msra.mxu1 %v6331_v40  ;;  %v6267_v40 = vor.u32 %v8896_v30, %v6264_v31  ;;  %v9036_v31 = vld [vmem:[%s14247_s6 + $0x5a4] sm:$0xf] }
  0xe2   :  { %v6315_v56 = vor.u32 %v8908_v43, %v6312_v46  ;;  %2456 = vmatpush.bf16.msra.mxu3 %v6475_v54  ;;  %v7080_v43 = vld [vmem:[%s14247_s6 + $0x7b0] sm:$0xf0] }
  0xe3   :  { %2399 = vmatmul.bf16.vlgmr.msrb.gmra.mxu3 %v10649_v60  ;;  %v6248_v46 = vld [vmem:[%s14247_s6 + $0x130] sm:$0xf0]  ;;  %v7083_v47 = vor.u32 %v9100_v39, %v7080_v43  ;;  %v9072_v43 = vld [vmem:[%s14247_s6 + $0x6c4] sm:$0xf] }
  0xe4   :  { %2475 = vmatpush.bf16.msra.mxu0 %v6507_v55  ;;  %v8928_v55 = vld [vmem:[%s14247_s6 + $0x244] sm:$0xf]  ;;  %v7016_v39 = vld [vmem:[%s14247_s6 + $0x730] sm:$0xf0] }
  0xe5   :  { %2600 = vmatpush.bf16.msrb.mxu2 %v6591_v62  ;;  %v6527_v62 = vor.u32 %v8963_v51, %v6526_v49  ;;  %2445 = vmatpush.bf16.msra.mxu1 %v6315_v56  ;;  %v7103_v49 = vor.u32 %v9107_v38, %v7102_v37  ;;  %v7086_v51 = vld [vmem:[%s14247_s6 + $0x7a8] sm:$0xf]  ;;  %v6392_v56 = vld [vmem:[%s14247_s6 + $0x250] sm:$0xf0]  ;;  %v9091_v37 = vld [vmem:[%s14247_s6 + $0x754] sm:$0xf0] }
  0xe6   :  { %2457 = vmatpush.bf16.msra.mxu3 %v6459_v6  ;;  %v7087_v0 = vor.u32 %v9103_v52, %v7086_v51  ;;  %v6395_v4 = vor.u32 %v8928_v55, %v6392_v56  ;;  %v9099_v6 = vld [vmem:[%s14247_s6 + $0x794] sm:$0xf0]  ;;  %v9084_v38 = vld [vmem:[%s14247_s6 + $0x724] sm:$0xf]  ;;  %v6350_v56 = vld [vmem:[%s14247_s6 + $0x1e8] sm:$0xf] }
  0xe7   :  { %v7071_v15 = vor.u32 %v9099_v6, %v7070_v5  ;;  %v7019_v41 = vor.u32 %v9084_v38, %v7016_v39  ;;  %v9087_v51 = vld [vmem:[%s14247_s6 + $0x734] sm:$0xf0]  ;;  %v9080_v52 = vld [vmem:[%s14247_s6 + $0x704] sm:$0xf]  ;;  %v7006_v5 = vld [vmem:[%s14247_s6 + $0x708] sm:$0xf] }
  0xe8   :  { %2476 = vmatpush.bf16.msra.mxu0 %v6491_v8  ;;  %v7003_v55 = vor.u32 %v9080_v52, %v7000_v53  ;;  %v9083_v6 = vld [vmem:[%s14247_s6 + $0x714] sm:$0xf0]  ;;  %v6448_v38 = vld [vmem:[%s14247_s6 + $0x2b8] sm:$0xf0]  ;;  %v6302_v39 = vld [vmem:[%s14247_s6 + $0x188] sm:$0xf] }
  0xe9   :  { %2601 = vmatpush.bf16.msrb.mxu2 %v6575_v11  ;;  %v9108_v11 = vld [vmem:[%s14247_s6 + $0x7e4] sm:$0xf]  ;;  %2446 = vmatpush.bf16.msra.mxu1 %v6299_v9  ;;  %v8937_v52 = vld [vmem:[%s14247_s6 + $0x28c] sm:$0xf] }
  0xea   :  { %v7115_v17 = vor.u32 %v9108_v11, %v7112_v12  ;;  %2458 = vmatpush.bf16.msra.mxu3 %v6443_v21  ;;  %v8924_v9 = vld [vmem:[%s14247_s6 + $0x224] sm:$0xf]  ;;  %v7048_v11 = vld [vmem:[%s14247_s6 + $0x770] sm:$0xf0]  ;;  %v6859_v12 = vor.u32 %v9044_v1, %v6856_v3  ;;  %v9095_v21 = vld [vmem:[%s14247_s6 + $0x774] sm:$0xf0] }
  0xeb   :  { %2477 = vmatmul.bf16.vlgmr.msra.gmra.mxu0 %v10534_v61  ;;  %v6379_v20 = vor.u32 %v8924_v9, %v6376_v10  ;;  %v7055_v30 = vor.u32 %v9095_v21, %v7054_v19  ;;  %v9028_v3 = vld [vmem:[%s14247_s6 + $0x564] sm:$0xf]  ;;  %v6480_v9 = vld [vmem:[%s14247_s6 + $0x2f8] sm:$0xf0]  ;;  %v6334_v10 = vld [vmem:[%s14247_s6 + $0x1c8] sm:$0xf] }
  0xec   :  { %2521 = vmatpush.bf16.msrb.mxu0 %v7115_v17  ;;  %v6840_v17 = vld [vmem:[%s14247_s6 + $0x5d0] sm:$0xf0]  ;;  %v9024_v19 = vld [vmem:[%s14247_s6 + $0x544] sm:$0xf] }
  0xed   :  { %2602 = vmatpush.bf16.msrb.mxu2 %v6559_v27  ;;  %v6424_v27 = vld [vmem:[%s14247_s6 + $0x290] sm:$0xf0]  ;;  %2447 = vmatpush.bf16.msra.mxu1 %v6283_v25 }
  0xee   :  { %v6427_v36 = vor.u32 %v8936_v26, %v6424_v27  ;;  %v6360_v25 = vld [vmem:[%s14247_s6 + $0x210] sm:$0xf0]  ;;  %v7035_v26 = vor.u32 %v9088_v22, %v7032_v23  ;;  %v6843_v27 = vor.u32 %v9040_v16, %v6840_v17  ;;  %v7007_v17 = vor.u32 %v9083_v6, %v7006_v5  ;;  %v8945_v22 = vld [vmem:[%s14247_s6 + $0x2cc] sm:$0xf] }
  0xef   :  { %v8933_v5 = vld [vmem:[%s14247_s6 + $0x26c] sm:$0xf] }
  0xf0   :  { %2522 = vmatpush.bf16.msrb.mxu0 %v7099_v34  ;;  %2459 = vmatpush.bf16.msra.mxu3 %v6427_v36  ;;  %v6824_v34 = vld [vmem:[%s14247_s6 + $0x5b0] sm:$0xf0]  ;;  %v6363_v36 = vor.u32 %v8920_v24, %v6360_v25  ;;  %v6464_v24 = vld [vmem:[%s14247_s6 + $0x2d8] sm:$0xf0]  ;;  %v6318_v25 = vld [vmem:[%s14247_s6 + $0x1a8] sm:$0xf] }
  0xf1   :  { %2603 = vmatpush.bf16.msrb.mxu2 %v6543_v44  ;;  %v8892_v44 = vld [vmem:[%s14247_s6 + $0x124] sm:$0xf]  ;;  %2448 = vmatpush.bf16.msra.mxu1 %v6267_v40  ;;  %v6827_v42 = vor.u32 %v9036_v31, %v6824_v34  ;;  %v6760_v34 = vld [vmem:[%s14247_s6 + $0x530] sm:$0xf0] }
  0xf2   :  { %v6251_v54 = vor.u32 %v8892_v44, %v6248_v46  ;;  %v6968_v44 = vld [vmem:[%s14247_s6 + $0x6d0] sm:$0xf0]  ;;  %v9020_v31 = vld [vmem:[%s14247_s6 + $0x524] sm:$0xf] }
  0xf4   :  { %2523 = vmatpush.bf16.msrb.mxu0 %v7083_v47  ;;  %2460 = vmatpush.bf16.msra.mxu3 %v6411_v50  ;;  %v9032_v47 = vld [vmem:[%s14247_s6 + $0x584] sm:$0xf]  ;;  %v7022_v50 = vld [vmem:[%s14247_s6 + $0x728] sm:$0xf] }
  0xf5   :  { %2604 = vmatpush.bf16.msrb.mxu2 %v6527_v62  ;;  %v6232_v62 = vld [vmem:[%s14247_s6 + $0x110] sm:$0xf0]  ;;  %2449 = vmatpush.bf16.msra.mxu1 %v6251_v54  ;;  %v6971_v54 = vor.u32 %v9072_v43, %v6968_v44  ;;  %v7023_v1 = vor.u32 %v9087_v51, %v7022_v50  ;;  %v9152_v50 = vld [vmem:[%s14247_s6 + $0x944] sm:$0xf] }
  0xf6   :  { %v6235_v8 = vor.u32 %v8888_v59, %v6232_v62  ;;  %v9068_v62 = vld [vmem:[%s14247_s6 + $0x6a4] sm:$0xf]  ;;  %v6904_v43 = vld [vmem:[%s14247_s6 + $0x650] sm:$0xf0] }
  0xf7   :  { %v7288_v51 = vld [vmem:[%s14247_s6 + $0x950] sm:$0xf0] }
  0xf8   :  { %2524 = vmatpush.bf16.msrb.mxu0 %v7067_v63  ;;  %2461 = vmatpush.bf16.msra.mxu3 %v6395_v4  ;;  %v6952_v63 = vld [vmem:[%s14247_s6 + $0x6b0] sm:$0xf0] }
  0xf9   :  { %2605 = vmatpush.bf16.msrb.mxu2 %v6511_v13  ;;  %v7051_v13 = vor.u32 %v9092_v7, %v7048_v11  ;;  %2450 = vmatpush.bf16.msra.mxu1 %v6235_v8  ;;  %v6792_v4 = vld [vmem:[%s14247_s6 + $0x570] sm:$0xf0]  ;;  %v8949_v7 = vld [vmem:[%s14247_s6 + $0x2ec] sm:$0xf]  ;;  %v6955_v8 = vor.u32 %v9068_v62, %v6952_v63  ;;  %v8915_v11 = vld [vmem:[%s14247_s6 + $0x1d4] sm:$0xf0] }
  0xfa   :  { %v6335_v16 = vor.u32 %v8915_v11, %v6334_v10  ;;  %v6483_v21 = vor.u32 %v8949_v7, %v6480_v9  ;;  %v6888_v62 = vld [vmem:[%s14247_s6 + $0x630] sm:$0xf0]  ;;  %v6416_v7 = vld [vmem:[%s14247_s6 + $0x278] sm:$0xf0]  ;;  %v8899_v9 = vld [vmem:[%s14247_s6 + $0x154] sm:$0xf0] }
  0xfb   :  { %v9048_v10 = vld [vmem:[%s14247_s6 + $0x604] sm:$0xf]  ;;  %v6872_v11 = vld [vmem:[%s14247_s6 + $0x610] sm:$0xf0] }
  0xfc   :  { %2525 = vmatpush.bf16.msrb.mxu0 %v7051_v13  ;;  %2462 = vmatpush.bf16.msra.mxu3 %v6379_v20  ;;  %v9064_v13 = vld [vmem:[%s14247_s6 + $0x684] sm:$0xf]  ;;  %v6776_v20 = vld [vmem:[%s14247_s6 + $0x550] sm:$0xf0] }
  0xfd   :  { %2606 = vmatpush.bf16.msrb.mxu2 %v6495_v29  ;;  %2495 = vmatpush.bf16.msrb.mxu1 %v6859_v12  ;;  %v6984_v29 = vld [vmem:[%s14247_s6 + $0x6f0] sm:$0xf0]  ;;  %v6795_v12 = vor.u32 %v9028_v3, %v6792_v4  ;;  %v9148_v3 = vld [vmem:[%s14247_s6 + $0x924] sm:$0xf] }
  0xfe   :  { %2451 = vmatmul.bf16.vlgmr.msra.gmra.mxu1 %v9898_v48  ;;  %v6987_v40 = vor.u32 %v9076_v28, %v6984_v29  ;;  %v9060_v28 = vld [vmem:[%s14247_s6 + $0x664] sm:$0xf]  ;;  %v6920_v29 = vld [vmem:[%s14247_s6 + $0x670] sm:$0xf0] }
  0xff   :  { %v7272_v4 = vld [vmem:[%s14247_s6 + $0x930] sm:$0xf0] }
 0x100   :  { %2607 = vmatmul.bf16.vlgmr.msrb.gmra.mxu2 %v10534_v61  ;;  %2526 = vmatpush.bf16.msrb.mxu0 %v7035_v26  ;;  %v8911_v26 = vld [vmem:[%s14247_s6 + $0x1b4] sm:$0xf0] }
 0x101   :  { %2651 = vmatpush.bf16.msra.mxu2 %v7119_v35  ;;  %v7038_v35 = vld [vmem:[%s14247_s6 + $0x748] sm:$0xf]  ;;  %2496 = vmatpush.bf16.msrb.mxu1 %v6843_v27  ;;  %v6779_v27 = vor.u32 %v9024_v19, %v6776_v20  ;;  %v9144_v19 = vld [vmem:[%s14247_s6 + $0x904] sm:$0xf]  ;;  %v7256_v20 = vld [vmem:[%s14247_s6 + $0x910] sm:$0xf0] }
 0x102   :  { %v7039_v46 = vor.u32 %v9091_v37, %v7038_v35  ;;  %2463 = vmatpush.bf16.msra.mxu3 %v6363_v36  ;;  %v6467_v35 = vor.u32 %v8945_v22, %v6464_v24  ;;  %v8941_v36 = vld [vmem:[%s14247_s6 + $0x2ac] sm:$0xf]  ;;  %v6923_v37 = vor.u32 %v9060_v28, %v6920_v29  ;;  %v6875_v22 = vor.u32 %v9048_v10, %v6872_v11  ;;  %v6254_v24 = vld [vmem:[%s14247_s6 + $0x128] sm:$0xf]  ;;  %v6400_v28 = vld [vmem:[%s14247_s6 + $0x258] sm:$0xf0] }
 0x104   :  { %2527 = vmatpush.bf16.msrb.mxu0 %v7019_v41  ;;  %v6763_v41 = vor.u32 %v9020_v31, %v6760_v34  ;;  %v6206_v31 = vld [vmem:[%s14247_s6 + $0xc8] sm:$0xf]  ;;  %v8883_v34 = vld [vmem:[%s14247_s6 + $0xd4] sm:$0xf0] }
 0x105   :  { %2652 = vmatpush.bf16.msra.mxu2 %v7103_v49  ;;  %v6808_v49 = vld [vmem:[%s14247_s6 + $0x590] sm:$0xf0]  ;;  %2497 = vmatpush.bf16.msrb.mxu1 %v6827_v42  ;;  %v9056_v42 = vld [vmem:[%s14247_s6 + $0x644] sm:$0xf] }
 0x106   :  { %2508 = vmatpush.bf16.msrb.mxu3 %v6987_v40  ;;  %v6811_v59 = vor.u32 %v9032_v47, %v6808_v49  ;;  %v8907_v40 = vld [vmem:[%s14247_s6 + $0x194] sm:$0xf0]  ;;  %v6744_v47 = vld [vmem:[%s14247_s6 + $0x510] sm:$0xf0]  ;;  %v6451_v49 = vor.u32 %v8941_v36, %v6448_v38  ;;  %v6907_v53 = vor.u32 %v9056_v42, %v6904_v43  ;;  %v6462_v36 = vld [vmem:[%s14247_s6 + $0x2c8] sm:$0xf]  ;;  %v6207_v42 = vor.u32 %v8883_v34, %v6206_v31 }
 0x107   :  { %2464 = vmatmul.bf16.vlgmr.msra.gmra.mxu3 %v10477_v33  ;;  %v6303_v44 = vor.u32 %v8907_v40, %v6302_v39  ;;  %v8925_v39 = vld [vmem:[%s14247_s6 + $0x22c] sm:$0xf]  ;;  %v6238_v40 = vld [vmem:[%s14247_s6 + $0x108] sm:$0xf]  ;;  %v6384_v43 = vld [vmem:[%s14247_s6 + $0x238] sm:$0xf0] }
 0x108   :  { %2528 = vmatpush.bf16.msrb.mxu0 %v7003_v55  ;;  %v6286_v55 = vld [vmem:[%s14247_s6 + $0x168] sm:$0xf]  ;;  %v9069_v31 = vld [vmem:[%s14247_s6 + $0x6ac] sm:$0xf]  ;;  %v6960_v34 = vld [vmem:[%s14247_s6 + $0x6b8] sm:$0xf0] }
 0x109   :  { %2653 = vmatpush.bf16.msra.mxu2 %v7087_v0  ;;  %v6351_v0 = vor.u32 %v8919_v58, %v6350_v56  ;;  %2498 = vmatpush.bf16.msrb.mxu1 %v6811_v59  ;;  %v8903_v56 = vld [vmem:[%s14247_s6 + $0x174] sm:$0xf0]  ;;  %v9052_v59 = vld [vmem:[%s14247_s6 + $0x624] sm:$0xf] }
 0x10a   :  { %2509 = vmatpush.bf16.msrb.mxu3 %v6971_v54  ;;  %v6432_v54 = vld [vmem:[%s14247_s6 + $0x298] sm:$0xf0]  ;;  %v6287_v63 = vor.u32 %v8903_v56, %v6286_v55  ;;  %v6891_v6 = vor.u32 %v9052_v59, %v6888_v62  ;;  %v8943_v55 = vld [vmem:[%s14247_s6 + $0x2b4] sm:$0xf0]  ;;  %v6174_v56 = vld [vmem:[%s14247_s6 + $0x88] sm:$0xf] }
 0x10b   :  { %2529 = vmatmul.bf16.vlgmr.msrb.gmra.mxu0 %v10649_v60  ;;  %v6368_v62 = vld [vmem:[%s14247_s6 + $0x218] sm:$0xf0] }
 0x10c   :  { %2573 = vmatpush.bf16.msra.mxu0 %v6351_v0  ;;  %v7291_v0 = vor.u32 %v9152_v50, %v7288_v51  ;;  %v8879_v50 = vld [vmem:[%s14247_s6 + $0xb4] sm:$0xf0] }
 0x10d   :  { %2654 = vmatpush.bf16.msra.mxu2 %v7071_v15  ;;  %v6936_v15 = vld [vmem:[%s14247_s6 + $0x690] sm:$0xf0]  ;;  %2499 = vmatpush.bf16.msrb.mxu1 %v6795_v12 }
 0x10e   :  { %2510 = vmatpush.bf16.msrb.mxu3 %v6955_v8  ;;  %v6939_v23 = vor.u32 %v9064_v13, %v6936_v15  ;;  %v6270_v8 = vld [vmem:[%s14247_s6 + $0x148] sm:$0xf]  ;;  %v7275_v13 = vor.u32 %v9148_v3, %v7272_v4  ;;  %v9077_v3 = vld [vmem:[%s14247_s6 + $0x6ec] sm:$0xf]  ;;  %v6992_v4 = vld [vmem:[%s14247_s6 + $0x6f8] sm:$0xf0] }
 0x10f   :  { %v6271_v12 = vor.u32 %v8899_v9, %v6270_v8  ;;  %v6222_v15 = vld [vmem:[%s14247_s6 + $0xe8] sm:$0xf]  ;;  %v8939_v9 = vld [vmem:[%s14247_s6 + $0x294] sm:$0xf0]  ;;  %v6995_v11 = vor.u32 %v9077_v3, %v6992_v4 }
 0x110   :  { %2574 = vmatpush.bf16.msra.mxu0 %v6335_v16  ;;  %v8887_v16 = vld [vmem:[%s14247_s6 + $0xf4] sm:$0xf0]  ;;  %v6430_v8 = vld [vmem:[%s14247_s6 + $0x288] sm:$0xf] }
 0x111   :  { %2655 = vmatpush.bf16.msra.mxu2 %v7055_v30  ;;  %v6319_v30 = vor.u32 %v8911_v26, %v6318_v25  ;;  %2500 = vmatpush.bf16.msrb.mxu1 %v6779_v27  ;;  %v8895_v25 = vld [vmem:[%s14247_s6 + $0x134] sm:$0xf0]  ;;  %v6223_v26 = vor.u32 %v8887_v16, %v6222_v15  ;;  %v8929_v27 = vld [vmem:[%s14247_s6 + $0x24c] sm:$0xf] }
 0x112   :  { %2511 = vmatpush.bf16.msrb.mxu3 %v6939_v23  ;;  %v8951_v23 = vld [vmem:[%s14247_s6 + $0x2f4] sm:$0xf0]  ;;  %v6255_v29 = vor.u32 %v8895_v25, %v6254_v24  ;;  %v6403_v38 = vor.u32 %v8929_v27, %v6400_v28  ;;  %v11146_v27 = vpop.f32.mrf.mxu0  ;;  %v6814_v28 = vld [vmem:[%s14247_s6 + $0x588] sm:$0xf] }
 0x113   :  { %v9039_v15 = vld [vmem:[%s14247_s6 + $0x5b4] sm:$0xf0] }
 0x114   :  { %2575 = vmatpush.bf16.msra.mxu0 %v6319_v30  ;;  %v7259_v30 = vor.u32 %v9144_v19, %v7256_v20  ;;  %v8871_v16 = vld [vmem:[%s14247_s6 + $0x74] sm:$0xf0]  ;;  %v6976_v19 = vld [vmem:[%s14247_s6 + $0x6d8] sm:$0xf0] }
 0x115   :  { %2656 = vmatpush.bf16.msra.mxu2 %v7039_v46  ;;  %v9016_v46 = vld [vmem:[%s14247_s6 + $0x504] sm:$0xf]  ;;  %2501 = vmatpush.bf16.msrb.mxu1 %v6763_v41  ;;  %v8891_v41 = vld [vmem:[%s14247_s6 + $0x114] sm:$0xf0] }
 0x116   :  { %2512 = vmatpush.bf16.msrb.mxu3 %v6923_v37  ;;  %v6747_v58 = vor.u32 %v9016_v46, %v6744_v47  ;;  %v8947_v37 = vld [vmem:[%s14247_s6 + $0x2d4] sm:$0xf0]  ;;  %v6862_v46 = vld [vmem:[%s14247_s6 + $0x5e8] sm:$0xf] }
 0x117   :  { %v9047_v47 = vld [vmem:[%s14247_s6 + $0x5f4] sm:$0xf0] }
 0x118   :  { %2576 = vmatpush.bf16.msra.mxu0 %v6303_v44  ;;  %v6239_v44 = vor.u32 %v8891_v41, %v6238_v40  ;;  %v6863_v51 = vor.u32 %v9047_v47, %v6862_v46  ;;  %v6963_v41 = vor.u32 %v9069_v31, %v6960_v34  ;;  %v8863_v46 = vld [vmem:[%s14247_s6 + $0x34] sm:$0xf0]  ;;  %v9065_v47 = vld [vmem:[%s14247_s6 + $0x68c] sm:$0xf]  ;;  %v6750_v34 = vld [vmem:[%s14247_s6 + $0x508] sm:$0xf] }
 0x119   :  { %2657 = vmatpush.bf16.msra.mxu2 %v7023_v1  ;;  %v6435_v1 = vor.u32 %v8937_v52, %v6432_v54  ;;  %2502 = vmatpush.bf16.msrb.mxu1 %v6747_v58  ;;  %v6463_v52 = vor.u32 %v8947_v37, %v6462_v36  ;;  %v6387_v54 = vor.u32 %v8925_v39, %v6384_v43  ;;  %v8921_v58 = vld [vmem:[%s14247_s6 + $0x20c] sm:$0xf]  ;;  %v6398_v37 = vld [vmem:[%s14247_s6 + $0x248] sm:$0xf]  ;;  %v11170_v39 = vpop.f32.mrf.mxu2 }
 0x11a   :  { %2513 = vmatpush.bf16.msrb.mxu3 %v6907_v53  ;;  %v6446_v53 = vld [vmem:[%s14247_s6 + $0x2a8] sm:$0xf] }
 0x11b   :  { %v6798_v43 = vld [vmem:[%s14247_s6 + $0x568] sm:$0xf] }
 0x11c   :  { %2577 = vmatpush.bf16.msra.mxu0 %v6287_v63  ;;  %2503 = vmatmul.bf16.vlgmr.msrb.gmra.mxu1 %v9976_v18  ;;  %v6846_v63 = vld [vmem:[%s14247_s6 + $0x5c8] sm:$0xf] }
 0x11d   :  { %2658 = vmatpush.bf16.msra.mxu2 %v7007_v17  ;;  %2552 = vmatpush.bf16.msra.mxu1 %v7291_v0  ;;  %v6419_v17 = vor.u32 %v8933_v5, %v6416_v7  ;;  %v9043_v0 = vld [vmem:[%s14247_s6 + $0x5d4] sm:$0xf0]  ;;  %v6371_v7 = vor.u32 %v8921_v58, %v6368_v62  ;;  %v2311_v58 = vpop.f32.mrf.mxu0 }
 0x11e   :  { %2514 = vmatpush.bf16.msrb.mxu3 %v6891_v6  ;;  %v6847_v5 = vor.u32 %v9043_v0, %v6846_v63  ;;  %v6447_v6 = vor.u32 %v8943_v55, %v6446_v53  ;;  %v8927_v53 = vld [vmem:[%s14247_s6 + $0x234] sm:$0xf0]  ;;  %v9061_v0 = vld [vmem:[%s14247_s6 + $0x66c] sm:$0xf]  ;;  %v7278_v58 = vld [vmem:[%s14247_s6 + $0x928] sm:$0xf] }
 0x11f   :  { %v9027_v62 = vld [vmem:[%s14247_s6 + $0x554] sm:$0xf0] }
 0x120   :  { %2659 = vmatmul.bf16.vlgmr.msra.gmra.mxu2 %v10649_v60  ;;  %2578 = vmatpush.bf16.msra.mxu0 %v6271_v12  ;;  %v6158_v12 = vld [vmem:[%s14247_s6 + $0x68] sm:$0xf]  ;;  %v8859_v63 = vld [vmem:[%s14247_s6 + $0x14] sm:$0xf0] }
 0x121   :  { %2716 = vmatpush.bf16.msrb.mxu2 %v6483_v21  ;;  %v6478_v21 = vld [vmem:[%s14247_s6 + $0x2e8] sm:$0xf]  ;;  %2553 = vmatpush.bf16.msra.mxu1 %v7275_v13  ;;  %v6159_v24 = vor.u32 %v8871_v16, %v6158_v12  ;;  %v9023_v16 = vld [vmem:[%s14247_s6 + $0x534] sm:$0xf0] }
 0x122   :  { %2515 = vmatpush.bf16.msrb.mxu3 %v6875_v22  ;;  %v6830_v13 = vld [vmem:[%s14247_s6 + $0x5a8] sm:$0xf] }
 0x123   :  { %v6831_v20 = vor.u32 %v9039_v15, %v6830_v13  ;;  %v6414_v22 = vld [vmem:[%s14247_s6 + $0x268] sm:$0xf]  ;;  %v9079_v13 = vld [vmem:[%s14247_s6 + $0x6f4] sm:$0xf0] }
 0x124   :  { %2579 = vmatpush.bf16.msra.mxu0 %v6255_v29  ;;  %v9035_v29 = vld [vmem:[%s14247_s6 + $0x594] sm:$0xf0]  ;;  %v6766_v15 = vld [vmem:[%s14247_s6 + $0x528] sm:$0xf] }
 0x125   :  { %2717 = vmatpush.bf16.msrb.mxu2 %v6467_v35  ;;  %v6479_v35 = vor.u32 %v8951_v23, %v6478_v21  ;;  %2554 = vmatpush.bf16.msra.mxu1 %v7259_v30  ;;  %v6431_v21 = vor.u32 %v8939_v9, %v6430_v8  ;;  %v8935_v23 = vld [vmem:[%s14247_s6 + $0x274] sm:$0xf0]  ;;  %v6990_v9 = vld [vmem:[%s14247_s6 + $0x6e8] sm:$0xf]  ;;  %v11259_v31 = vpop.f32.mrf.mxu0 }
 0x126   :  { %2560 = vmatpush.bf16.msra.mxu3 %v6223_v26  ;;  %v6142_v26 = vld [vmem:[%s14247_s6 + $0x48] sm:$0xf]  ;;  %v8867_v30 = vld [vmem:[%s14247_s6 + $0x54] sm:$0xf0]  ;;  %v6415_v36 = vor.u32 %v8935_v23, %v6414_v22 }
 0x127   :  { %2516 = vmatmul.bf16.vlgmr.msrb.gmra.mxu3 %v10598_v32  ;;  %v6143_v40 = vor.u32 %v8867_v30, %v6142_v26  ;;  %v8923_v8 = vld [vmem:[%s14247_s6 + $0x214] sm:$0xf0]  ;;  %v6718_v23 = vld [vmem:[%s14247_s6 + $0x4c8] sm:$0xf]  ;;  %v9053_v30 = vld [vmem:[%s14247_s6 + $0x62c] sm:$0xf] }
 0x128   :  { %2580 = vmatpush.bf16.msra.mxu0 %v6239_v44  ;;  %v9031_v44 = vld [vmem:[%s14247_s6 + $0x574] sm:$0xf0]  ;;  %v6974_v26 = vld [vmem:[%s14247_s6 + $0x6c8] sm:$0xf] }
 0x129   :  { %2718 = vmatpush.bf16.msrb.mxu2 %v6451_v49  ;;  %v6190_v49 = vld [vmem:[%s14247_s6 + $0xa8] sm:$0xf]  ;;  %2586 = vmatpush.bf16.msrb.mxu1 %v6479_v35  ;;  %v6815_v35 = vor.u32 %v9035_v29, %v6814_v28  ;;  %v9075_v28 = vld [vmem:[%s14247_s6 + $0x6d4] sm:$0xf0] }
 0x12a   :  { %2561 = vmatpush.bf16.msra.mxu3 %v6207_v42  ;;  %v6191_v59 = vor.u32 %v8879_v50, %v6190_v49  ;;  %v6126_v42 = vld [vmem:[%s14247_s6 + $0x28] sm:$0xf]  ;;  %v6944_v49 = vld [vmem:[%s14247_s6 + $0x698] sm:$0xf0]  ;;  %v6799_v50 = vor.u32 %v9031_v44, %v6798_v43  ;;  %v9007_v43 = vld [vmem:[%s14247_s6 + $0x4b4] sm:$0xf0] }
 0x12b   :  { %2581 = vmatmul.bf16.vlgmr.msra.gmra.mxu0 %v9898_v48  ;;  %v6947_v55 = vor.u32 %v9065_v47, %v6944_v49  ;;  %v6958_v47 = vld [vmem:[%s14247_s6 + $0x6a8] sm:$0xf] }
 0x12c   :  { %2625 = vmatpush.bf16.msrb.mxu0 %v6863_v51  ;;  %7301 = vmatmul.msk.bf16.vlgmr.msra.gmra.mxu1 %vm2296_vm1, %v10060_v57 }
 0x12d   :  { %2719 = vmatpush.bf16.msrb.mxu2 %v6435_v1  ;;  %v8875_v1 = vld [vmem:[%s14247_s6 + $0x94] sm:$0xf0]  ;;  %2587 = vmatpush.bf16.msrb.mxu1 %v6463_v52  ;;  %v6382_v52 = vld [vmem:[%s14247_s6 + $0x228] sm:$0xf] }
 0x12e   :  { %2562 = vmatpush.bf16.msra.mxu3 %v6191_v59  ;;  %v6175_v10 = vor.u32 %v8875_v1, %v6174_v56  ;;  %v6110_v56 = vld [vmem:[%s14247_s6 + $0x8] sm:$0xf]  ;;  %v6928_v1 = vld [vmem:[%s14247_s6 + $0x678] sm:$0xf0]  ;;  %v6383_v4 = vor.u32 %v8927_v53, %v6382_v52  ;;  %v9071_v52 = vld [vmem:[%s14247_s6 + $0x6b4] sm:$0xf0] }
 0x12f   :  { %v6782_v59 = vld [vmem:[%s14247_s6 + $0x548] sm:$0xf]  ;;  %v6931_v12 = vor.u32 %v9061_v0, %v6928_v1  ;;  %v6959_v0 = vor.u32 %v9071_v52, %v6958_v47  ;;  %v11386_v47 = vld [vmem:[%s14253_s28] sm:$0xf] }
 0x130   :  { %2626 = vmatpush.bf16.msrb.mxu0 %v6847_v5  ;;  %v6783_v3 = vor.u32 %v9027_v62, %v6782_v59  ;;  %v6734_v5 = vld [vmem:[%s14247_s6 + $0x4e8] sm:$0xf]  ;;  %v9151_v59 = vld [vmem:[%s14247_s6 + $0x934] sm:$0xf0] }
 0x131   :  { %2720 = vmatpush.bf16.msrb.mxu2 %v6419_v17  ;;  %v9073_v17 = vld [vmem:[%s14247_s6 + $0x6cc] sm:$0xf]  ;;  %2588 = vmatpush.bf16.msrb.mxu1 %v6447_v6  ;;  %v9015_v6 = vld [vmem:[%s14247_s6 + $0x4f4] sm:$0xf0]  ;;  %v6686_v53 = vld [vmem:[%s14247_s6 + $0x488] sm:$0xf]  ;;  %v7279_v1 = vor.u32 %v9151_v59, %v7278_v58 }
 0x132   :  { %2563 = vmatpush.bf16.msra.mxu3 %v6175_v10  ;;  %v6979_v25 = vor.u32 %v9073_v17, %v6976_v19  ;;  %v2324_v10 = vpop.f32.mrf.mxu2  ;;  %v6735_v17 = vor.u32 %v9015_v6, %v6734_v5  ;;  %v9057_v19 = vld [vmem:[%s14247_s6 + $0x64c] sm:$0xf]  ;;  %v9003_v62 = vld [vmem:[%s14247_s6 + $0x494] sm:$0xf0]  ;;  %v6942_v5 = vld [vmem:[%s14247_s6 + $0x688] sm:$0xf] }
 0x133   :  { %v9067_v6 = vld [vmem:[%s14247_s6 + $0x694] sm:$0xf0]  ;;  %v6670_v10 = vld [vmem:[%s14247_s6 + $0x468] sm:$0xf] }
 0x134   :  { %2627 = vmatpush.bf16.msrb.mxu0 %v6831_v20  ;;  %v6912_v20 = vld [vmem:[%s14247_s6 + $0x658] sm:$0xf0]  ;;  %v6638_v52 = vld [vmem:[%s14247_s6 + $0x428] sm:$0xf] }
 0x135   :  { %2721 = vmatpush.bf16.msrb.mxu2 %v6403_v38  ;;  %2589 = vmatpush.bf16.msrb.mxu1 %v6431_v21  ;;  %v8931_v38 = vld [vmem:[%s14247_s6 + $0x254] sm:$0xf0]  ;;  %v6767_v21 = vor.u32 %v9023_v16, %v6766_v15  ;;  %v6915_v29 = vor.u32 %v9057_v19, %v6912_v20  ;;  %v7354_v16 = vld [vmem:[%s14251_s29 + $0x60] sm:$0xf]  ;;  %v6943_v19 = vor.u32 %v9067_v6, %v6942_v5 }
 0x136   :  { %2564 = vmatpush.bf16.msra.mxu3 %v6159_v24  ;;  %v6399_v51 = vor.u32 %v8931_v38, %v6398_v37  ;;  %v9011_v24 = vld [vmem:[%s14247_s6 + $0x4d4] sm:$0xf0]  ;;  %v6896_v37 = vld [vmem:[%s14247_s6 + $0x638] sm:$0xf0]  ;;  %v7294_v38 = vld [vmem:[%s14247_s6 + $0x948] sm:$0xf] }
 0x137   :  { %v8999_v15 = vld [vmem:[%s14247_s6 + $0x474] sm:$0xf0] }
 0x138   :  { %2628 = vmatpush.bf16.msrb.mxu0 %v6815_v35  ;;  %v9019_v35 = vld [vmem:[%s14247_s6 + $0x514] sm:$0xf0] }
 0x139   :  { %2722 = vmatpush.bf16.msrb.mxu2 %v6387_v54  ;;  %2590 = vmatpush.bf16.msrb.mxu1 %v6415_v36  ;;  %v6127_v54 = vor.u32 %v8863_v46, %v6126_v42  ;;  %v6719_v36 = vor.u32 %v9011_v24, %v6718_v23  ;;  %v6702_v42 = vld [vmem:[%s14247_s6 + $0x4a8] sm:$0xf]  ;;  %v6751_v44 = vor.u32 %v9019_v35, %v6750_v34  ;;  %v9063_v24 = vld [vmem:[%s14247_s6 + $0x674] sm:$0xf0]  ;;  %v7346_v35 = vld [vmem:[%s14251_s29 + $0x50] sm:$0xf] }
 0x13a   :  { %2565 = vmatpush.bf16.msra.mxu3 %v6143_v40  ;;  %v9155_v40 = vld [vmem:[%s14247_s6 + $0x954] sm:$0xf0]  ;;  %v6975_v46 = vor.u32 %v9075_v28, %v6974_v26  ;;  %v11286_v49 = vpop.f32.mrf.mxu2  ;;  %v6926_v23 = vld [vmem:[%s14247_s6 + $0x668] sm:$0xf]  ;;  %v6671_v26 = vor.u32 %v8999_v15, %v6670_v10  ;;  %v7330_v10 = vld [vmem:[%s14251_s29 + $0x30] sm:$0xf] }
 0x13b   :  { %v8995_v34 = vld [vmem:[%s14247_s6 + $0x454] sm:$0xf0] }
 0x13c   :  { %2629 = vmatpush.bf16.msrb.mxu0 %v6799_v50  ;;  %v7295_v50 = vor.u32 %v9155_v40, %v7294_v38  ;;  %v6927_v40 = vor.u32 %v9063_v24, %v6926_v23 }
 0x13d   :  { %2723 = vmatpush.bf16.msrb.mxu2 %v6371_v7  ;;  %2591 = vmatpush.bf16.msrb.mxu1 %v6399_v51  ;;  %v6366_v7 = vld [vmem:[%s14247_s6 + $0x208] sm:$0xf]  ;;  %v6899_v51 = vor.u32 %v9053_v30, %v6896_v37 }
 0x13e   :  { %2566 = vmatpush.bf16.msra.mxu3 %v6127_v54  ;;  %v6367_v22 = vor.u32 %v8923_v8, %v6366_v7  ;;  %v9049_v54 = vld [vmem:[%s14247_s6 + $0x60c] sm:$0xf]  ;;  %v2363_v7 = vpop.f32.mrf.mxu0  ;;  %v6687_v8 = vor.u32 %v9003_v62, %v6686_v53 }
 0x13f   :  { %v6622_v7 = vld [vmem:[%s14247_s6 + $0x408] sm:$0xf] }
 0x140   :  { %2724 = vmatmul.bf16.vlgmr.msrb.gmra.mxu2 %v10477_v33  ;;  %2630 = vmatpush.bf16.msrb.mxu0 %v6783_v3  ;;  %v9534_v3 = vld [vmem:[%s14252_s26] ss:$0 sm:$0xff] }
 0x141   :  { %2768 = vmatpush.bf16.msra.mxu2 %v6995_v11  ;;  %v6111_v11 = vor.u32 %v8859_v63, %v6110_v56  ;;  %2592 = vmatpush.bf16.msrb.mxu1 %v6383_v4  ;;  %v6880_v56 = vld [vmem:[%s14247_s6 + $0x618] sm:$0xf0]  ;;  %v7362_v63 = vld [vmem:[%s14251_s29 + $0x70] sm:$0xf] }
 0x142   :  { %v6883_v4 = vor.u32 %v9049_v54, %v6880_v56  ;;  %v2376_v20 = vpop.f32.mrf.mxu2  ;;  %v8991_v54 = vld [vmem:[%s14247_s6 + $0x434] sm:$0xf0]  ;;  %v9165_v56 = vld [vmem:[%s14251_s29 + $0x44] sm:$0xf0] }
 0x143   :  { %2567 = vmatpush.bf16.msra.mxu3 %v6111_v11  ;;  %v7262_v11 = vld [vmem:[%s14247_s6 + $0x908] sm:$0xf]  ;;  %v461_v38 = vpop.f32.mrf.mxu3  ;;  %v6639_v5 = vor.u32 %v8991_v54, %v6638_v52  ;;  %v7314_v54 = vld [vmem:[%s14251_s29 + $0x10] sm:$0xf] }
 0x144   :  { %2631 = vmatpush.bf16.msrb.mxu0 %v6767_v21  ;;  %v8917_v21 = vld [vmem:[%s14247_s6 + $0x1ec] sm:$0xf] }
 0x145   :  { %2769 = vmatpush.bf16.msra.mxu2 %v6979_v25  ;;  %v6991_v25 = vor.u32 %v9079_v13, %v6990_v9  ;;  %2593 = vmatpush.bf16.msrb.mxu1 %v6367_v22  ;;  %v6352_v22 = vld [vmem:[%s14247_s6 + $0x1f8] sm:$0xf0] }
 0x146   :  { %2568 = vmatmul.bf16.vlgmr.msra.gmra.mxu3 %v10205_v2  ;;  %v6355_v37 = vor.u32 %v8917_v21, %v6352_v22  ;;  %v6878_v21 = vld [vmem:[%s14247_s6 + $0x608] sm:$0xf]  ;;  %v9051_v22 = vld [vmem:[%s14247_s6 + $0x614] sm:$0xf0] }
 0x147   :  { %2612 = vmatpush.bf16.msrb.mxu3 %v6735_v17  ;;  %v9169_v17 = vld [vmem:[%s14251_s29 + $0x64] sm:$0xf0] }
 0x148   :  { %2594 = vmatmul.bf16.vlgmr.msrb.gmra.mxu1 %v10477_v33  ;;  %v9171_v33 = vld [vmem:[%s14251_s29 + $0x74] sm:$0xf0]  ;;  %2632 = vmatpush.bf16.msrb.mxu0 %v6751_v44  ;;  %v7355_v28 = vor.u32 %v9169_v17, %v7354_v16  ;;  %v6910_v44 = vld [vmem:[%s14247_s6 + $0x648] sm:$0xf]  ;;  %v8905_v17 = vld [vmem:[%s14247_s6 + $0x18c] sm:$0xf] }
 0x149   :  { %2770 = vmatpush.bf16.msra.mxu2 %v6963_v41  ;;  %v448_v41 = vpop.f32.mrf.mxu1  ;;  %2638 = vmatpush.bf16.msra.mxu1 %v6991_v25  ;;  %v7363_v9 = vor.u32 %v9171_v33, %v7362_v63  ;;  %v8909_v63 = vld [vmem:[%s14247_s6 + $0x1ac] sm:$0xf]  ;;  %v6320_v33 = vld [vmem:[%s14247_s6 + $0x1b8] sm:$0xf0]  ;;  %v9143_v16 = vld [vmem:[%s14247_s6 + $0x8f4] sm:$0xf0] }
 0x14a   :  { %v449_v30 = vadd.f32 %v9534_v3, %v448_v41  ;;  %v8913_v41 = vld [vmem:[%s14247_s6 + $0x1cc] sm:$0xf]  ;;  %v11402_v62 = vpop.f32.mrf.mxu2  ;;  %v9055_v3 = vld [vmem:[%s14247_s6 + $0x634] sm:$0xf0] }
 0x14b   :  { %2613 = vmatpush.bf16.msrb.mxu3 %v6719_v36  ;;  %2633 = vmatmul.bf16.vlgmr.msrb.gmra.mxu0 %v9976_v18  ;;  %v9167_v36 = vld [vmem:[%s14251_s29 + $0x54] sm:$0xf0] }
 0x14c   :  { %2682 = vmatpush.bf16.msra.mxu0 %v7295_v50 }
 0x14d   :  { %2771 = vmatpush.bf16.msra.mxu2 %v6947_v55  ;;  %v6703_v55 = vor.u32 %v9007_v43, %v6702_v42  ;;  %2639 = vmatpush.bf16.msra.mxu1 %v6975_v46  ;;  %v6336_v42 = vld [vmem:[%s14247_s6 + $0x1d8] sm:$0xf0]  ;;  %v11375_v43 = vadd.f32 %v461_v38, %v449_v30  ;;  %v9059_v46 = vld [vmem:[%s14247_s6 + $0x654] sm:$0xf0]  ;;  %v9161_v30 = vld [vmem:[%s14251_s29 + $0x24] sm:$0xf0] }
 0x14e   :  { %v6339_v58 = vor.u32 %v8913_v41, %v6336_v42  ;;  %v6911_v59 = vor.u32 %v9059_v46, %v6910_v44  ;;  %v8901_v42 = vld [vmem:[%s14247_s6 + $0x16c] sm:$0xf]  ;;  %v6288_v44 = vld [vmem:[%s14247_s6 + $0x178] sm:$0xf0] }
 0x14f   :  { %2614 = vmatpush.bf16.msrb.mxu3 %v6703_v55  ;;  %v7338_v55 = vld [vmem:[%s14251_s29 + $0x40] sm:$0xf] }
 0x150   :  { %2683 = vmatpush.bf16.msra.mxu0 %v7279_v1  ;;  %v6894_v1 = vld [vmem:[%s14247_s6 + $0x628] sm:$0xf]  ;;  %v7339_v6 = vor.u32 %v9165_v56, %v7338_v55  ;;  %v9159_v55 = vld [vmem:[%s14251_s29 + $0x14] sm:$0xf0] }
 0x151   :  { %2772 = vmatpush.bf16.msra.mxu2 %v6931_v12  ;;  %v9147_v12 = vld [vmem:[%s14247_s6 + $0x914] sm:$0xf0]  ;;  %v450_v13 = vpop.f32.mrf.mxu1  ;;  %2640 = vmatpush.bf16.msra.mxu1 %v6959_v0  ;;  %v788_v0 = vperm.slane %v11386_v47, 0  ;;  %v6895_v15 = vor.u32 %v9055_v3, %v6894_v1  ;;  %v8897_v1 = vld [vmem:[%s14247_s6 + $0x14c] sm:$0xf] }
 0x152   :  { %v7263_v25 = vor.u32 %v9147_v12, %v7262_v11  ;;  %v9163_v11 = vld [vmem:[%s14251_s29 + $0x34] sm:$0xf0]  ;;  %v6323_v12 = vor.u32 %v8909_v63, %v6320_v33  ;;  %v463_v13 = vpop.f32.mrf.mxu3  ;;  %v2428_v38 = vpop.f32.mrf.mxu2  ;;  %v6291_v63 = vor.u32 %v8901_v42, %v6288_v44  ;;  %v6272_v3 = vld [vmem:[%s14247_s6 + $0x158] sm:$0xf0] }
 0x153   :  { %2615 = vmatpush.bf16.msrb.mxu3 %v6687_v8  ;;  %v8987_v8 = vld [vmem:[%s14247_s6 + $0x414] sm:$0xf0]  ;;  %v2310_v20 = vadd.f32 %v11146_v27, %v788_v0  ;;  %v7331_v24 = vor.u32 %v9163_v11, %v7330_v10  ;;  %v6224_v27 = vld [vmem:[%s14247_s6 + $0xf8] sm:$0xf0]  ;;  %v7198_v10 = vld [vmem:[%s14247_s6 + $0x888] sm:$0xf] }
 0x154   :  { %2684 = vmatpush.bf16.msra.mxu0 %v7263_v25  ;;  %v6623_v23 = vor.u32 %v8987_v8, %v6622_v7  ;;  %v8885_v25 = vld [vmem:[%s14247_s6 + $0xec] sm:$0xf]  ;;  %v7306_v11 = vld [vmem:[%s14251_s29] sm:$0xf]  ;;  %v9131_v13 = vld [vmem:[%s14247_s6 + $0x894] sm:$0xf0] }
 0x155   :  { %2773 = vmatpush.bf16.msra.mxu2 %v6915_v29  ;;  %v6654_v29 = vld [vmem:[%s14247_s6 + $0x448] sm:$0xf]  ;;  %2641 = vmatpush.bf16.msra.mxu1 %v6943_v19  ;;  %v6304_v19 = vld [vmem:[%s14247_s6 + $0x198] sm:$0xf0]  ;;  %v6227_v41 = vor.u32 %v8885_v25, %v6224_v27  ;;  %v7199_v25 = vor.u32 %v9131_v13, %v7198_v10  ;;  %v9164_v10 = vld [vmem:[%s14251_s29 + $0x44] sm:$0xf] }
 0x156   :  { %v6655_v50 = vor.u32 %v8995_v34, %v6654_v29  ;;  %v7322_v29 = vld [vmem:[%s14251_s29 + $0x20] sm:$0xf]  ;;  %v6307_v34 = vor.u32 %v8905_v17, %v6304_v19  ;;  %v6275_v17 = vor.u32 %v8897_v1, %v6272_v3  ;;  %v6240_v38 = vld [vmem:[%s14247_s6 + $0x118] sm:$0xf0]  ;;  %v8861_v13 = vld [vmem:[%s14247_s6 + $0x2c] sm:$0xf] }
 0x157   :  { %2616 = vmatpush.bf16.msrb.mxu3 %v6671_v26  ;;  %v6864_v42 = vld [vmem:[%s14247_s6 + $0x5f8] sm:$0xf0] }
 0x158   :  { %2703 = vmatpush.bf16.msrb.mxu0 %v6355_v37  ;;  %v9139_v37 = vld [vmem:[%s14247_s6 + $0x8d4] sm:$0xf0]  ;;  %v6848_v1 = vld [vmem:[%s14247_s6 + $0x5d8] sm:$0xf0] }
 0x159   :  { %2774 = vmatpush.bf16.msra.mxu2 %v6899_v51  ;;  %v7347_v51 = vor.u32 %v9167_v36, %v7346_v35  ;;  %v11391_v53 = vpop.f32.mrf.mxu1  ;;  %2642 = vmatpush.bf16.msra.mxu1 %v6927_v40  ;;  %v6879_v35 = vor.u32 %v9051_v22, %v6878_v21  ;;  %v7230_v36 = vld [vmem:[%s14247_s6 + $0x8c8] sm:$0xf]  ;;  %v2323_v40 = vadd.f32 %v11170_v39, %v2310_v20  ;;  %v6208_v39 = vld [vmem:[%s14247_s6 + $0xd8] sm:$0xf0]  ;;  %v8873_v22 = vld [vmem:[%s14247_s6 + $0x8c] sm:$0xf] }
 0x15a   :  { %v7231_v52 = vor.u32 %v9139_v37, %v7230_v36  ;;  %v2348_v56 = vpop.f32.mrf.mxu3  ;;  %v6256_v20 = vld [vmem:[%s14247_s6 + $0x138] sm:$0xf0]  ;;  %v8869_v36 = vld [vmem:[%s14247_s6 + $0x6c] sm:$0xf] }
 0x15b   :  { %2617 = vmatpush.bf16.msrb.mxu3 %v6655_v50  ;;  %7302 = vmatmul.msk.bf16.vlgmr.msra.gmra.mxu0 %vm2296_vm1, %v10060_v57  ;;  %v7323_v50 = vor.u32 %v9161_v30, %v7322_v29  ;;  %v2336_v33 = vadd.f32 %v11391_v53, %v2323_v40  ;;  %v6192_v53 = vld [vmem:[%s14247_s6 + $0xb8] sm:$0xf0]  ;;  %v9127_v29 = vld [vmem:[%s14247_s6 + $0x874] sm:$0xf0]  ;;  %v9168_v30 = vld [vmem:[%s14251_s29 + $0x64] sm:$0xf] }
 0x15c   :  { %2704 = vmatpush.bf16.msrb.mxu0 %v6339_v58  ;;  %v7214_v58 = vld [vmem:[%s14247_s6 + $0x8a8] sm:$0xf]  ;;  %v8889_v37 = vld [vmem:[%s14247_s6 + $0x10c] sm:$0xf]  ;;  %v6160_v40 = vld [vmem:[%s14247_s6 + $0x78] sm:$0xf0] }
 0x15d   :  { %2775 = vmatpush.bf16.msra.mxu2 %v6883_v4  ;;  %v11417_v4 = vpop.f32.mrf.mxu0  ;;  %2643 = vmatpush.bf16.msra.mxu1 %v6911_v59  ;;  %v9135_v59 = vld [vmem:[%s14247_s6 + $0x8b4] sm:$0xf0]  ;;  %v2349_v7 = vadd.f32 %v2348_v56, %v2336_v33  ;;  %v11584_v56 = vpop.f32.mrf.mxu2  ;;  %v6144_v33 = vld [vmem:[%s14247_s6 + $0x58] sm:$0xf0] }
 0x15f   :  { %2618 = vmatpush.bf16.msrb.mxu3 %v6639_v5  ;;  %v7315_v5 = vor.u32 %v9159_v55, %v7314_v54  ;;  %v9166_v54 = vld [vmem:[%s14251_s29 + $0x54] sm:$0xf]  ;;  %v6243_v55 = vor.u32 %v8889_v37, %v6240_v38  ;;  %v9013_v37 = vld [vmem:[%s14247_s6 + $0x4ec] sm:$0xf]  ;;  %v6736_v38 = vld [vmem:[%s14247_s6 + $0x4f8] sm:$0xf0] }
 0x160   :  { %2776 = vmatmul.bf16.vlgmr.msra.gmra.mxu2 %v10598_v32  ;;  %2705 = vmatpush.bf16.msrb.mxu0 %v6323_v12  ;;  %v9157_v12 = vld [vmem:[%s14251_s29 + $0x4] sm:$0xf0] }
 0x161   :  { %3218 = vmatpush.bf16.msrb.mxu2 %v7363_v9  ;;  %v7246_v9 = vld [vmem:[%s14247_s6 + $0x8e8] sm:$0xf]  ;;  %v2337_v26 = vpop.f32.mrf.mxu1  ;;  %2644 = vmatpush.bf16.msra.mxu1 %v6895_v15  ;;  %v9170_v15 = vld [vmem:[%s14251_s29 + $0x74] sm:$0xf]  ;;  %v7307_v21 = vor.u32 %v9157_v12, %v7306_v11 }
 0x162   :  { %v7182_v26 = vld [vmem:[%s14247_s6 + $0x868] sm:$0xf] }
 0x163   :  { %2619 = vmatpush.bf16.msrb.mxu3 %v6623_v23  ;;  %v6176_v23 = vld [vmem:[%s14247_s6 + $0x98] sm:$0xf0] }
 0x164   :  { %2706 = vmatpush.bf16.msrb.mxu0 %v6307_v34 }
 0x165   :  { %3219 = vmatpush.bf16.msrb.mxu2 %v7355_v28  ;;  %v7247_v28 = vor.u32 %v9143_v16, %v7246_v9  ;;  %v2415_v46 = vpop.f32.mrf.mxu0  ;;  %2645 = vmatpush.bf16.msra.mxu1 %v6879_v35  ;;  %v7215_v9 = vor.u32 %v9135_v59, %v7214_v58  ;;  %v7364_v16 = vld [vmem:[%s14251_s29 + $0x78] sm:$0xf0]  ;;  %v6179_v35 = vor.u32 %v8873_v22, %v6176_v23  ;;  %v8865_v59 = vld [vmem:[%s14247_s6 + $0x4c] sm:$0xf]  ;;  %v7134_v22 = vld [vmem:[%s14247_s6 + $0x808] sm:$0xf] }
 0x166   :  { %2620 = vmatmul.bf16.vlgmr.msrb.gmra.mxu3 %v10347_v14  ;;  %v7367_v27 = vor.u32 %v9170_v15, %v7364_v16  ;;  %v7183_v46 = vor.u32 %v9127_v29, %v7182_v26  ;;  %v6163_v58 = vor.u32 %v8869_v36, %v6160_v40  ;;  %v6147_v12 = vor.u32 %v8865_v59, %v6144_v33  ;;  %v6128_v16 = vld [vmem:[%s14247_s6 + $0x38] sm:$0xf0]  ;;  %v9115_v23 = vld [vmem:[%s14247_s6 + $0x814] sm:$0xf0] }
 0x167   :  { %2664 = vmatpush.bf16.msra.mxu3 %v7247_v28  ;;  %v2350_v28 = vpop.f32.mrf.mxu3  ;;  %v6131_v26 = vor.u32 %v8861_v13, %v6128_v16  ;;  %v7332_v29 = vld [vmem:[%s14251_s29 + $0x38] sm:$0xf0]  ;;  %v7135_v36 = vor.u32 %v9115_v23, %v7134_v22 }
 0x168   :  { %2646 = vmatmul.bf16.vlgmr.msra.gmra.mxu1 %v10598_v32  ;;  %2707 = vmatpush.bf16.msrb.mxu0 %v6291_v63  ;;  %v8893_v32 = vld [vmem:[%s14247_s6 + $0x12c] sm:$0xf]  ;;  %v9162_v28 = vld [vmem:[%s14251_s29 + $0x34] sm:$0xf]  ;;  %v6720_v33 = vld [vmem:[%s14247_s6 + $0x4d8] sm:$0xf0] }
 0x169   :  { %3220 = vmatpush.bf16.msrb.mxu2 %v7347_v51  ;;  %v8881_v51 = vld [vmem:[%s14247_s6 + $0xcc] sm:$0xf]  ;;  %2690 = vmatpush.bf16.msrb.mxu1 %v6227_v41  ;;  %v2387_v8 = vpop.f32.mrf.mxu1  ;;  %v6259_v34 = vor.u32 %v8893_v32, %v6256_v20  ;;  %v6704_v13 = vld [vmem:[%s14247_s6 + $0x4b8] sm:$0xf0] }
 0x16a   :  { %v6211_v0 = vor.u32 %v8881_v51, %v6208_v39  ;;  %v9045_v41 = vld [vmem:[%s14247_s6 + $0x5ec] sm:$0xf]  ;;  %v7166_v51 = vld [vmem:[%s14247_s6 + $0x848] sm:$0xf] }
 0x16b   :  { %2665 = vmatpush.bf16.msra.mxu3 %v7231_v52  ;;  %v9123_v52 = vld [vmem:[%s14247_s6 + $0x854] sm:$0xf0]  ;;  %v6867_v63 = vor.u32 %v9045_v41, %v6864_v42  ;;  %v7335_v41 = vor.u32 %v9162_v28, %v7332_v29  ;;  %v8977_v42 = vld [vmem:[%s14247_s6 + $0x3cc] sm:$0xf] }
 0x16c   :  { %2708 = vmatpush.bf16.msrb.mxu0 %v6275_v17  ;;  %v9037_v17 = vld [vmem:[%s14247_s6 + $0x5ac] sm:$0xf] }
 0x16d   :  { %3221 = vmatpush.bf16.msrb.mxu2 %v7339_v6  ;;  %v8877_v6 = vld [vmem:[%s14247_s6 + $0xac] sm:$0xf]  ;;  %2691 = vmatpush.bf16.msrb.mxu1 %v6211_v0  ;;  %v11681_v59 = vpop.f32.mrf.mxu0 }
 0x16e   :  { %v6195_v19 = vor.u32 %v8877_v6, %v6192_v53  ;;  %v9041_v0 = vld [vmem:[%s14247_s6 + $0x5cc] sm:$0xf]  ;;  %v7150_v53 = vld [vmem:[%s14247_s6 + $0x828] sm:$0xf] }
 0x16f   :  { %2666 = vmatpush.bf16.msra.mxu3 %v7215_v9  ;;  %v9119_v9 = vld [vmem:[%s14247_s6 + $0x834] sm:$0xf0]  ;;  %v6851_v15 = vor.u32 %v9041_v0, %v6848_v1  ;;  %v8965_v29 = vld [vmem:[%s14247_s6 + $0x36c] sm:$0xf] }
 0x170   :  { %2709 = vmatpush.bf16.msrb.mxu0 %v6259_v34  ;;  %v7151_v20 = vor.u32 %v9119_v9, %v7150_v53  ;;  %v6816_v34 = vld [vmem:[%s14247_s6 + $0x598] sm:$0xf0] }
 0x171   :  { %3222 = vmatpush.bf16.msrb.mxu2 %v7331_v24  ;;  %v2362_v24 = vadd.f32 %v11259_v31, %v2349_v7  ;;  %v7356_v31 = vld [vmem:[%s14251_s29 + $0x68] sm:$0xf0]  ;;  %2692 = vmatpush.bf16.msrb.mxu1 %v6195_v19  ;;  %v2389_v39 = vpop.f32.mrf.mxu1  ;;  %v2400_v7 = vpop.f32.mrf.mxu3  ;;  %v6832_v19 = vld [vmem:[%s14247_s6 + $0x5b8] sm:$0xf0] }
 0x172   :  { %v9160_v39 = vld [vmem:[%s14251_s29 + $0x24] sm:$0xf]  ;;  %v7316_v53 = vld [vmem:[%s14251_s29 + $0x18] sm:$0xf0] }
 0x173   :  { %v2375_v44 = vadd.f32 %v11286_v49, %v2362_v24  ;;  %2667 = vmatpush.bf16.msra.mxu3 %v7199_v25  ;;  %v7348_v49 = vld [vmem:[%s14251_s29 + $0x58] sm:$0xf0]  ;;  %v8981_v24 = vld [vmem:[%s14247_s6 + $0x3ec] sm:$0xf]  ;;  %v2441_v25 = vpop.f32.mrf.mxu2 }
 0x174   :  { %v7351_v6 = vor.u32 %v9166_v54, %v7348_v49  ;;  %2710 = vmatpush.bf16.msrb.mxu0 %v6243_v55  ;;  %v6739_v49 = vor.u32 %v9013_v37, %v6736_v38  ;;  %v9029_v55 = vld [vmem:[%s14247_s6 + $0x56c] sm:$0xf]  ;;  %v6672_v37 = vld [vmem:[%s14247_s6 + $0x478] sm:$0xf0] }
 0x175   :  { %3223 = vmatpush.bf16.msrb.mxu2 %v7323_v50  ;;  %v7359_v50 = vor.u32 %v9168_v30, %v7356_v31  ;;  %2693 = vmatpush.bf16.msrb.mxu1 %v6179_v35  ;;  %v2388_v3 = vadd.f32 %v2387_v8, %v2375_v44  ;;  %v7340_v8 = vld [vmem:[%s14251_s29 + $0x48] sm:$0xf0]  ;;  %v6835_v31 = vor.u32 %v9037_v17, %v6832_v19  ;;  %v2480_v25 = vpop.f32.mrf.mxu0 }
 0x176   :  { %v8857_v30 = vld [vmem:[%s14247_s6 + $0xc] sm:$0xf] }
 0x177   :  { %2668 = vmatpush.bf16.msra.mxu3 %v7183_v46  ;;  %v2401_v11 = vadd.f32 %v2400_v7, %v2388_v3  ;;  %2711 = vmatmul.bf16.vlgmr.msrb.gmra.mxu0 %v9898_v48  ;;  %v6112_v48 = vld [vmem:[%s14247_s6 + $0x18] sm:$0xf0]  ;;  %v8973_v3 = vld [vmem:[%s14247_s6 + $0x3ac] sm:$0xf] }
 0x178   :  { %2755 = vmatpush.bf16.msra.mxu0 %v6867_v63  ;;  %v9009_v63 = vld [vmem:[%s14247_s6 + $0x4cc] sm:$0xf] }
 0x179   :  { %3224 = vmatpush.bf16.msrb.mxu2 %v7315_v5  ;;  %v7167_v5 = vor.u32 %v9123_v52, %v7166_v51  ;;  %2694 = vmatpush.bf16.msrb.mxu1 %v6163_v58  ;;  %v2414_v32 = vadd.f32 %v11417_v4, %v2401_v11  ;;  %v6608_v4 = vld [vmem:[%s14247_s6 + $0x3f8] sm:$0xf0]  ;;  %v2402_v44 = vpop.f32.mrf.mxu3  ;;  %v7324_v52 = vld [vmem:[%s14251_s29 + $0x28] sm:$0xf0] }
 0x17a   :  { %v6611_v40 = vor.u32 %v8981_v24, %v6608_v4  ;;  %v6592_v51 = vld [vmem:[%s14247_s6 + $0x3d8] sm:$0xf0]  ;;  %v7327_v1 = vor.u32 %v9160_v39, %v7324_v52  ;;  %v8969_v17 = vld [vmem:[%s14247_s6 + $0x38c] sm:$0xf] }
 0x17b   :  { %2669 = vmatpush.bf16.msra.mxu3 %v7167_v5  ;;  %v6800_v58 = vld [vmem:[%s14247_s6 + $0x578] sm:$0xf0]  ;;  %v6595_v0 = vor.u32 %v8977_v42, %v6592_v51  ;;  %v11702_v9 = vpop.f32.mrf.mxu2  ;;  %v11720_v19 = vpop.f32.mrf.mxu1  ;;  %v9021_v24 = vld [vmem:[%s14247_s6 + $0x52c] sm:$0xf] }
 0x17c   :  { %2756 = vmatpush.bf16.msra.mxu0 %v6851_v15  ;;  %v6576_v5 = vld [vmem:[%s14247_s6 + $0x3b8] sm:$0xf0]  ;;  %v6803_v7 = vor.u32 %v9029_v55, %v6800_v58  ;;  %v8993_v51 = vld [vmem:[%s14247_s6 + $0x44c] sm:$0xf] }
 0x17d   :  { %3225 = vmatpush.bf16.msrb.mxu2 %v7307_v21  ;;  %v7343_v21 = vor.u32 %v9164_v10, %v7340_v8  ;;  %2695 = vmatpush.bf16.msrb.mxu1 %v6147_v12  ;;  %v6723_v10 = vor.u32 %v9009_v63, %v6720_v33  ;;  %v9025_v8 = vld [vmem:[%s14247_s6 + $0x54c] sm:$0xf]  ;;  %v6784_v11 = vld [vmem:[%s14247_s6 + $0x558] sm:$0xf0]  ;;  %v6579_v15 = vor.u32 %v8973_v3, %v6576_v5 }
 0x17e   :  { %v9005_v12 = vld [vmem:[%s14247_s6 + $0x4ac] sm:$0xf]  ;;  %v6787_v22 = vor.u32 %v9025_v8, %v6784_v11  ;;  %v6768_v4 = vld [vmem:[%s14247_s6 + $0x538] sm:$0xf0] }
 0x17f   :  { %2670 = vmatpush.bf16.msra.mxu3 %v7151_v20  ;;  %v9156_v20 = vld [vmem:[%s14251_s29 + $0x4] sm:$0xf]  ;;  %v6707_v23 = vor.u32 %v9005_v12, %v6704_v13  ;;  %v6528_v42 = vld [vmem:[%s14247_s6 + $0x358] sm:$0xf0]  ;;  %v8957_v55 = vld [vmem:[%s14247_s6 + $0x32c] sm:$0xf] }
 0x180   :  { %2757 = vmatpush.bf16.msra.mxu0 %v6835_v31  ;;  %v6771_v31 = vor.u32 %v9021_v24, %v6768_v4  ;;  %v6656_v39 = vld [vmem:[%s14247_s6 + $0x458] sm:$0xf0]  ;;  %v8989_v3 = vld [vmem:[%s14247_s6 + $0x42c] sm:$0xf] }
 0x181   :  { %3270 = vmatpush.bf16.msra.mxu2 %v7367_v27  ;;  %v2427_v27 = vadd.f32 %v11402_v62, %v2414_v32  ;;  %v9033_v62 = vld [vmem:[%s14247_s6 + $0x58c] sm:$0xf]  ;;  %2696 = vmatpush.bf16.msrb.mxu1 %v6131_v26  ;;  %v6560_v32 = vld [vmem:[%s14247_s6 + $0x398] sm:$0xf0] }
 0x182   :  { %v6819_v54 = vor.u32 %v9033_v62, %v6816_v34  ;;  %v6563_v26 = vor.u32 %v8969_v17, %v6560_v32  ;;  %v9017_v34 = vld [vmem:[%s14247_s6 + $0x50c] sm:$0xf]  ;;  %v6512_v58 = vld [vmem:[%s14247_s6 + $0x338] sm:$0xf0] }
 0x183   :  { %v2820_v35 = vmax.f32 %v2427_v27, 0.0  ;;  %2671 = vmatpush.bf16.msra.mxu3 %v7135_v36  ;;  %v9001_v27 = vld [vmem:[%s14247_s6 + $0x48c] sm:$0xf]  ;;  %v6640_v5 = vld [vmem:[%s14247_s6 + $0x438] sm:$0xf0] }
 0x184   :  { %2758 = vmatpush.bf16.msra.mxu0 %v6819_v54  ;;  %v8997_v36 = vld [vmem:[%s14247_s6 + $0x46c] sm:$0xf]  ;;  %v6496_v8 = vld [vmem:[%s14247_s6 + $0x318] sm:$0xf0]  ;;  %v6643_v12 = vor.u32 %v8989_v3, %v6640_v5 }
 0x185   :  { %3271 = vmatpush.bf16.msra.mxu2 %v7359_v50  ;;  %v11664_v46 = vpack.c.bf16 %v2820_v35, %v2820_v35  ;;  %v6115_v50 = vor.u32 %v8857_v30, %v6112_v48  ;;  %v6544_v30 = vld [vmem:[%s14247_s6 + $0x378] sm:$0xf0]  ;;  %v2493_v48 = vpop.f32.mrf.mxu2  ;;  %v9141_v17 = vld [vmem:[%s14247_s6 + $0x8ec] sm:$0xf] }
 0x186   :  { %2672 = vmatmul.bf16.vlgmr.msra.gmra.mxu3 %v10503_v45  ;;  %v6752_v35 = vld [vmem:[%s14247_s6 + $0x518] sm:$0xf0]  ;;  %v6547_v38 = vor.u32 %v8965_v29, %v6544_v30  ;;  %v9137_v30 = vld [vmem:[%s14247_s6 + $0x8cc] sm:$0xf] }
 0x187   :  { %3226 = vmatmul.bf16.vlgmr.msrb.gmra.mxu2 %v11664_v46  ;;  %2729 = vmatpush.bf16.msrb.mxu3 %v6611_v40  ;;  %v2454_v40 = vpop.f32.mrf.mxu1  ;;  %v6755_v44 = vor.u32 %v9017_v34, %v6752_v35  ;;  %v7120_v13 = vld [vmem:[%s14247_s6 + $0x7f8] sm:$0xf0] }
 0x188   :  { %2697 = vmatpush.bf16.msrb.mxu1 %v6115_v50  ;;  %2759 = vmatpush.bf16.msra.mxu0 %v6803_v7  ;;  %v6675_v50 = vor.u32 %v8997_v36, %v6672_v37  ;;  %v11775_v54 = vpop.f32.mrf.mxu0  ;;  %v7280_v7 = vld [vmem:[%s14247_s6 + $0x938] sm:$0xf0]  ;;  %v9133_v36 = vld [vmem:[%s14247_s6 + $0x8ac] sm:$0xf] }
 0x189   :  { %3272 = vmatpush.bf16.msra.mxu2 %v7351_v6  ;;  %v9158_v6 = vld [vmem:[%s14251_s29 + $0x14] sm:$0xf]  ;;  %v7088_v34 = vld [vmem:[%s14247_s6 + $0x7b8] sm:$0xf0] }
 0x18a   :  { %v7319_v16 = vor.u32 %v9158_v6, %v7316_v53  ;;  %v11789_v63 = vpop.f32.mrf.mxu3  ;;  %v6515_v6 = vor.u32 %v8957_v55, %v6512_v58  ;;  %v9149_v53 = vld [vmem:[%s14247_s6 + $0x92c] sm:$0xf]  ;;  %v7216_v37 = vld [vmem:[%s14247_s6 + $0x8b8] sm:$0xf0]  ;;  %v789_v55 = vperm.slane %v11386_v47, 1 }
 0x18b   :  { %2730 = vmatpush.bf16.msrb.mxu3 %v6595_v0  ;;  %2698 = vmatmul.bf16.vlgmr.msrb.gmra.mxu1 %v10205_v2  ;;  %v6688_v2 = vld [vmem:[%s14247_s6 + $0x498] sm:$0xf0]  ;;  %v7283_v11 = vor.u32 %v9149_v53, %v7280_v7  ;;  %v9121_v53 = vld [vmem:[%s14247_s6 + $0x84c] sm:$0xf] }
 0x18c   :  { %2742 = vmatpush.bf16.msra.mxu1 %v6739_v49  ;;  %2760 = vmatpush.bf16.msra.mxu0 %v6787_v22  ;;  %v6691_v62 = vor.u32 %v9001_v27, %v6688_v2  ;;  %v9153_v49 = vld [vmem:[%s14247_s6 + $0x94c] sm:$0xf]  ;;  %v7264_v22 = vld [vmem:[%s14247_s6 + $0x918] sm:$0xf0]  ;;  %v2440_v7 = vadd.f32 %v11584_v56, %v789_v55  ;;  %v7386_v55 = vld [vmem:[%s14251_s29 + $0xa0] sm:$0xf] }
 0x18d   :  { %3273 = vmatpush.bf16.msra.mxu2 %v7343_v21  ;;  %v7308_v21 = vld [vmem:[%s14251_s29 + $0x8] sm:$0xf0]  ;;  %v11791_v33 = vpop.f32.mrf.mxu2  ;;  %v7040_v3 = vld [vmem:[%s14247_s6 + $0x758] sm:$0xf0] }
 0x18e   :  { %v7311_v28 = vor.u32 %v9156_v20, %v7308_v21  ;;  %v7248_v20 = vld [vmem:[%s14247_s6 + $0x8f8] sm:$0xf0]  ;;  %v9145_v21 = vld [vmem:[%s14247_s6 + $0x90c] sm:$0xf] }
 0x18f   :  { %2731 = vmatpush.bf16.msrb.mxu3 %v6579_v15  ;;  %v8985_v15 = vld [vmem:[%s14247_s6 + $0x40c] sm:$0xf]  ;;  %v7267_v27 = vor.u32 %v9145_v21, %v7264_v22  ;;  %v7251_v29 = vor.u32 %v9141_v17, %v7248_v20  ;;  %v7168_v47 = vld [vmem:[%s14247_s6 + $0x858] sm:$0xf0] }
 0x190   :  { %2743 = vmatpush.bf16.msra.mxu1 %v6723_v10  ;;  %2761 = vmatpush.bf16.msra.mxu0 %v6771_v31  ;;  %v8953_v10 = vld [vmem:[%s14247_s6 + $0x30c] sm:$0xf]  ;;  %v7232_v31 = vld [vmem:[%s14247_s6 + $0x8d8] sm:$0xf0] }
 0x191   :  { %3274 = vmatpush.bf16.msra.mxu2 %v7335_v41  ;;  %v8961_v41 = vld [vmem:[%s14247_s6 + $0x34c] sm:$0xf]  ;;  %v6499_v32 = vor.u32 %v8953_v10, %v6496_v8  ;;  %v7235_v35 = vor.u32 %v9137_v30, %v7232_v31  ;;  %v7152_v56 = vld [vmem:[%s14247_s6 + $0x838] sm:$0xf0]  ;;  %v9185_v30 = vld [vmem:[%s14251_s29 + $0xe4] sm:$0xf0] }
 0x192   :  { %v6531_v52 = vor.u32 %v8961_v41, %v6528_v42  ;;  %v2467_v4 = vpop.f32.mrf.mxu3  ;;  %v9097_v41 = vld [vmem:[%s14247_s6 + $0x78c] sm:$0xf]  ;;  %v7008_v20 = vld [vmem:[%s14247_s6 + $0x718] sm:$0xf0] }
 0x193   :  { %2732 = vmatpush.bf16.msrb.mxu3 %v6563_v26  ;;  %v9105_v26 = vld [vmem:[%s14247_s6 + $0x7cc] sm:$0xf]  ;;  %v7136_v4 = vld [vmem:[%s14247_s6 + $0x818] sm:$0xf0] }
 0x194   :  { %2744 = vmatpush.bf16.msra.mxu1 %v6707_v23  ;;  %2762 = vmatpush.bf16.msra.mxu0 %v6755_v44  ;;  %v2532_v23 = vpop.f32.mrf.mxu0  ;;  %v7219_v44 = vor.u32 %v9133_v36, %v7216_v37 }
 0x195   :  { %3275 = vmatpush.bf16.msra.mxu2 %v7327_v1  ;;  %v6659_v1 = vor.u32 %v8993_v51, %v6656_v39  ;;  %v2545_v25 = vpop.f32.mrf.mxu2  ;;  %v9093_v39 = vld [vmem:[%s14247_s6 + $0x76c] sm:$0xf]  ;;  %v9187_v23 = vld [vmem:[%s14251_s29 + $0xf4] sm:$0xf0] }
 0x197   :  { %2733 = vmatpush.bf16.msrb.mxu3 %v6547_v38  ;;  %2763 = vmatmul.bf16.vlgmr.msra.gmra.mxu0 %v9976_v18  ;;  %v9109_v18 = vld [vmem:[%s14247_s6 + $0x7ec] sm:$0xf] }
 0x198   :  { %2745 = vmatpush.bf16.msra.mxu1 %v6691_v62  ;;  %v7123_v24 = vor.u32 %v9109_v18, %v7120_v13  ;;  %v9101_v62 = vld [vmem:[%s14247_s6 + $0x7ac] sm:$0xf]  ;;  %v7171_v18 = vor.u32 %v9121_v53, %v7168_v47 }
 0x199   :  { %3276 = vmatpush.bf16.msra.mxu2 %v7319_v16  ;;  %v6624_v16 = vld [vmem:[%s14247_s6 + $0x418] sm:$0xf0]  ;;  %v11861_v38 = vpop.f32.mrf.mxu1  ;;  %v7091_v40 = vor.u32 %v9101_v62, %v7088_v34  ;;  %v9117_v13 = vld [vmem:[%s14247_s6 + $0x82c] sm:$0xf]  ;;  %v7410_v34 = vld [vmem:[%s14251_s29 + $0xd0] sm:$0xf] }
 0x19a   :  { %v6627_v2 = vor.u32 %v8985_v15, %v6624_v16  ;;  %v2453_v15 = vadd.f32 %v11720_v19, %v2440_v7  ;;  %v7155_v22 = vor.u32 %v9117_v13, %v7152_v56  ;;  %v7426_v19 = vld [vmem:[%s14251_s29 + $0xf0] sm:$0xf]  ;;  %v7466_v56 = vld [vmem:[%s14251_s29 + $0x140] sm:$0xf] }
 0x19b   :  { %2734 = vmatpush.bf16.msrb.mxu3 %v6531_v52  ;;  %v7056_v52 = vld [vmem:[%s14247_s6 + $0x778] sm:$0xf0]  ;;  %v7378_v7 = vld [vmem:[%s14251_s29 + $0x90] sm:$0xf] }
 0x19c   :  { %2746 = vmatpush.bf16.msra.mxu1 %v6675_v50  ;;  %v9129_v50 = vld [vmem:[%s14247_s6 + $0x88c] sm:$0xf]  ;;  %v2466_v25 = vadd.f32 %v11789_v63, %v2453_v15  ;;  %v9197_v15 = vld [vmem:[%s14251_s29 + $0x144] sm:$0xf0] }
 0x19d   :  { %3277 = vmatpush.bf16.msra.mxu2 %v7311_v28  ;;  %v7104_v28 = vld [vmem:[%s14247_s6 + $0x7d8] sm:$0xf0]  ;;  %v11870_v42 = vpop.f32.mrf.mxu2 }
 0x19e   :  { %v7107_v48 = vor.u32 %v9105_v26, %v7104_v28  ;;  %v2479_v31 = vadd.f32 %v11681_v59, %v2466_v25  ;;  %v9195_v25 = vld [vmem:[%s14251_s29 + $0x134] sm:$0xf0] }
 0x19f   :  { %2735 = vmatpush.bf16.msrb.mxu3 %v6515_v6 }
 0x1a0   :  { %3278 = vmatmul.bf16.vlgmr.msra.gmra.mxu2 %v11664_v46  ;;  %v7296_v46 = vld [vmem:[%s14247_s6 + $0x958] sm:$0xf0]  ;;  %2747 = vmatpush.bf16.msra.mxu1 %v6659_v1  ;;  %v9089_v1 = vld [vmem:[%s14247_s6 + $0x74c] sm:$0xf]  ;;  %v2492_v59 = vadd.f32 %v11702_v9, %v2479_v31 }
 0x1a1   :  { %v7299_v0 = vor.u32 %v9153_v49, %v7296_v46  ;;  %v9125_v46 = vld [vmem:[%s14247_s6 + $0x86c] sm:$0xf]  ;;  %v2506_v58 = vpop.f32.mrf.mxu1  ;;  %v7043_v10 = vor.u32 %v9089_v1, %v7040_v3 }
 0x1a2   :  { %v9177_v58 = vld [vmem:[%s14251_s29 + $0xa4] sm:$0xf0] }
 0x1a3   :  { %2812 = vmatpush.bf16.msrb.mxu0 %v7299_v0  ;;  %2736 = vmatpush.bf16.msrb.mxu3 %v6499_v32  ;;  %v7059_v0 = vor.u32 %v9093_v39, %v7056_v52  ;;  %v9081_v32 = vld [vmem:[%s14247_s6 + $0x70c] sm:$0xf]  ;;  %v9179_v39 = vld [vmem:[%s14251_s29 + $0xb4] sm:$0xf0]  ;;  %v7387_v47 = vor.u32 %v9177_v58, %v7386_v55  ;;  %v9180_v55 = vld [vmem:[%s14251_s29 + $0xc4] sm:$0xf] }
 0x1a4   :  { %2748 = vmatpush.bf16.msra.mxu1 %v6643_v12  ;;  %v7024_v12 = vld [vmem:[%s14247_s6 + $0x738] sm:$0xf0]  ;;  %v7404_v58 = vld [vmem:[%s14251_s29 + $0xc8] sm:$0xf0] }
 0x1a5   :  { %v2610_v5 = vpop.f32.mrf.mxu2 }
 0x1a6   :  { %2737 = vmatmul.bf16.vlgmr.msrb.gmra.mxu3 %v10534_v61  ;;  %v7072_v61 = vld [vmem:[%s14247_s6 + $0x798] sm:$0xf0]  ;;  %v7474_v5 = vld [vmem:[%s14251_s29 + $0x150] sm:$0xf] }
 0x1a7   :  { %2813 = vmatpush.bf16.msrb.mxu0 %v7283_v11  ;;  %2781 = vmatpush.bf16.msra.mxu3 %v7123_v24  ;;  %v7075_v51 = vor.u32 %v9097_v41, %v7072_v61  ;;  %v9085_v11 = vld [vmem:[%s14247_s6 + $0x72c] sm:$0xf]  ;;  %v9181_v41 = vld [vmem:[%s14251_s29 + $0xc4] sm:$0xf0]  ;;  %v7490_v61 = vld [vmem:[%s14251_s29 + $0x170] sm:$0xf] }
 0x1a8   :  { %2749 = vmatpush.bf16.msra.mxu1 %v6627_v2  ;;  %v7027_v17 = vor.u32 %v9085_v11, %v7024_v12  ;;  %v9113_v24 = vld [vmem:[%s14247_s6 + $0x80c] sm:$0xf]  ;;  %v7427_v2 = vor.u32 %v9187_v23, %v7426_v19  ;;  %v11955_v36 = vpop.f32.mrf.mxu0 }
 0x1a9   :  { %v11919_v16 = vpop.f32.mrf.mxu1  ;;  %v7139_v28 = vor.u32 %v9113_v24, %v7136_v4  ;;  %v7458_v4 = vld [vmem:[%s14251_s29 + $0x130] sm:$0xf] }
 0x1aa   :  { %v2517_v8 = vpop.f32.mrf.mxu3 }
 0x1ab   :  { %2814 = vmatpush.bf16.msrb.mxu0 %v7267_v27  ;;  %2782 = vmatpush.bf16.msra.mxu3 %v7107_v48  ;;  %v7011_v27 = vor.u32 %v9081_v32, %v7008_v20  ;;  %v7370_v20 = vld [vmem:[%s14251_s29 + $0x80] sm:$0xf] }
 0x1ac   :  { %2794 = vmatpush.bf16.msrb.mxu1 %v7251_v29  ;;  %v7418_v29 = vld [vmem:[%s14251_s29 + $0xe0] sm:$0xf] }
 0x1ad   :  { %2750 = vmatmul.bf16.vlgmr.msra.gmra.mxu1 %v10347_v14  ;;  %v7200_v14 = vld [vmem:[%s14247_s6 + $0x898] sm:$0xf0]  ;;  %v11927_v21 = vpop.f32.mrf.mxu2  ;;  %v7419_v63 = vor.u32 %v9185_v30, %v7418_v29 }
 0x1ae   :  { %7303 = vmatmul.msk.bf16.vlgmr.msrb.gmra.mxu0 %vm2296_vm1, %v10060_v57  ;;  %v7203_v49 = vor.u32 %v9129_v50, %v7200_v14  ;;  %v7184_v57 = vld [vmem:[%s14247_s6 + $0x878] sm:$0xf0]  ;;  %v7394_v50 = vld [vmem:[%s14251_s29 + $0xb0] sm:$0xf]  ;;  %s14254_s6 = sld [smem:[#allocation11_spill]] }
 0x1af   :  { %2783 = vmatpush.bf16.msra.mxu3 %v7091_v40  ;;  %v7187_v6 = vor.u32 %v9125_v46, %v7184_v57  ;;  %v7402_v40 = vld [vmem:[%s14251_s29 + $0xc0] sm:$0xf]  ;;  %v7395_v57 = vor.u32 %v9179_v39, %v7394_v50 }
 0x1b0   :  { %2795 = vmatpush.bf16.msrb.mxu1 %v7235_v35  ;;  %v9183_v35 = vld [vmem:[%s14251_s29 + $0xd4] sm:$0xf0]  ;;  %v2584_v52 = vpop.f32.mrf.mxu0  ;;  %v7434_v39 = vld [vmem:[%s14251_s29 + $0x100] sm:$0xf] }
 0x1b1   :  { %v2558_v48 = vpop.f32.mrf.mxu1  ;;  %v7411_v37 = vor.u32 %v9183_v35, %v7410_v34  ;;  %v9184_v35 = vld [vmem:[%s14251_s29 + $0xe4] sm:$0xf]  ;;  %v9189_v52 = vld [vmem:[%s14251_s29 + $0x104] sm:$0xf0] }
 0x1b2   :  { %v2519_v26 = vpop.f32.mrf.mxu3 }
 0x1b3   :  { %2784 = vmatpush.bf16.msra.mxu3 %v7075_v51 }
 0x1b4   :  { %2796 = vmatpush.bf16.msrb.mxu1 %v7219_v44  ;;  %v7403_v44 = vor.u32 %v9181_v41, %v7402_v40  ;;  %v3331_v3 = vld [vmem:[%s14254_s6 + $0x30] sm:$0x3]  ;;  %v3326_v26 = vld [vmem:[%s14254_s6 + $0x8] sm:$0xff]  ;;  %v3325_v48 = vld [vmem:[%s14254_s6] sm:$0xff] }
 0x1b5   :  { %v2662_v62 = vpop.f32.mrf.mxu2  ;;  %7560 = vmatpush.msk.msrb.mxu2 %vm3340_vm2, %v3331_v3  ;;  %v3327_v24 = vld [vmem:[%s14254_s6 + $0x10] sm:$0xff]  ;;  %v7407_v3 = vor.u32 %v9180_v55, %v7404_v58 }
 0x1b6   :  { %v7450_v62 = vld [vmem:[%s14251_s29 + $0x120] sm:$0xf]  ;;  %v7442_v41 = vld [vmem:[%s14251_s29 + $0x110] sm:$0xf] }
 0x1b7   :  { %2785 = vmatpush.bf16.msra.mxu3 %v7059_v0  ;;  %v7538_v55 = vld [vmem:[%s14251_s29 + $0x1d0] sm:$0xf] }
 0x1b8   :  { %2797 = vmatpush.bf16.msrb.mxu1 %v7203_v49  ;;  %v7482_v49 = vld [vmem:[%s14251_s29 + $0x160] sm:$0xf] }
 0x1bb   :  { %2786 = vmatpush.bf16.msra.mxu3 %v7043_v10  ;;  %v9175_v10 = vld [vmem:[%s14251_s29 + $0x94] sm:$0xf0] }
 0x1bc   :  { %2798 = vmatpush.bf16.msrb.mxu1 %v7187_v6  ;;  %v3330_v6 = vld [vmem:[%s14254_s6 + $0x28] sm:$0xff]  ;;  %v7379_v32 = vor.u32 %v9175_v10, %v7378_v7  ;;  %v12124_v10 = vld [vmem:[%s14253_s28] sm:$0xf] }
 0x1bd   :  { %3354 = vmatpush.msrb.mxu2 %v3330_v6 }
 0x1bf   :  { %2787 = vmatpush.bf16.msra.mxu3 %v7027_v17  ;;  %v7467_v17 = vor.u32 %v9197_v15, %v7466_v56  ;;  %v7388_v56 = vld [vmem:[%s14251_s29 + $0xa8] sm:$0xf0] }
 0x1c0   :  { %2799 = vmatpush.bf16.msrb.mxu1 %v7171_v18  ;;  %v3329_v18 = vld [vmem:[%s14254_s6 + $0x20] sm:$0xff] }
 0x1c1   :  { %3355 = vmatpush.msrb.mxu2 %v3329_v18  ;;  %v9176_v18 = vld [vmem:[%s14251_s29 + $0xa4] sm:$0xf] }
 0x1c3   :  { %2788 = vmatpush.bf16.msra.mxu3 %v7011_v27  ;;  %v11976_v14 = vpop.f32.mrf.mxu2  ;;  %v9186_v27 = vld [vmem:[%s14251_s29 + $0xf4] sm:$0xf] }
 0x1c4   :  { %2800 = vmatpush.bf16.msrb.mxu1 %v7155_v22  ;;  %v9173_v22 = vld [vmem:[%s14251_s29 + $0x84] sm:$0xf0] }
 0x1c5   :  { %v11994_v1 = vpop.f32.mrf.mxu1 }
 0x1c6   :  { %2789 = vmatmul.bf16.vlgmr.msra.gmra.mxu3 %v10649_v60  ;;  %v9203_v60 = vld [vmem:[%s14251_s29 + $0x174] sm:$0xf0] }
 0x1c7   :  { %3231 = vmatpush.bf16.msrb.mxu3 %v7427_v2  ;;  %v7491_v9 = vor.u32 %v9203_v60, %v7490_v61  ;;  %v7459_v2 = vor.u32 %v9195_v25, %v7458_v4  ;;  %v9191_v61 = vld [vmem:[%s14251_s29 + $0x114] sm:$0xf0]  ;;  %v7380_v4 = vld [vmem:[%s14251_s29 + $0x98] sm:$0xf0]  ;;  %v9196_v25 = vld [vmem:[%s14251_s29 + $0x144] sm:$0xf] }
 0x1c8   :  { %2801 = vmatpush.bf16.msrb.mxu1 %v7139_v28  ;;  %v12020_v13 = vpop.f32.mrf.mxu0  ;;  %v7371_v28 = vor.u32 %v9173_v22, %v7370_v20  ;;  %v7443_v50 = vor.u32 %v9191_v61, %v7442_v41  ;;  %v7391_v22 = vor.u32 %v9176_v18, %v7388_v56  ;;  %v7522_v18 = vld [vmem:[%s14251_s29 + $0x1b0] sm:$0xf] }
 0x1c9   :  { %3244 = vmatpush.bf16.msra.mxu0 %v7491_v9  ;;  %v12015_v12 = vpop.f32.mrf.mxu3 }
 0x1cb   :  { %3232 = vmatpush.bf16.msrb.mxu3 %v7419_v63  ;;  %2802 = vmatmul.bf16.vlgmr.msrb.gmra.mxu1 %v10503_v45  ;;  %v2505_v45 = vadd.f32 %v11861_v38, %v2492_v59  ;;  %v9201_v38 = vld [vmem:[%s14251_s29 + $0x164] sm:$0xf0]  ;;  %v3324_v63 = vld [vmem:[%s14211_s2] sm:$0xff]  ;;  %v7420_v59 = vld [vmem:[%s14251_s29 + $0xe8] sm:$0xf0] }
 0x1cc   :  { %v7483_v46 = vor.u32 %v9201_v38, %v7482_v49  ;;  %v7423_v9 = vor.u32 %v9184_v35, %v7420_v59  ;;  %v9202_v49 = vld [vmem:[%s14251_s29 + $0x174] sm:$0xf]  ;;  %v7492_v38 = vld [vmem:[%s14251_s29 + $0x178] sm:$0xf0]  ;;  %v9192_v35 = vld [vmem:[%s14251_s29 + $0x124] sm:$0xf] }
 0x1cd   :  { %v2518_v51 = vadd.f32 %v2517_v8, %v2505_v45  ;;  %v2727_v8 = vpop.f32.mrf.mxu2  ;;  %v2597_v23 = vpop.f32.mrf.mxu1  ;;  %v9182_v45 = vld [vmem:[%s14251_s29 + $0xd4] sm:$0xf]  ;;  %v7452_v59 = vld [vmem:[%s14251_s29 + $0x128] sm:$0xf0] }
 0x1ce   :  { %3245 = vmatpush.bf16.msra.mxu0 %v7483_v46  ;;  %v790_v8 = vperm.slane %v12124_v10, 2 }
 0x1cf   :  { %3233 = vmatpush.bf16.msrb.mxu3 %v7411_v37  ;;  %v2531_v0 = vadd.f32 %v11775_v54, %v2518_v51  ;;  %v9199_v54 = vld [vmem:[%s14251_s29 + $0x154] sm:$0xf0]  ;;  %v9193_v37 = vld [vmem:[%s14251_s29 + $0x124] sm:$0xf0]  ;;  %v7412_v51 = vld [vmem:[%s14251_s29 + $0xd8] sm:$0xf0] }
 0x1d0   :  { %v7475_v53 = vor.u32 %v9199_v54, %v7474_v5  ;;  %v2636_v34 = vpop.f32.mrf.mxu0  ;;  %v7451_v40 = vor.u32 %v9193_v37, %v7450_v62  ;;  %v7415_v46 = vor.u32 %v9182_v45, %v7412_v51  ;;  %v9178_v5 = vld [vmem:[%s14251_s29 + $0xb4] sm:$0xf]  ;;  %v7396_v54 = vld [vmem:[%s14251_s29 + $0xb8] sm:$0xf0]  ;;  %v2570_v23 = vadd.f32 %v12015_v12, %v790_v8  ;;  %v9172_v12 = vld [vmem:[%s14251_s29 + $0x84] sm:$0xf] }
 0x1d1   :  { %v2544_v11 = vadd.f32 %v11791_v33, %v2531_v0  ;;  %v3328_v33 = vld [vmem:[%s14254_s6 + $0x18] sm:$0xff]  ;;  %v2571_v31 = vpop.f32.mrf.mxu3  ;;  %v7495_v0 = vor.u32 %v9202_v49, %v7492_v38  ;;  %v7455_v37 = vor.u32 %v9192_v35, %v7452_v59  ;;  %v7436_v51 = vld [vmem:[%s14251_s29 + $0x108] sm:$0xf0]  ;;  %v7546_v38 = vld [vmem:[%s14251_s29 + $0x1e0] sm:$0xf] }
 0x1d2   :  { %3246 = vmatpush.bf16.msra.mxu0 %v7475_v53  ;;  %3356 = vmatpush.msrb.mxu2 %v3328_v33  ;;  %v9200_v53 = vld [vmem:[%s14251_s29 + $0x164] sm:$0xf]  ;;  %v7476_v33 = vld [vmem:[%s14251_s29 + $0x158] sm:$0xf0]  ;;  %v9214_v59 = vld [vmem:[%s14251_s29 + $0x1d4] sm:$0xf] }
 0x1d3   :  { %3234 = vmatpush.bf16.msrb.mxu3 %v7403_v44  ;;  %v2557_v19 = vadd.f32 %v11919_v16, %v2544_v11  ;;  %v7428_v16 = vld [vmem:[%s14251_s29 + $0xf8] sm:$0xf0]  ;;  %v7399_v11 = vor.u32 %v9178_v5, %v7396_v54 }
 0x1d4   :  { %3357 = vmatpush.msrb.mxu2 %v3327_v24  ;;  %v7431_v30 = vor.u32 %v9186_v27, %v7428_v16  ;;  %v7468_v27 = vld [vmem:[%s14251_s29 + $0x148] sm:$0xf0]  ;;  %v7460_v31 = vld [vmem:[%s14251_s29 + $0x138] sm:$0xf0] }
 0x1d5   :  { %v2821_v29 = vmax.f32 %v2557_v19, 0.0  ;;  %v9174_v19 = vld [vmem:[%s14251_s29 + $0x94] sm:$0xf]  ;;  %v7471_v16 = vor.u32 %v9196_v25, %v7468_v27  ;;  %v9207_v25 = vld [vmem:[%s14251_s29 + $0x194] sm:$0xf0] }
 0x1d6   :  { %3247 = vmatpush.bf16.msra.mxu0 %v7467_v17  ;;  %3358 = vmatpush.msrb.mxu2 %v3326_v26  ;;  %v9198_v17 = vld [vmem:[%s14251_s29 + $0x154] sm:$0xf]  ;;  %v2583_v26 = vadd.f32 %v11955_v36, %v2570_v23 }
 0x1d7   :  { %3235 = vmatpush.bf16.msrb.mxu3 %v7395_v57  ;;  %v12080_v60 = vpack.c.bf16 %v2821_v29, %v2821_v29  ;;  %v7435_v57 = vor.u32 %v9189_v52, %v7434_v39 }
 0x1d8   :  { %3359 = vmatpush.msrb.mxu2 %v3325_v48  ;;  %v12139_v20 = vpop.f32.mrf.mxu0  ;;  %v2596_v36 = vadd.f32 %v11994_v1, %v2583_v26  ;;  %v7444_v1 = vld [vmem:[%s14251_s29 + $0x118] sm:$0xf0]  ;;  %v9205_v26 = vld [vmem:[%s14251_s29 + $0x184] sm:$0xf0] }
 0x1d9   :  { %7561 = vmatmul.msk.f32.vlgmr.msrb.gmra.mxu2 %vm3336_vm3, %v3324_v63 }
 0x1da   :  { %3248 = vmatpush.bf16.msra.mxu0 %v7459_v2  ;;  %v7383_v2 = vor.u32 %v9174_v19, %v7380_v4  ;;  %v2609_v41 = vadd.f32 %v11870_v42, %v2596_v36  ;;  %v7554_v42 = vld [vmem:[%s14251_s29 + $0x1f0] sm:$0xf]  ;;  %v9209_v19 = vld [vmem:[%s14251_s29 + $0x1a4] sm:$0xf0]  ;;  %v7548_v36 = vld [vmem:[%s14251_s29 + $0x1e8] sm:$0xf0] }
 0x1db   :  { %3236 = vmatpush.bf16.msrb.mxu3 %v7387_v47  ;;  %v7484_v47 = vld [vmem:[%s14251_s29 + $0x168] sm:$0xf0] }
 0x1dc   :  { %v7487_v7 = vor.u32 %v9200_v53, %v7484_v47  ;;  %v7530_v47 = vld [vmem:[%s14251_s29 + $0x1c0] sm:$0xf] }
 0x1de   :  { %3249 = vmatpush.bf16.msra.mxu0 %v7451_v40  ;;  %v9190_v40 = vld [vmem:[%s14251_s29 + $0x114] sm:$0xf] }
 0x1df   :  { %3237 = vmatpush.bf16.msrb.mxu3 %v7379_v32  ;;  %v7479_v32 = vor.u32 %v9198_v17, %v7476_v33  ;;  %v7447_v61 = vor.u32 %v9190_v40, %v7444_v1 }
 0x1e0   :  { %v2688_v63 = vpop.f32.mrf.mxu0 }
 0x1e2   :  { %3250 = vmatpush.bf16.msra.mxu0 %v7443_v50  ;;  %v9188_v50 = vld [vmem:[%s14251_s29 + $0x104] sm:$0xf] }
 0x1e3   :  { %3238 = vmatpush.bf16.msrb.mxu3 %v7371_v28  ;;  %v12085_v44 = vpop.f32.mrf.mxu2  ;;  %v7372_v28 = vld [vmem:[%s14251_s29 + $0x88] sm:$0xf0]  ;;  %v7439_v39 = vor.u32 %v9188_v50, %v7436_v51 }
 0x1e4   :  { %v7375_v62 = vor.u32 %v9172_v12, %v7372_v28  ;;  %v7498_v12 = vld [vmem:[%s14251_s29 + $0x180] sm:$0xf]  ;;  %v9218_v28 = vld [vmem:[%s14251_s29 + $0x1f4] sm:$0xf]  ;;  %v7532_v50 = vld [vmem:[%s14251_s29 + $0x1c8] sm:$0xf0] }
 0x1e5   :  { %v2647_v15 = vpop.f32.mrf.mxu1 }
 0x1e6   :  { %3239 = vmatmul.bf16.vlgmr.msrb.gmra.mxu3 %v12080_v60  ;;  %3251 = vmatpush.bf16.msra.mxu0 %v7435_v57 }
 0x1e7   :  { %3283 = vmatpush.bf16.msra.mxu3 %v7431_v30  ;;  %v9194_v30 = vld [vmem:[%s14251_s29 + $0x134] sm:$0xf] }
 0x1e8   :  { %v7463_v48 = vor.u32 %v9194_v30, %v7460_v31  ;;  %v7499_v30 = vor.u32 %v9205_v26, %v7498_v12  ;;  %v9220_v26 = vld [vmem:[%s14213_s15] sm:$0xff] }
 0x1e9   :  { %v2621_v24 = vpop.f32.mrf.mxu3 }
 0x1ea   :  { %3296 = vmatpush.bf16.msrb.mxu0 %v7495_v0  ;;  %v2622_v45 = vadd.f32 %v2621_v24, %v2609_v41  ;;  %v791_v41 = vperm.slane %v12124_v10, 3  ;;  %v7524_v10 = vld [vmem:[%s14251_s29 + $0x1b8] sm:$0xf0] }
 0x1eb   :  { %3284 = vmatpush.bf16.msra.mxu3 %v7423_v9  ;;  %v2779_v6 = vpop.f32.mrf.mxu2 }
 0x1ec   :  { %v2635_v49 = vadd.f32 %v12020_v13, %v2622_v45  ;;  %v9215_v13 = vld [vmem:[%s14251_s29 + $0x1d4] sm:$0xf0]  ;;  %v9212_v45 = vld [vmem:[%s14251_s29 + $0x1c4] sm:$0xf] }
 0x1ed   :  { %v2649_v29 = vpop.f32.mrf.mxu1  ;;  %v7535_v51 = vor.u32 %v9212_v45, %v7532_v50 }
 0x1ee   :  { %3297 = vmatpush.bf16.msrb.mxu0 %v7487_v7  ;;  %v2648_v0 = vadd.f32 %v2647_v15, %v2635_v49  ;;  %v9213_v7 = vld [vmem:[%s14251_s29 + $0x1c4] sm:$0xf0]  ;;  %v7556_v29 = vld [vmem:[%s14251_s29 + $0x1f8] sm:$0xf0] }
 0x1ef   :  { %3285 = vmatpush.bf16.msra.mxu3 %v7415_v46  ;;  %v9217_v46 = vld [vmem:[%s14251_s29 + $0x1e4] sm:$0xf0]  ;;  %v7559_v31 = vor.u32 %v9218_v28, %v7556_v29 }
 0x1f0   :  { %v7547_v58 = vor.u32 %v9217_v46, %v7546_v38  ;;  %v2661_v54 = vadd.f32 %v11927_v21, %v2648_v0  ;;  %v9211_v21 = vld [vmem:[%s14251_s29 + $0x1b4] sm:$0xf0]  ;;  %v7508_v0 = vld [vmem:[%s14251_s29 + $0x198] sm:$0xf0] }
 0x1f1   :  { %v2623_v34 = vpop.f32.mrf.mxu3  ;;  %v7523_v15 = vor.u32 %v9211_v21, %v7522_v18 }
 0x1f2   :  { %3298 = vmatpush.bf16.msrb.mxu0 %v7479_v32 }
 0x1f3   :  { %3286 = vmatpush.bf16.msra.mxu3 %v7407_v3  ;;  %v7539_v3 = vor.u32 %v9215_v13, %v7538_v55  ;;  %v7516_v55 = vld [vmem:[%s14251_s29 + $0x1a8] sm:$0xf0]  ;;  %v9206_v13 = vld [vmem:[%s14251_s29 + $0x194] sm:$0xf] }
 0x1f4   :  { %v12182_v9 = vpop.f32.mrf.mxu0 }
 0x1f6   :  { %3299 = vmatpush.bf16.msrb.mxu0 %v7471_v16 }
 0x1f7   :  { %3287 = vmatpush.bf16.msra.mxu3 %v7399_v11  ;;  %v7531_v11 = vor.u32 %v9213_v7, %v7530_v47 }
 0x1fa   :  { %3300 = vmatpush.bf16.msrb.mxu0 %v7463_v48 }
 0x1fb   :  { %3288 = vmatpush.bf16.msra.mxu3 %v7391_v22  ;;  %v7514_v22 = vld [vmem:[%s14251_s29 + $0x1a0] sm:$0xf] }
 0x1fc   :  { %v2714_v57 = vpop.f32.mrf.mxu0  ;;  %v7515_v4 = vor.u32 %v9209_v19, %v7514_v22  ;;  %v9225_v22 = vld [vmem:[%s14213_s15 + $0x28] sm:$0xff] }
 0x1fd   :  { %v9208_v57 = vld [vmem:[%s14251_s29 + $0x1a4] sm:$0xf] }
 0x1fe   :  { %3301 = vmatpush.bf16.msrb.mxu0 %v7455_v37  ;;  %v7540_v37 = vld [vmem:[%s14251_s29 + $0x1d8] sm:$0xf0] }
 0x1ff   :  { %3289 = vmatpush.bf16.msra.mxu3 %v7383_v2  ;;  %v7543_v1 = vor.u32 %v9214_v59, %v7540_v37  ;;  %v7692_v37 = vld [vmem:[%s14214_s18 + $0xc0] sm:$0xf] }
 0x202   :  { %3302 = vmatpush.bf16.msrb.mxu0 %v7447_v61 }
 0x203   :  { %3290 = vmatpush.bf16.msra.mxu3 %v7375_v62  ;;  %v9216_v62 = vld [vmem:[%s14251_s29 + $0x1e4] sm:$0xf] }
 0x204   :  { %v7551_v34 = vor.u32 %v9216_v62, %v7548_v36  ;;  %v9288_v62 = vld [vmem:[%s14214_s18 + $0xe4] sm:$0xf] }
 0x206   :  { %3291 = vmatmul.bf16.vlgmr.msra.gmra.mxu3 %v12080_v60  ;;  %v9219_v60 = vld [vmem:[%s14251_s29 + $0x1f4] sm:$0xf0]  ;;  %3303 = vmatpush.bf16.msrb.mxu0 %v7439_v39 }
 0x207   :  { %v7555_v52 = vor.u32 %v9219_v60, %v7554_v42  ;;  %v9210_v60 = vld [vmem:[%s14251_s29 + $0x1b4] sm:$0xf] }
 0x208   :  { %v2699_v6 = vpop.f32.mrf.mxu1  ;;  %v7527_v49 = vor.u32 %v9210_v60, %v7524_v10  ;;  %v7678_v10 = vld [vmem:[%s14214_s18 + $0xb0] sm:$0xf0] }
 0x209   :  { %3257 = vmatpush.bf16.msra.mxu1 %v7555_v52  ;;  %v2673_v53 = vpop.f32.mrf.mxu3  ;;  %v2700_v39 = vadd.f32 %v2699_v6, %v791_v41  ;;  %v9204_v6 = vld [vmem:[%s14251_s29 + $0x184] sm:$0xf] }
 0x20a   :  { %v12209_v5 = vpop.f32.mrf.mxu2  ;;  %v2674_v8 = vadd.f32 %v2673_v53, %v2661_v54  ;;  %v7500_v54 = vld [vmem:[%s14251_s29 + $0x188] sm:$0xf0]  ;;  %v9284_v41 = vld [vmem:[%s14214_s18 + $0xc4] sm:$0xf] }
 0x20b   :  { %v2713_v38 = vadd.f32 %v12182_v9, %v2700_v39  ;;  %v7503_v47 = vor.u32 %v9204_v6, %v7500_v54  ;;  %v9282_v39 = vld [vmem:[%s14214_s18 + $0xac] sm:$0xf0] }
 0x20c   :  { %v2687_v56 = vadd.f32 %v12139_v20, %v2674_v8  ;;  %v7506_v20 = vld [vmem:[%s14251_s29 + $0x190] sm:$0xf] }
 0x20d   :  { %3258 = vmatpush.bf16.msra.mxu1 %v7547_v58  ;;  %v7507_v16 = vor.u32 %v9207_v25, %v7506_v20  ;;  %v7519_v58 = vor.u32 %v9208_v57, %v7516_v55  ;;  %v2726_v9 = vadd.f32 %v11976_v14, %v2713_v38  ;;  %v9227_v14 = vld [vmem:[%s14213_s15 + $0x38] sm:$0xff]  ;;  %v9222_v20 = vld [vmem:[%s14213_s15 + $0x10] sm:$0xff]  ;;  %v9221_v25 = vld [vmem:[%s14213_s15 + $0x8] sm:$0xff] }
 0x20e   :  { %v2822_v17 = vmax.f32 %v2687_v56, 0.0  ;;  %3434 = vmatpush.bf16.msrb.mxu3 %v9227_v14  ;;  %v9278_v38 = vld [vmem:[%s14214_s18 + $0x8c] sm:$0xf0]  ;;  %v7662_v55 = vld [vmem:[%s14214_s18 + $0x90] sm:$0xf0] }
 0x20f   :  { %v9322_v54 = vld [vmem:[%s14214_s18 + $0x1ec] sm:$0xf0]  ;;  %v7838_v14 = vld [vmem:[%s14214_s18 + $0x1f0] sm:$0xf0] }
 0x210   :  { %v2701_v32 = vpop.f32.mrf.mxu1  ;;  %v2826_v23 = vpack.c.bf16 %v2822_v17, %v2822_v17  ;;  %v9226_v17 = vld [vmem:[%s14213_s15 + $0x30] sm:$0xff] }
 0x211   :  { %3259 = vmatpush.bf16.msra.mxu1 %v7539_v3  ;;  %v2675_v24 = vpop.f32.mrf.mxu3  ;;  %v7511_v3 = vor.u32 %v9206_v13, %v7508_v0  ;;  %v7644_v0 = vld [vmem:[%s14214_s18 + $0x60] sm:$0xf] }
 0x212   :  { %v3229_v33 = vpop.f32.mrf.mxu2  ;;  %3252 = vmatmul.bf16.vlgmr.msra.gmra.mxu0 %v2826_v23  ;;  %3435 = vmatpush.bf16.msrb.mxu3 %v9226_v17  ;;  %v9318_v17 = vld [vmem:[%s14214_s18 + $0x1cc] sm:$0xf0] }
 0x214   :  { %v2764_v27 = vpop.f32.mrf.mxu0 }
 0x215   :  { %3260 = vmatpush.bf16.msra.mxu1 %v7531_v11 }
 0x216   :  { %3436 = vmatpush.bf16.msrb.mxu3 %v9225_v22  ;;  %v9268_v22 = vld [vmem:[%s14214_s18 + $0x44] sm:$0xf] }
 0x219   :  { %3261 = vmatpush.bf16.msra.mxu1 %v7523_v15 }
 0x21c   :  { %v2766_v48 = vpop.f32.mrf.mxu0 }
 0x21d   :  { %3262 = vmatpush.bf16.msra.mxu1 %v7515_v4  ;;  %v9223_v4 = vld [vmem:[%s14213_s15 + $0x18] sm:$0xff]  ;;  %v7708_v48 = vld [vmem:[%s14214_s18 + $0xe0] sm:$0xf] }
 0x221   :  { %3263 = vmatpush.bf16.msra.mxu1 %v7507_v16 }
 0x222   :  { %3304 = vmatmul.bf16.vlgmr.msrb.gmra.mxu0 %v2826_v23 }
 0x223   :  { %v12237_v2 = vpop.f32.mrf.mxu2 }
 0x225   :  { %3264 = vmatpush.bf16.msra.mxu1 %v7499_v30 }
 0x229   :  { %3309 = vmatpush.bf16.msrb.mxu1 %v7559_v31  ;;  %v2738_v61 = vpop.f32.mrf.mxu3 }
 0x22a   :  { %v2751_v35 = vpop.f32.mrf.mxu1  ;;  %v2739_v53 = vadd.f32 %v2738_v61, %v2726_v9  ;;  %v7694_v61 = vld [vmem:[%s14214_s18 + $0xd0] sm:$0xf0]  ;;  %v9274_v9 = vld [vmem:[%s14214_s18 + $0x6c] sm:$0xf0] }
 0x22b   :  { %v3281_v63 = vpop.f32.mrf.mxu2  ;;  %v2816_v40 = vpop.f32.mrf.mxu0  ;;  %v7697_v45 = vor.u32 %v9284_v41, %v7694_v61  ;;  %v7645_v6 = vor.u32 %v9274_v9, %v7644_v0  ;;  %v9308_v41 = vld [vmem:[%s14214_s18 + $0x184] sm:$0xf]  ;;  %v7790_v61 = vld [vmem:[%s14214_s18 + $0x190] sm:$0xf0]  ;;  %v7700_v0 = vld [vmem:[%s14214_s18 + $0xc8] sm:$0xf] }
 0x22c   :  { %v2752_v7 = vadd.f32 %v2751_v35, %v2739_v53  ;;  %v9290_v63 = vld [vmem:[%s14214_s18 + $0xec] sm:$0xf0]  ;;  %v3448_v35 = vld [vmem:[%s14215_s3] sm:$0xff]  ;;  %v9287_v9 = vld [vmem:[%s14214_s18 + $0xd4] sm:$0xf0] }
 0x22d   :  { %3310 = vmatpush.bf16.msrb.mxu1 %v7551_v34  ;;  %v7709_v36 = vor.u32 %v9290_v63, %v7708_v48  ;;  %v7710_v34 = vld [vmem:[%s14214_s18 + $0xf0] sm:$0xf0]  ;;  %3450 = vrot.lane.b32.xlu0 %v3448_v35, %s9539_s9  ;;  %v9272_v53 = vld [vmem:[%s14214_s18 + $0x64] sm:$0xf] }
 0x22e   :  { %v2765_v8 = vadd.f32 %v2764_v27, %v2752_v7  ;;  %v9535_v27 = vld [vmem:[%s14212_s14] ss:$0 sm:$0xff]  ;;  %v7713_v59 = vor.u32 %v9288_v62, %v7710_v34 }
 0x22f   :  { %3876 = vmatpush.bf16.msra.mxu0 %v7709_v36  ;;  %v7596_v62 = vld [vmem:[%s14214_s18] sm:$0xf]  ;;  %v9262_v36 = vld [vmem:[%s14214_s18 + $0xc] sm:$0xf0] }
 0x230   :  { %v2778_v18 = vadd.f32 %v12085_v44, %v2765_v8  ;;  %v9224_v44 = vld [vmem:[%s14213_s15 + $0x20] sm:$0xff] }
 0x231   :  { %3311 = vmatpush.bf16.msrb.mxu1 %v7543_v1  ;;  %v2740_v46 = vpop.f32.mrf.mxu3  ;;  %3437 = vmatpush.bf16.msrb.mxu3 %v9224_v44  ;;  %v7822_v44 = vld [vmem:[%s14214_s18 + $0x1d0] sm:$0xf0]  ;;  %v7788_v34 = vld [vmem:[%s14214_s18 + $0x180] sm:$0xf] }
 0x232   :  { %v2753_v42 = vpop.f32.mrf.mxu1  ;;  %v9276_v46 = vld [vmem:[%s14214_s18 + $0x84] sm:$0xf] }
 0x233   :  { %v2818_v52 = vpop.f32.mrf.mxu0  ;;  %v9280_v42 = vld [vmem:[%s14214_s18 + $0xa4] sm:$0xf] }
 0x234   :  { %v7681_v52 = vor.u32 %v9280_v42, %v7678_v10  ;;  %v9289_v42 = vld [vmem:[%s14214_s18 + $0xec] sm:$0xf] }
 0x235   :  { %3312 = vmatpush.bf16.msrb.mxu1 %v7535_v51  ;;  %3438 = vmatpush.bf16.msrb.mxu3 %v9223_v4  ;;  %v7676_v51 = vld [vmem:[%s14214_s18 + $0xa0] sm:$0xf] }
 0x236   :  { %v7677_v60 = vor.u32 %v9282_v39, %v7676_v51  ;;  %v7612_v4 = vld [vmem:[%s14214_s18 + $0x20] sm:$0xf]  ;;  %v7597_v51 = vor.u32 %v9262_v36, %v7596_v62  ;;  %v9291_v39 = vld [vmem:[%s14214_s18 + $0xf4] sm:$0xf0]  ;;  %v7726_v62 = vld [vmem:[%s14214_s18 + $0x110] sm:$0xf0] }
 0x237   :  { %v7652_v36 = vld [vmem:[%s14214_s18 + $0x68] sm:$0xf] }
 0x239   :  { %3313 = vmatpush.bf16.msrb.mxu1 %v7527_v49  ;;  %3439 = vmatpush.bf16.msrb.mxu3 %v9222_v20  ;;  %v7660_v49 = vld [vmem:[%s14214_s18 + $0x80] sm:$0xf]  ;;  %v9266_v20 = vld [vmem:[%s14214_s18 + $0x2c] sm:$0xf0] }
 0x23a   :  { %v7661_v57 = vor.u32 %v9278_v38, %v7660_v49  ;;  %v7793_v49 = vor.u32 %v9308_v41, %v7790_v61  ;;  %v9273_v41 = vld [vmem:[%s14214_s18 + $0x6c] sm:$0xf]  ;;  %v7654_v61 = vld [vmem:[%s14214_s18 + $0x78] sm:$0xf0] }
 0x23d   :  { %3314 = vmatpush.bf16.msrb.mxu1 %v7519_v58  ;;  %3440 = vmatpush.bf16.msrb.mxu3 %v9221_v25  ;;  %v7665_v58 = vor.u32 %v9276_v46, %v7662_v55  ;;  %v7772_v46 = vld [vmem:[%s14214_s18 + $0x160] sm:$0xf]  ;;  %v9304_v55 = vld [vmem:[%s14214_s18 + $0x164] sm:$0xf] }
 0x241   :  { %3315 = vmatpush.bf16.msrb.mxu1 %v7511_v3  ;;  %3441 = vmatpush.bf16.msrb.mxu3 %v9220_v26  ;;  %v7836_v3 = vld [vmem:[%s14214_s18 + $0x1e0] sm:$0xf]  ;;  %v7613_v26 = vor.u32 %v9266_v20, %v7612_v4  ;;  %v7742_v20 = vld [vmem:[%s14214_s18 + $0x130] sm:$0xf0] }
 0x242   :  { %v7837_v7 = vor.u32 %v9322_v54, %v7836_v3  ;;  %v9285_v3 = vld [vmem:[%s14214_s18 + $0xcc] sm:$0xf] }
 0x244   :  { %3889 = vmatpush.bf16.msra.mxu2 %v7837_v7  ;;  %v7756_v7 = vld [vmem:[%s14214_s18 + $0x140] sm:$0xf] }
 0x245   :  { %3316 = vmatpush.bf16.msrb.mxu1 %v7503_v47  ;;  %v7646_v47 = vld [vmem:[%s14214_s18 + $0x70] sm:$0xf0] }
 0x246   :  { %v7649_v8 = vor.u32 %v9272_v53, %v7646_v47  ;;  %v7701_v47 = vor.u32 %v9287_v9, %v7700_v0  ;;  %v9317_v0 = vld [vmem:[%s14214_s18 + $0x1cc] sm:$0xf]  ;;  %v7830_v9 = vld [vmem:[%s14214_s18 + $0x1d8] sm:$0xf0] }
 0x248   :  { %v2803_v11 = vpop.f32.mrf.mxu1 }
 0x249   :  { %v2790_v21 = vpop.f32.mrf.mxu3 }
 0x24a   :  { %v2791_v56 = vadd.f32 %v2790_v21, %v2778_v18  ;;  %v7628_v18 = vld [vmem:[%s14214_s18 + $0x40] sm:$0xf] }
 0x24c   :  { %v2804_v15 = vadd.f32 %v2803_v11, %v2791_v56  ;;  %v9320_v11 = vld [vmem:[%s14214_s18 + $0x1e4] sm:$0xf]  ;;  %v9270_v56 = vld [vmem:[%s14214_s18 + $0x4c] sm:$0xf0] }
 0x24d   :  { %v7841_v21 = vor.u32 %v9320_v11, %v7838_v14  ;;  %v9300_v11 = vld [vmem:[%s14214_s18 + $0x144] sm:$0xf] }
 0x24e   :  { %v2817_v32 = vadd.f32 %v2816_v40, %v2804_v15  ;;  %v9286_v40 = vld [vmem:[%s14214_s18 + $0xcc] sm:$0xf0]  ;;  %v7820_v15 = vld [vmem:[%s14214_s18 + $0x1c0] sm:$0xf] }
 0x24f   :  { %v7693_v1 = vor.u32 %v9286_v40, %v7692_v37  ;;  %3915 = vmatpush.bf16.msra.mxu3 %v7841_v21  ;;  %v9260_v37 = vld [vmem:[%s14214_s18 + $0x4] sm:$0xf]  ;;  %v7598_v40 = vld [vmem:[%s14214_s18 + $0x10] sm:$0xf0] }
 0x250   :  { %v2805_v33 = vpop.f32.mrf.mxu1  ;;  %v2823_v19 = vmax.f32 %v2817_v32, 0.0  ;;  %v7821_v32 = vor.u32 %v9318_v17, %v7820_v15  ;;  %v7758_v21 = vld [vmem:[%s14214_s18 + $0x150] sm:$0xf0]  ;;  %v9283_v15 = vld [vmem:[%s14214_s18 + $0xb4] sm:$0xf0] }
 0x251   :  { %v2792_v23 = vpop.f32.mrf.mxu3  ;;  %3877 = vmatpush.bf16.msra.mxu0 %v7693_v1  ;;  %v7629_v33 = vor.u32 %v9270_v56, %v7628_v18  ;;  %v7684_v56 = vld [vmem:[%s14214_s18 + $0xa8] sm:$0xf]  ;;  %v9281_v17 = vld [vmem:[%s14214_s18 + $0xac] sm:$0xf] }
 0x252   :  { %v2827_v24 = vpack.c.bf16 %v2823_v19, %v2823_v19  ;;  %v7630_v19 = vld [vmem:[%s14214_s18 + $0x50] sm:$0xf0]  ;;  %v9316_v23 = vld [vmem:[%s14214_s18 + $0x1c4] sm:$0xf]  ;;  %3890 = vmatpush.bf16.msra.mxu2 %v7821_v32 }
 0x253   :  { %v7825_v25 = vor.u32 %v9316_v23, %v7822_v44  ;;  %v7740_v23 = vld [vmem:[%s14214_s18 + $0x120] sm:$0xf]  ;;  %v9296_v44 = vld [vmem:[%s14214_s18 + $0x124] sm:$0xf] }
 0x254   :  { %3265 = vmatmul.bf16.vlgmr.msra.gmra.mxu1 %v2827_v24 }
 0x255   :  { %3902 = vmatpush.bf16.msra.mxu1 %v7713_v59  ;;  %3878 = vmatpush.bf16.msra.mxu0 %v7677_v60  ;;  %v9310_v59 = vld [vmem:[%s14214_s18 + $0x18c] sm:$0xf0]  ;;  %v7718_v60 = vld [vmem:[%s14214_s18 + $0xf8] sm:$0xf0] }
 0x256   :  { %3916 = vmatpush.bf16.msra.mxu3 %v7825_v25  ;;  %v7789_v10 = vor.u32 %v9310_v59, %v7788_v34  ;;  %v7668_v25 = vld [vmem:[%s14214_s18 + $0x88] sm:$0xf]  ;;  %v9275_v59 = vld [vmem:[%s14214_s18 + $0x74] sm:$0xf0] }
 0x259   :  { %3903 = vmatpush.bf16.msra.mxu1 %v7697_v45  ;;  %3879 = vmatpush.bf16.msra.mxu0 %v7661_v57  ;;  %v7716_v45 = vld [vmem:[%s14214_s18 + $0xe8] sm:$0xf]  ;;  %v9306_v57 = vld [vmem:[%s14214_s18 + $0x16c] sm:$0xf0] }
 0x25a   :  { %v7717_v38 = vor.u32 %v9291_v39, %v7716_v45  ;;  %v7773_v54 = vor.u32 %v9306_v57, %v7772_v46  ;;  %v7846_v39 = vld [vmem:[%s14214_s18 + $0x1f8] sm:$0xf0]  ;;  %v7828_v46 = vld [vmem:[%s14214_s18 + $0x1c8] sm:$0xf] }
 0x25c   :  { %v3361_v16 = vpop.f32.mrf.mxu2 }
 0x25d   :  { %v3362_v12 = vadd.f32 %v9535_v27, %v3361_v16  ;;  %3904 = vmatpush.bf16.msra.mxu1 %v7681_v52  ;;  %3880 = vmatpush.bf16.msra.mxu0 %v7645_v6  ;;  %v7804_v27 = vld [vmem:[%s14214_s18 + $0x1a0] sm:$0xf]  ;;  %v9314_v16 = vld [vmem:[%s14214_s18 + $0x1ac] sm:$0xf0]  ;;  %v7601_v52 = vor.u32 %v9260_v37, %v7598_v40  ;;  %v7702_v6 = vld [vmem:[%s14214_s18 + $0xd8] sm:$0xf0] }
 0x25e   :  { %v7805_v48 = vor.u32 %v9314_v16, %v7804_v27  ;;  %v7705_v18 = vor.u32 %v9285_v3, %v7702_v6  ;;  %v9279_v27 = vld [vmem:[%s14214_s18 + $0x94] sm:$0xf0]  ;;  %v9277_v16 = vld [vmem:[%s14214_s18 + $0x8c] sm:$0xf]  ;;  %v7844_v37 = vld [vmem:[%s14214_s18 + $0x1e8] sm:$0xf] }
 0x25f   :  { %v3364_v28 = vmax.f32 %v3362_v12, 0.0  ;;  %v9264_v12 = vld [vmem:[%s14214_s18 + $0x24] sm:$0xf]  ;;  %v9323_v40 = vld [vmem:[%s14214_s18 + $0x1f4] sm:$0xf0] }
 0x260   :  { %3891 = vmatpush.bf16.msra.mxu2 %v7805_v48  ;;  %v7669_v48 = vor.u32 %v9279_v27, %v7668_v25  ;;  %v7606_v25 = vld [vmem:[%s14214_s18 + $0x18] sm:$0xf0] }
 0x261   :  { %v3365_v30 = vpack.c.bf16 %v3364_v28, %v3364_v28  ;;  %3905 = vmatpush.bf16.msra.mxu1 %v7665_v58  ;;  %3881 = vmatpush.bf16.msra.mxu0 %v7629_v33  ;;  %v7614_v28 = vld [vmem:[%s14214_s18 + $0x30] sm:$0xf0]  ;;  %v7721_v58 = vor.u32 %v9289_v42, %v7718_v60  ;;  %v7686_v33 = vld [vmem:[%s14214_s18 + $0xb8] sm:$0xf0]  ;;  %v7653_v60 = vor.u32 %v9275_v59, %v7652_v36  ;;  %v9303_v59 = vld [vmem:[%s14214_s18 + $0x154] sm:$0xf0] }
 0x262   :  { %v7617_v63 = vor.u32 %v9264_v12, %v7614_v28  ;;  %v7689_v4 = vor.u32 %v9281_v17, %v7686_v33  ;;  %v7670_v12 = vld [vmem:[%s14214_s18 + $0x98] sm:$0xf0]  ;;  %v7724_v28 = vld [vmem:[%s14214_s18 + $0x100] sm:$0xf]  ;;  %v9313_v33 = vld [vmem:[%s14214_s18 + $0x1ac] sm:$0xf] }
 0x263   :  { %3442 = vmatmul.bf16.vlgmr.msrb.gmra.mxu3 %v3365_v30  ;;  %v9312_v30 = vld [vmem:[%s14214_s18 + $0x1a4] sm:$0xf] }
 0x264   :  { %3317 = vmatmul.bf16.vlgmr.msrb.gmra.mxu1 %v2827_v24  ;;  %v7633_v24 = vor.u32 %v9268_v22, %v7630_v19  ;;  %3892 = vmatpush.bf16.msra.mxu2 %v7789_v10  ;;  %v7761_v22 = vor.u32 %v9300_v11, %v7758_v21  ;;  %v7685_v19 = vor.u32 %v9283_v15, %v7684_v56  ;;  %v7812_v11 = vld [vmem:[%s14214_s18 + $0x1a8] sm:$0xf]  ;;  %v9265_v21 = vld [vmem:[%s14214_s18 + $0x2c] sm:$0xf]  ;;  %v7622_v56 = vld [vmem:[%s14214_s18 + $0x38] sm:$0xf0] }
 0x265   :  { %3906 = vmatpush.bf16.msra.mxu1 %v7649_v8  ;;  %3882 = vmatpush.bf16.msra.mxu0 %v7613_v26  ;;  %v9302_v8 = vld [vmem:[%s14214_s18 + $0x14c] sm:$0xf0]  ;;  %v7845_v10 = vor.u32 %v9323_v40, %v7844_v37  ;;  %v7625_v17 = vor.u32 %v9265_v21, %v7622_v56  ;;  %v9301_v37 = vld [vmem:[%s14214_s18 + $0x14c] sm:$0xf]  ;;  %v7956_v21 = vld [vmem:[%s14218_s17 + $0xc8] sm:$0xf] }
 0x266   :  { %v7757_v32 = vor.u32 %v9302_v8, %v7756_v7  ;;  %v7620_v7 = vld [vmem:[%s14214_s18 + $0x28] sm:$0xf]  ;;  %v9267_v8 = vld [vmem:[%s14214_s18 + $0x34] sm:$0xf0] }
 0x267   :  { %v9255_v56 = vld [vmem:[%s14218_s17 + $0xd4] sm:$0xf0] }
 0x268   :  { %3893 = vmatpush.bf16.msra.mxu2 %v7773_v54 }
 0x269   :  { %v12324_v29 = vpop.f32.mrf.mxu3  ;;  %3907 = vmatpush.bf16.msra.mxu1 %v7633_v24  ;;  %3883 = vmatpush.bf16.msra.mxu0 %v7597_v51  ;;  %v9298_v24 = vld [vmem:[%s14214_s18 + $0x12c] sm:$0xf0]  ;;  %v9321_v51 = vld [vmem:[%s14214_s18 + $0x1ec] sm:$0xf] }
 0x26a   :  { %v7741_v26 = vor.u32 %v9298_v24, %v7740_v23  ;;  %v7849_v57 = vor.u32 %v9321_v51, %v7846_v39  ;;  %v9263_v23 = vld [vmem:[%s14214_s18 + $0x14] sm:$0xf0]  ;;  %v7796_v24 = vld [vmem:[%s14214_s18 + $0x188] sm:$0xf]  ;;  %v9297_v39 = vld [vmem:[%s14214_s18 + $0x12c] sm:$0xf] }
 0x26b   :  { %v9299_v51 = vld [vmem:[%s14214_s18 + $0x134] sm:$0xf0] }
 0x26c   :  { %3894 = vmatpush.bf16.msra.mxu2 %v7757_v32  ;;  %v7814_v32 = vld [vmem:[%s14214_s18 + $0x1b8] sm:$0xf0] }
 0x26d   :  { %3908 = vmatpush.bf16.msra.mxu1 %v7617_v63  ;;  %3928 = vmatpush.bf16.msrb.mxu0 %v7717_v38  ;;  %v9292_v63 = vld [vmem:[%s14214_s18 + $0x104] sm:$0xf]  ;;  %v9271_v38 = vld [vmem:[%s14214_s18 + $0x54] sm:$0xf0] }
 0x26e   :  { %v7729_v42 = vor.u32 %v9292_v63, %v7726_v62  ;;  %v7782_v62 = vld [vmem:[%s14214_s18 + $0x178] sm:$0xf0] }
 0x270   :  { %3895 = vmatpush.bf16.msra.mxu2 %v7741_v26  ;;  %v7798_v26 = vld [vmem:[%s14214_s18 + $0x198] sm:$0xf0] }
 0x271   :  { %v3242_v31 = vpop.f32.mrf.mxu3  ;;  %3909 = vmatpush.bf16.msra.mxu1 %v7601_v52  ;;  %3929 = vmatpush.bf16.msrb.mxu0 %v7701_v47  ;;  %v7657_v52 = vor.u32 %v9273_v41, %v7654_v61  ;;  %v7833_v47 = vor.u32 %v9317_v0, %v7830_v9  ;;  %v7766_v41 = vld [vmem:[%s14214_s18 + $0x158] sm:$0xf0] }
 0x272   :  { %v7806_v31 = vld [vmem:[%s14214_s18 + $0x1b0] sm:$0xf0]  ;;  %v7769_v61 = vor.u32 %v9301_v37, %v7766_v41  ;;  %v9257_v37 = vld [vmem:[%s14218_s17 + $0xec] sm:$0xf] }
 0x273   :  { %v7809_v35 = vor.u32 %v9312_v30, %v7806_v31  ;;  %v9294_v30 = vld [vmem:[%s14214_s18 + $0x10c] sm:$0xf0]  ;;  %v7745_v31 = vor.u32 %v9296_v44, %v7742_v20  ;;  %v9261_v20 = vld [vmem:[%s14214_s18 + $0xc] sm:$0xf] }
 0x274   :  { %v7725_v45 = vor.u32 %v9294_v30, %v7724_v28  ;;  %v7780_v30 = vld [vmem:[%s14214_s18 + $0x168] sm:$0xf] }
 0x275   :  { %3917 = vmatpush.bf16.msra.mxu3 %v7809_v35  ;;  %3954 = vmatpush.bf16.msrb.mxu1 %v7721_v58  ;;  %v7673_v35 = vor.u32 %v9277_v16, %v7670_v12  ;;  %v9269_v58 = vld [vmem:[%s14214_s18 + $0x4c] sm:$0xf]  ;;  %v7609_v16 = vor.u32 %v9261_v20, %v7606_v25  ;;  %v7916_v25 = vld [vmem:[%s14218_s17 + $0x80] sm:$0xf] }
 0x276   :  { %3930 = vmatpush.bf16.msrb.mxu0 %v7685_v19  ;;  %3896 = vmatpush.bf16.msra.mxu2 %v7725_v45  ;;  %v7604_v19 = vld [vmem:[%s14214_s18 + $0x8] sm:$0xf]  ;;  %v9309_v12 = vld [vmem:[%s14214_s18 + $0x18c] sm:$0xf] }
 0x277   :  { %v7605_v44 = vor.u32 %v9263_v23, %v7604_v19  ;;  %v7801_v28 = vor.u32 %v9309_v12, %v7798_v26  ;;  %v7748_v45 = vld [vmem:[%s14214_s18 + $0x128] sm:$0xf]  ;;  %v9250_v19 = vld [vmem:[%s14218_s17 + $0xac] sm:$0xf0] }
 0x278   :  { %v7940_v23 = vld [vmem:[%s14218_s17 + $0xa8] sm:$0xf] }
 0x279   :  { %3918 = vmatpush.bf16.msra.mxu3 %v7793_v49  ;;  %3955 = vmatpush.bf16.msrb.mxu1 %v7705_v18  ;;  %v7636_v49 = vld [vmem:[%s14214_s18 + $0x48] sm:$0xf]  ;;  %v9315_v18 = vld [vmem:[%s14214_s18 + $0x1b4] sm:$0xf0] }
 0x27a   :  { %3931 = vmatpush.bf16.msrb.mxu0 %v7669_v48  ;;  %v7637_v3 = vor.u32 %v9271_v38, %v7636_v49  ;;  %3941 = vmatpush.bf16.msrb.mxu2 %v7845_v10  ;;  %v7813_v15 = vor.u32 %v9315_v18, %v7812_v11  ;;  %v9305_v48 = vld [vmem:[%s14214_s18 + $0x16c] sm:$0xf]  ;;  %v7732_v49 = vld [vmem:[%s14214_s18 + $0x108] sm:$0xf]  ;;  %v9295_v38 = vld [vmem:[%s14214_s18 + $0x114] sm:$0xf0] }
 0x27b   :  { %v7785_v36 = vor.u32 %v9305_v48, %v7782_v62  ;;  %v7948_v11 = vld [vmem:[%s14218_s17 + $0xc0] sm:$0xf]  ;;  %v9254_v18 = vld [vmem:[%s14218_s17 + $0xcc] sm:$0xf0]  ;;  %v7924_v12 = vld [vmem:[%s14218_s17 + $0x88] sm:$0xf] }
 0x27c   :  { %v7900_v48 = vld [vmem:[%s14218_s17 + $0x60] sm:$0xf]  ;;  %v9256_v62 = vld [vmem:[%s14218_s17 + $0xe4] sm:$0xf] }
 0x27d   :  { %3956 = vmatpush.bf16.msrb.mxu1 %v7689_v4  ;;  %v9311_v4 = vld [vmem:[%s14214_s18 + $0x194] sm:$0xf0] }
 0x27e   :  { %3932 = vmatpush.bf16.msrb.mxu0 %v7653_v60  ;;  %v7797_v27 = vor.u32 %v9311_v4, %v7796_v24  ;;  %v7750_v60 = vld [vmem:[%s14214_s18 + $0x138] sm:$0xf0]  ;;  %v9251_v24 = vld [vmem:[%s14218_s17 + $0xb4] sm:$0xf0] }
 0x27f   :  { %v7753_v10 = vor.u32 %v9297_v39, %v7750_v60  ;;  %v7941_v20 = vor.u32 %v9251_v24, %v7940_v23  ;;  %v9238_v39 = vld [vmem:[%s14218_s17 + $0x4c] sm:$0xf0]  ;;  %v8092_v23 = vld [vmem:[%s14219_s19 + $0xe0] sm:$0xf] }
 0x280   :  { %v9354_v24 = vld [vmem:[%s14219_s19 + $0xec] sm:$0xf0] }
 0x281   :  { %3957 = vmatpush.bf16.msrb.mxu1 %v7673_v35  ;;  %v7764_v35 = vld [vmem:[%s14214_s18 + $0x148] sm:$0xf] }
 0x282   :  { %3933 = vmatpush.bf16.msrb.mxu0 %v7637_v3  ;;  %v7765_v40 = vor.u32 %v9303_v59, %v7764_v35  ;;  %v9243_v35 = vld [vmem:[%s14218_s17 + $0x74] sm:$0xf0] }
 0x285   :  { %3958 = vmatpush.bf16.msrb.mxu1 %v7657_v52  ;;  %v2892_v52 = vld [vmem:[%s14217_s12] sm:$0x3] }
 0x289   :  { %v12353_v50 = vpop.f32.mrf.mxu3 }
 0x28f   :  { %v12469_v1 = vpop.f32.mrf.mxu0 }
 0x291   :  { %v3294_v13 = vpop.f32.mrf.mxu3 }
 0x292   :  { %v7774_v13 = vld [vmem:[%s14214_s18 + $0x170] sm:$0xf0] }
 0x293   :  { %v7777_v53 = vor.u32 %v9304_v55, %v7774_v13  ;;  %v9319_v55 = vld [vmem:[%s14214_s18 + $0x1d4] sm:$0xf0]  ;;  %v7638_v13 = vld [vmem:[%s14214_s18 + $0x58] sm:$0xf0] }
 0x294   :  { %v7829_v54 = vor.u32 %v9319_v55, %v7828_v46  ;;  %v9293_v46 = vld [vmem:[%s14214_s18 + $0x10c] sm:$0xf]  ;;  %v7734_v55 = vld [vmem:[%s14214_s18 + $0x118] sm:$0xf0] }
 0x295   :  { %3919 = vmatpush.bf16.msra.mxu3 %v7777_v53  ;;  %v7641_v53 = vor.u32 %v9269_v58, %v7638_v13  ;;  %v7737_v58 = vor.u32 %v9293_v46, %v7734_v55  ;;  %v2894_v13 = vperm.slane %v2892_v52, 0  ;;  %v9253_v46 = vld [vmem:[%s14218_s17 + $0xcc] sm:$0xf] }
 0x296   :  { %3942 = vmatpush.bf16.msrb.mxu2 %v7829_v54  ;;  %v7964_v54 = vld [vmem:[%s14218_s17 + $0xe0] sm:$0xf] }
 0x297   :  { %v3255_v14 = vpop.f32.mrf.mxu0  ;;  %3959 = vmatpush.bf16.msrb.mxu1 %v7641_v53  ;;  %v3228_v0 = vadd.f32 %v12209_v5, %v2894_v13  ;;  %v9259_v5 = vld [vmem:[%s14218_s17 + $0xf4] sm:$0xf0] }
 0x298   :  { %v7621_v14 = vor.u32 %v9267_v8, %v7620_v7  ;;  %v7972_v7 = vld [vmem:[%s14218_s17 + $0xe8] sm:$0xf] }
 0x299   :  { %3920 = vmatpush.bf16.msra.mxu3 %v7761_v22  ;;  %v7817_v22 = vor.u32 %v9313_v33, %v7814_v32  ;;  %v3241_v9 = vadd.f32 %v12324_v29, %v3228_v0  ;;  %v7973_v8 = vor.u32 %v9259_v5, %v7972_v7  ;;  %v7949_v33 = vor.u32 %v9254_v18, %v7948_v11  ;;  %v7868_v0 = vld [vmem:[%s14218_s17 + $0x20] sm:$0xf]  ;;  %v9235_v7 = vld [vmem:[%s14218_s17 + $0x34] sm:$0xf0]  ;;  %v9249_v5 = vld [vmem:[%s14218_s17 + $0xac] sm:$0xf] }
 0x29a   :  { %3934 = vmatpush.bf16.msrb.mxu0 %v7621_v14  ;;  %3943 = vmatpush.bf16.msrb.mxu2 %v7813_v15  ;;  %v2895_v15 = vperm.slane %v2892_v52, 1  ;;  %v7957_v32 = vor.u32 %v9255_v56, %v7956_v21  ;;  %v7950_v52 = vld [vmem:[%s14218_s17 + $0xd0] sm:$0xf0]  ;;  %v9230_v18 = vld [vmem:[%s14218_s17 + $0xc] sm:$0xf0] }
 0x29b   :  { %3960 = vmatpush.bf16.msrb.mxu1 %v7625_v17  ;;  %v3254_v3 = vadd.f32 %v12469_v1, %v3241_v9  ;;  %v9234_v9 = vld [vmem:[%s14218_s17 + $0x2c] sm:$0xf0]  ;;  %v9244_v21 = vld [vmem:[%s14218_s17 + $0x84] sm:$0xf] }
 0x29d   :  { %3921 = vmatpush.bf16.msra.mxu3 %v7745_v31  ;;  %v9307_v31 = vld [vmem:[%s14214_s18 + $0x174] sm:$0xf0] }
 0x29e   :  { %3935 = vmatpush.bf16.msrb.mxu0 %v7605_v44  ;;  %3944 = vmatpush.bf16.msrb.mxu2 %v7797_v27  ;;  %v7781_v63 = vor.u32 %v9307_v31, %v7780_v30  ;;  %v3280_v44 = vadd.f32 %v12237_v2, %v2895_v15  ;;  %v9247_v2 = vld [vmem:[%s14218_s17 + $0x94] sm:$0xf0] }
 0x29f   :  { %v12576_v34 = vpop.f32.mrf.mxu0  ;;  %3961 = vmatpush.bf16.msrb.mxu1 %v7609_v16  ;;  %v9246_v16 = vld [vmem:[%s14218_s17 + $0x8c] sm:$0xf0]  ;;  %v7925_v31 = vor.u32 %v9247_v2, %v7924_v12  ;;  %v9240_v2 = vld [vmem:[%s14218_s17 + $0x64] sm:$0xf] }
 0x2a0   :  { %v3293_v27 = vadd.f32 %v12353_v50, %v3280_v44  ;;  %v7917_v30 = vor.u32 %v9246_v16, %v7916_v25  ;;  %v9352_v44 = vld [vmem:[%s14219_s19 + $0xe4] sm:$0xf] }
 0x2a1   :  { %3922 = vmatpush.bf16.msra.mxu3 %v7729_v42  ;;  %v7749_v42 = vor.u32 %v9299_v51, %v7748_v45  ;;  %v7884_v51 = vld [vmem:[%s14218_s17 + $0x40] sm:$0xf] }
 0x2a2   :  { %3945 = vmatpush.bf16.msrb.mxu2 %v7781_v63  ;;  %v3306_v26 = vadd.f32 %v12576_v34, %v3293_v27  ;;  %v9242_v63 = vld [vmem:[%s14218_s17 + $0x6c] sm:$0xf0]  ;;  %v7966_v34 = vld [vmem:[%s14218_s17 + $0xf0] sm:$0xf0]  ;;  %v465_v27 = vmax.f32 %v11375_v43, 0.0 }
 0x2a3   :  { %v7969_v45 = vor.u32 %v9256_v62, %v7966_v34  ;;  %v7910_v43 = vld [vmem:[%s14218_s17 + $0x78] sm:$0xf0]  ;;  %v8078_v62 = vld [vmem:[%s14219_s19 + $0xd0] sm:$0xf0] }
 0x2a5   :  { %3967 = vmatpush.bf16.msrb.mxu3 %v7849_v57  ;;  %v7733_v57 = vor.u32 %v9295_v38, %v7732_v49  ;;  %v7892_v49 = vld [vmem:[%s14218_s17 + $0x48] sm:$0xf]  ;;  %v9239_v38 = vld [vmem:[%s14218_s17 + $0x54] sm:$0xf0] }
 0x2a6   :  { %3946 = vmatpush.bf16.msrb.mxu2 %v7765_v40  ;;  %v7974_v40 = vld [vmem:[%s14218_s17 + $0xf8] sm:$0xf0] }
 0x2a7   :  { %v3307_v6 = vpop.f32.mrf.mxu0  ;;  %v7977_v60 = vor.u32 %v9257_v37, %v7974_v40  ;;  %v7886_v37 = vld [vmem:[%s14218_s17 + $0x50] sm:$0xf0]  ;;  %v12921_v40 = vpack.c.bf16 %v465_v27, %v465_v27  ;;  %v9366_v27 = vld [vmem:[%s14219_s19 + $0x14c] sm:$0xf0] }
 0x2a9   :  { %3968 = vmatpush.bf16.msrb.mxu3 %v7833_v47  ;;  %v9258_v47 = vld [vmem:[%s14218_s17 + $0xec] sm:$0xf0] }
 0x2aa   :  { %3947 = vmatpush.bf16.msrb.mxu2 %v7749_v42  ;;  %v7965_v1 = vor.u32 %v9258_v47, %v7964_v54  ;;  %v9248_v54 = vld [vmem:[%s14218_s17 + $0xa4] sm:$0xf]  ;;  %v7876_v47 = vld [vmem:[%s14218_s17 + $0x28] sm:$0xf] }
 0x2ab   :  { %v7877_v56 = vor.u32 %v9235_v7, %v7876_v47  ;;  %v7854_v7 = vld [vmem:[%s14218_s17 + $0x10] sm:$0xf0] }
 0x2ad   :  { %3969 = vmatpush.bf16.msrb.mxu3 %v7817_v22  ;;  %v7932_v22 = vld [vmem:[%s14218_s17 + $0xa0] sm:$0xf] }
 0x2ae   :  { %3948 = vmatpush.bf16.msrb.mxu2 %v7733_v57  ;;  %v7933_v4 = vor.u32 %v9250_v19, %v7932_v22  ;;  %v7958_v57 = vld [vmem:[%s14218_s17 + $0xd8] sm:$0xf0]  ;;  %v9245_v22 = vld [vmem:[%s14218_s17 + $0x8c] sm:$0xf] }
 0x2af   :  { %v7926_v19 = vld [vmem:[%s14218_s17 + $0x98] sm:$0xf0] }
 0x2b0   :  { %v7929_v12 = vor.u32 %v9245_v22, %v7926_v19  ;;  %v9355_v22 = vld [vmem:[%s14219_s19 + $0xf4] sm:$0xf0] }
 0x2b1   :  { %3970 = vmatpush.bf16.msrb.mxu3 %v7801_v28 }
 0x2b5   :  { %3971 = vmatpush.bf16.msrb.mxu3 %v7785_v36  ;;  %v7908_v36 = vld [vmem:[%s14218_s17 + $0x68] sm:$0xf] }
 0x2b6   :  { %v7909_v42 = vor.u32 %v9243_v35, %v7908_v36 }
 0x2b9   :  { %3972 = vmatpush.bf16.msrb.mxu3 %v7769_v61  ;;  %v7901_v61 = vor.u32 %v9242_v63, %v7900_v48  ;;  %v9350_v48 = vld [vmem:[%s14219_s19 + $0xcc] sm:$0xf0]  ;;  %v9348_v63 = vld [vmem:[%s14219_s19 + $0xc4] sm:$0xf] }
 0x2bd   :  { %3973 = vmatpush.bf16.msrb.mxu3 %v7753_v10  ;;  %v9252_v10 = vld [vmem:[%s14218_s17 + $0xc4] sm:$0xf] }
 0x2be   :  { %v7953_v13 = vor.u32 %v9252_v10, %v7950_v52  ;;  %v9344_v10 = vld [vmem:[%s14219_s19 + $0xa4] sm:$0xf]  ;;  %v8062_v52 = vld [vmem:[%s14219_s19 + $0xb0] sm:$0xf0] }
 0x2c1   :  { %3974 = vmatpush.bf16.msrb.mxu3 %v7737_v58  ;;  %v7885_v58 = vor.u32 %v9238_v39, %v7884_v51  ;;  %v9237_v51 = vld [vmem:[%s14218_s17 + $0x4c] sm:$0xf]  ;;  %v7894_v39 = vld [vmem:[%s14218_s17 + $0x58] sm:$0xf0] }
 0x2d1   :  { %v3266_v6 = vpop.f32.mrf.mxu1 }
 0x2d2   :  { %v3267_v53 = vadd.f32 %v3266_v6, %v3254_v3  ;;  %v7893_v3 = vor.u32 %v9239_v38, %v7892_v49  ;;  %v7961_v6 = vor.u32 %v9253_v46, %v7958_v57  ;;  %v9232_v38 = vld [vmem:[%s14218_s17 + $0x24] sm:$0xf]  ;;  %v7870_v46 = vld [vmem:[%s14218_s17 + $0x30] sm:$0xf0] }
 0x2d4   :  { %v3322_v29 = vmax.f32 %v3267_v53, 0.0  ;;  %v7934_v53 = vld [vmem:[%s14218_s17 + $0xb0] sm:$0xf0] }
 0x2d5   :  { %v7937_v11 = vor.u32 %v9248_v54, %v7934_v53  ;;  %v7873_v54 = vor.u32 %v9232_v38, %v7870_v46  ;;  %v9228_v53 = vld [vmem:[%s14218_s17 + $0x4] sm:$0xf]  ;;  %v3451_v38 = vpop.permute.xlu0 %3450  ;;  %v7982_v46 = vld [vmem:[%s14219_s19 + $0x10] sm:$0xf0] }
 0x2d6   :  { %v3490_v14 = vpack.c.bf16 %v3322_v29, %v3322_v29  ;;  %v7942_v29 = vld [vmem:[%s14218_s17 + $0xb8] sm:$0xf0] }
 0x2d7   :  { %v7945_v15 = vor.u32 %v9249_v5, %v7942_v29  ;;  %v9229_v5 = vld [vmem:[%s14218_s17 + $0xc] sm:$0xf]  ;;  %v7862_v29 = vld [vmem:[%s14218_s17 + $0x18] sm:$0xf0] }
 0x2d8   :  { %3884 = vmatmul.bf16.vlgmr.msra.gmra.mxu0 %v3490_v14  ;;  %3910 = vmatmul.bf16.vlgmr.msra.gmra.mxu1 %v3490_v14  ;;  %v7865_v19 = vor.u32 %v9229_v5, %v7862_v29 }
 0x2d9   :  { %4140 = vmatpush.bf16.msra.mxu0 %v7965_v1  ;;  %4166 = vmatpush.bf16.msra.mxu1 %v7973_v8  ;;  %v3268_v17 = vpop.f32.mrf.mxu1  ;;  %v7869_v8 = vor.u32 %v9234_v9, %v7868_v0  ;;  %v8044_v0 = vld [vmem:[%s14219_s19 + $0x80] sm:$0xf]  ;;  %v9342_v9 = vld [vmem:[%s14219_s19 + $0x8c] sm:$0xf0] }
 0x2da   :  { %v7918_v17 = vld [vmem:[%s14218_s17 + $0x90] sm:$0xf0] }
 0x2db   :  { %v7921_v25 = vor.u32 %v9244_v21, %v7918_v17  ;;  %v9370_v21 = vld [vmem:[%s14219_s19 + $0x16c] sm:$0xf0]  ;;  %v8030_v17 = vld [vmem:[%s14219_s19 + $0x70] sm:$0xf0] }
 0x2dd   :  { %4141 = vmatpush.bf16.msra.mxu0 %v7949_v33  ;;  %4167 = vmatpush.bf16.msra.mxu1 %v7957_v32  ;;  %v7860_v33 = vld [vmem:[%s14218_s17 + $0x8] sm:$0xf]  ;;  %v9231_v32 = vld [vmem:[%s14218_s17 + $0x14] sm:$0xf0] }
 0x2de   :  { %v7861_v16 = vor.u32 %v9231_v32, %v7860_v33  ;;  %v7857_v33 = vor.u32 %v9228_v53, %v7854_v7  ;;  %v8100_v32 = vld [vmem:[%s14219_s19 + $0xe8] sm:$0xf] }
 0x2e1   :  { %4142 = vmatpush.bf16.msra.mxu0 %v7933_v4  ;;  %4168 = vmatpush.bf16.msra.mxu1 %v7941_v20  ;;  %v3318_v28 = vpop.f32.mrf.mxu1  ;;  %v8094_v4 = vld [vmem:[%s14219_s19 + $0xf0] sm:$0xf0] }
 0x2e2   :  { %v3319_v50 = vadd.f32 %v3318_v28, %v3306_v26  ;;  %v7902_v26 = vld [vmem:[%s14218_s17 + $0x70] sm:$0xf0]  ;;  %v8093_v28 = vor.u32 %v9354_v24, %v8092_v23  ;;  %v9536_v24 = vld [vmem:[%s14216_s16] ss:$0 sm:$0xff] }
 0x2e3   :  { %v7905_v36 = vor.u32 %v9240_v2, %v7902_v26  ;;  %v9332_v2 = vld [vmem:[%s14219_s19 + $0x44] sm:$0xf]  ;;  %v8014_v26 = vld [vmem:[%s14219_s19 + $0x50] sm:$0xf0] }
 0x2e4   :  { %v3323_v59 = vmax.f32 %v3319_v50, 0.0  ;;  %v8076_v50 = vld [vmem:[%s14219_s19 + $0xc0] sm:$0xf] }
 0x2e5   :  { %4143 = vmatpush.bf16.msra.mxu0 %v7917_v30  ;;  %4169 = vmatpush.bf16.msra.mxu1 %v7925_v31  ;;  %v8097_v30 = vor.u32 %v9352_v44, %v8094_v4  ;;  %v9241_v31 = vld [vmem:[%s14218_s17 + $0x6c] sm:$0xf] }
 0x2e6   :  { %v12800_v41 = vpack.c.bf16 %v3323_v59, %v3323_v59  ;;  %v12852_v1 = vpop.f32.mrf.mxu3  ;;  %v7913_v35 = vor.u32 %v9241_v31, %v7910_v43  ;;  %v9236_v59 = vld [vmem:[%s14218_s17 + $0x44] sm:$0xf] }
 0x2e7   :  { %v7889_v49 = vor.u32 %v9236_v59, %v7886_v37  ;;  %v3444_v43 = vadd.f32 %v9536_v24, %v12852_v1  ;;  %v7998_v59 = vld [vmem:[%s14219_s19 + $0x30] sm:$0xf0]  ;;  %v8068_v37 = vld [vmem:[%s14219_s19 + $0xa8] sm:$0xf] }
 0x2e8   :  { %3897 = vmatmul.bf16.vlgmr.msra.gmra.mxu2 %v12800_v41  ;;  %3923 = vmatmul.bf16.vlgmr.msra.gmra.mxu3 %v12800_v41  ;;  %v8020_v24 = vld [vmem:[%s14219_s19 + $0x48] sm:$0xf] }
 0x2e9   :  { %3936 = vmatmul.bf16.vlgmr.msrb.gmra.mxu0 %v3490_v14  ;;  %3962 = vmatmul.bf16.vlgmr.msrb.gmra.mxu1 %v3490_v14  ;;  %v3320_v55 = vpop.f32.mrf.mxu1  ;;  %v7852_v14 = vld [vmem:[%s14218_s17] sm:$0xf] }
 0x2ea   :  { %4144 = vmatpush.bf16.msra.mxu0 %v7901_v61  ;;  %4153 = vmatpush.bf16.msra.mxu2 %v7969_v45  ;;  %v7853_v20 = vor.u32 %v9230_v18, %v7852_v14  ;;  %v8077_v61 = vor.u32 %v9350_v48, %v8076_v50  ;;  %v8081_v45 = vor.u32 %v9348_v63, %v8078_v62  ;;  %v8028_v14 = vld [vmem:[%s14219_s19 + $0x60] sm:$0xf] }
 0x2eb   :  { %4170 = vmatpush.bf16.msra.mxu1 %v7909_v42  ;;  %4179 = vmatpush.bf16.msra.mxu3 %v7977_v60  ;;  %v8060_v42 = vld [vmem:[%s14219_s19 + $0xa0] sm:$0xf]  ;;  %v9346_v60 = vld [vmem:[%s14219_s19 + $0xac] sm:$0xf0]  ;;  %v8065_v55 = vor.u32 %v9344_v10, %v8062_v52  ;;  %v8017_v48 = vor.u32 %v9332_v2, %v8014_v26  ;;  %v9363_v2 = vld [vmem:[%s14219_s19 + $0x134] sm:$0xf0] }
 0x2ec   :  { %v8061_v57 = vor.u32 %v9346_v60, %v8060_v42  ;;  %v8156_v18 = vld [vmem:[%s14219_s19 + $0x160] sm:$0xf]  ;;  %v9358_v52 = vld [vmem:[%s14219_s19 + $0x10c] sm:$0xf0]  ;;  %v9361_v26 = vld [vmem:[%s14219_s19 + $0x12c] sm:$0xf] }
 0x2ed   :  { %v8157_v23 = vor.u32 %v9370_v21, %v8156_v18  ;;  %v7996_v63 = vld [vmem:[%s14219_s19 + $0x20] sm:$0xf]  ;;  %v9364_v21 = vld [vmem:[%s14219_s19 + $0x144] sm:$0xf] }
 0x2ee   :  { %4145 = vmatpush.bf16.msra.mxu0 %v7885_v58  ;;  %4154 = vmatpush.bf16.msra.mxu2 %v7953_v13  ;;  %v3445_v34 = vpop.f32.mrf.mxu3  ;;  %v9233_v58 = vld [vmem:[%s14218_s17 + $0x2c] sm:$0xf]  ;;  %v7878_v13 = vld [vmem:[%s14218_s17 + $0x38] sm:$0xf0]  ;;  %v8124_v62 = vld [vmem:[%s14219_s19 + $0x120] sm:$0xf] }
 0x2ef   :  { %4171 = vmatpush.bf16.msra.mxu1 %v7893_v3  ;;  %4180 = vmatpush.bf16.msra.mxu3 %v7961_v6  ;;  %v9340_v3 = vld [vmem:[%s14219_s19 + $0x84] sm:$0xf]  ;;  %v8046_v6 = vld [vmem:[%s14219_s19 + $0x90] sm:$0xf0]  ;;  %v7881_v47 = vor.u32 %v9233_v58, %v7878_v13  ;;  %v9362_v34 = vld [vmem:[%s14219_s19 + $0x12c] sm:$0xf0] }
 0x2f0   :  { %v8108_v10 = vld [vmem:[%s14219_s19 + $0x100] sm:$0xf]  ;;  %v9368_v58 = vld [vmem:[%s14219_s19 + $0x164] sm:$0xf]  ;;  %v8158_v13 = vld [vmem:[%s14219_s19 + $0x170] sm:$0xf0] }
 0x2f1   :  { %v8161_v29 = vor.u32 %v9368_v58, %v8158_v13  ;;  %v9341_v58 = vld [vmem:[%s14219_s19 + $0x8c] sm:$0xf]  ;;  %v8054_v13 = vld [vmem:[%s14219_s19 + $0x98] sm:$0xf0] }
 0x2f2   :  { %4146 = vmatpush.bf16.msra.mxu0 %v7869_v8  ;;  %4155 = vmatpush.bf16.msra.mxu2 %v7937_v11  ;;  %v8045_v8 = vor.u32 %v9342_v9, %v8044_v0  ;;  %v8049_v11 = vor.u32 %v9340_v3, %v8046_v6  ;;  %v8164_v0 = vld [vmem:[%s14219_s19 + $0x168] sm:$0xf]  ;;  %v8109_v9 = vor.u32 %v9358_v52, %v8108_v10  ;;  %v9371_v3 = vld [vmem:[%s14219_s19 + $0x174] sm:$0xf0]  ;;  %v9369_v6 = vld [vmem:[%s14219_s19 + $0x16c] sm:$0xf] }
 0x2f3   :  { %4172 = vmatpush.bf16.msra.mxu1 %v7877_v56  ;;  %4181 = vmatpush.bf16.msra.mxu3 %v7945_v15  ;;  %v9338_v56 = vld [vmem:[%s14219_s19 + $0x6c] sm:$0xf0]  ;;  %v9336_v15 = vld [vmem:[%s14219_s19 + $0x64] sm:$0xf]  ;;  %v9349_v52 = vld [vmem:[%s14219_s19 + $0xcc] sm:$0xf] }
 0x2f4   :  { %v8029_v44 = vor.u32 %v9338_v56, %v8028_v14  ;;  %v8033_v4 = vor.u32 %v9336_v15, %v8030_v17  ;;  %v8165_v14 = vor.u32 %v9371_v3, %v8164_v0  ;;  %v8142_v56 = vld [vmem:[%s14219_s19 + $0x150] sm:$0xf0]  ;;  %v8148_v17 = vld [vmem:[%s14219_s19 + $0x148] sm:$0xf]  ;;  %v8057_v0 = vor.u32 %v9341_v58, %v8054_v13  ;;  %v8038_v3 = vld [vmem:[%s14219_s19 + $0x78] sm:$0xf0] }
 0x2f5   :  { %v9374_v58 = vld [vmem:[%s14220_s21 + $0xc] sm:$0xf0]  ;;  %v8368_v13 = vld [vmem:[%s14220_s21 + $0x180] sm:$0xf] }
 0x2f6   :  { %4147 = vmatpush.bf16.msra.mxu0 %v7853_v20  ;;  %4156 = vmatpush.bf16.msra.mxu2 %v7921_v25  ;;  %v8012_v20 = vld [vmem:[%s14219_s19 + $0x40] sm:$0xf] }
 0x2f7   :  { %4173 = vmatpush.bf16.msra.mxu1 %v7861_v16  ;;  %4182 = vmatpush.bf16.msra.mxu3 %v7929_v12  ;;  %v8140_v25 = vld [vmem:[%s14219_s19 + $0x140] sm:$0xf]  ;;  %v8101_v16 = vor.u32 %v9355_v22, %v8100_v32  ;;  %v9334_v12 = vld [vmem:[%s14219_s19 + $0x4c] sm:$0xf0]  ;;  %v9365_v32 = vld [vmem:[%s14219_s19 + $0x14c] sm:$0xf] }
 0x2f8   :  { %3949 = vmatmul.bf16.vlgmr.msrb.gmra.mxu2 %v12800_v41  ;;  %3975 = vmatmul.bf16.vlgmr.msrb.gmra.mxu3 %v12800_v41  ;;  %v7897_v41 = vor.u32 %v9237_v51, %v7894_v39  ;;  %v8141_v31 = vor.u32 %v9366_v27, %v8140_v25  ;;  %v8013_v50 = vor.u32 %v9334_v12, %v8012_v20  ;;  %v7980_v39 = vld [vmem:[%s14219_s19] sm:$0xf]  ;;  %v8150_v22 = vld [vmem:[%s14219_s19 + $0x158] sm:$0xf0]  ;;  %v9360_v25 = vld [vmem:[%s14219_s19 + $0x124] sm:$0xf] }
 0x2f9   :  { %4148 = vmatmul.bf16.vlgmr.msra.gmra.mxu0 %v12921_v40  ;;  %v8125_v51 = vor.u32 %v9362_v34, %v8124_v62  ;;  %v8126_v27 = vld [vmem:[%s14219_s19 + $0x130] sm:$0xf0]  ;;  %v8132_v12 = vld [vmem:[%s14219_s19 + $0x128] sm:$0xf]  ;;  %v9353_v34 = vld [vmem:[%s14219_s19 + $0xec] sm:$0xf] }
 0x2fa   :  { %4483 = vmatpush.bf16.msrb.mxu0 %v8093_v28  ;;  %4157 = vmatpush.bf16.msra.mxu2 %v7905_v36  ;;  %v8084_v28 = vld [vmem:[%s14219_s19 + $0xc8] sm:$0xf]  ;;  %v9330_v36 = vld [vmem:[%s14219_s19 + $0x2c] sm:$0xf0]  ;;  %v8110_v62 = vld [vmem:[%s14219_s19 + $0x110] sm:$0xf0] }
 0x2fb   :  { %4509 = vmatpush.bf16.msrb.mxu1 %v8097_v30  ;;  %4183 = vmatpush.bf16.msra.mxu3 %v7913_v35  ;;  %v9351_v30 = vld [vmem:[%s14219_s19 + $0xd4] sm:$0xf0]  ;;  %v9328_v35 = vld [vmem:[%s14219_s19 + $0x24] sm:$0xf]  ;;  %v7997_v42 = vor.u32 %v9330_v36, %v7996_v63  ;;  %v8102_v36 = vld [vmem:[%s14219_s19 + $0xf8] sm:$0xf0] }
 0x2fc   :  { %4174 = vmatmul.bf16.vlgmr.msra.gmra.mxu1 %v12921_v40  ;;  %v8085_v1 = vor.u32 %v9351_v30, %v8084_v28  ;;  %v8001_v60 = vor.u32 %v9328_v35, %v7998_v59  ;;  %v8134_v28 = vld [vmem:[%s14219_s19 + $0x138] sm:$0xf0]  ;;  %v9356_v63 = vld [vmem:[%s14219_s19 + $0x104] sm:$0xf]  ;;  %v8116_v35 = vld [vmem:[%s14219_s19 + $0x108] sm:$0xf] }
 0x2fd   :  { %v9359_v59 = vld [vmem:[%s14219_s19 + $0x114] sm:$0xf0] }
 0x2fe   :  { %4484 = vmatpush.bf16.msrb.mxu0 %v8077_v61  ;;  %4158 = vmatpush.bf16.msra.mxu2 %v7889_v49  ;;  %v9347_v61 = vld [vmem:[%s14219_s19 + $0xb4] sm:$0xf0]  ;;  %v9324_v49 = vld [vmem:[%s14219_s19 + $0x4] sm:$0xf] }
 0x2ff   :  { %4510 = vmatpush.bf16.msrb.mxu1 %v8081_v45  ;;  %4184 = vmatpush.bf16.msra.mxu3 %v7897_v41  ;;  %v3447_v45 = vmax.f32 %v3444_v43, 0.0  ;;  %v8069_v41 = vor.u32 %v9347_v61, %v8068_v37  ;;  %v7985_v7 = vor.u32 %v9324_v49, %v7982_v46  ;;  %v8004_v43 = vld [vmem:[%s14219_s19 + $0x28] sm:$0xf]  ;;  %v9357_v37 = vld [vmem:[%s14219_s19 + $0x10c] sm:$0xf] }
 0x300   :  { %v8118_v61 = vld [vmem:[%s14219_s19 + $0x118] sm:$0xf0]  ;;  %v9345_v46 = vld [vmem:[%s14219_s19 + $0xac] sm:$0xf] }
 0x301   :  { %v3454_v53 = vsel %vm3453_vm4, %v3447_v45, %v3451_v38  ;;  %v8121_v10 = vor.u32 %v9357_v37, %v8118_v61  ;;  %v8086_v49 = vld [vmem:[%s14219_s19 + $0xd8] sm:$0xf0]  ;;  %v8512_v37 = vld [vmem:[%s14220_s21 + $0x2a0] sm:$0xf]  ;;  %v9458_v61 = vld [vmem:[%s14220_s21 + $0x2ac] sm:$0xf0] }
 0x302   :  { %4485 = vmatpush.bf16.msrb.mxu0 %v8061_v57  ;;  %4159 = vmatpush.bf16.msra.mxu2 %v7873_v54  ;;  %v8052_v57 = vld [vmem:[%s14219_s19 + $0x88] sm:$0xf]  ;;  %v8166_v54 = vld [vmem:[%s14219_s19 + $0x178] sm:$0xf0]  ;;  %v13114_v15 = vpack.c.bf16 %v3454_v53, %v3454_v53 }
 0x303   :  { %4511 = vmatpush.bf16.msrb.mxu1 %v8065_v55  ;;  %4185 = vmatpush.bf16.msra.mxu3 %v7881_v47  ;;  %v9343_v55 = vld [vmem:[%s14219_s19 + $0x94] sm:$0xf0]  ;;  %v8169_v18 = vor.u32 %v9369_v6, %v8166_v54  ;;  %v9333_v54 = vld [vmem:[%s14219_s19 + $0x4c] sm:$0xf]  ;;  %v8022_v53 = vld [vmem:[%s14219_s19 + $0x58] sm:$0xf0] }
 0x304   :  { %v8053_v5 = vor.u32 %v9343_v55, %v8052_v57  ;;  %v8070_v57 = vld [vmem:[%s14219_s19 + $0xb8] sm:$0xf0] }
 0x305   :  { %v8073_v55 = vor.u32 %v9345_v46, %v8070_v57 }
 0x306   :  { %4486 = vmatpush.bf16.msrb.mxu0 %v8045_v8  ;;  %4160 = vmatpush.bf16.msra.mxu2 %v7857_v33  ;;  %v8036_v8 = vld [vmem:[%s14219_s19 + $0x68] sm:$0xf]  ;;  %v9367_v33 = vld [vmem:[%s14219_s19 + $0x154] sm:$0xf0] }
 0x307   :  { %4512 = vmatpush.bf16.msrb.mxu1 %v8049_v11  ;;  %4186 = vmatpush.bf16.msra.mxu3 %v7865_v19  ;;  %v9339_v11 = vld [vmem:[%s14219_s19 + $0x74] sm:$0xf0]  ;;  %v8149_v20 = vor.u32 %v9367_v33, %v8148_v17  ;;  %v8272_v17 = vld [vmem:[%s14220_s21 + $0xc0] sm:$0xf]  ;;  %v9398_v33 = vld [vmem:[%s14220_s21 + $0xcc] sm:$0xf0] }
 0x308   :  { %v8037_v19 = vor.u32 %v9339_v11, %v8036_v8  ;;  %v9325_v8 = vld [vmem:[%s14219_s19 + $0xc] sm:$0xf]  ;;  %v7990_v11 = vld [vmem:[%s14219_s19 + $0x18] sm:$0xf0] }
 0x309   :  { %4161 = vmatmul.bf16.vlgmr.msra.gmra.mxu2 %v12921_v40 }
 0x30a   :  { %4500 = vmatpush.bf16.msrb.mxu2 %v8157_v23  ;;  %4487 = vmatpush.bf16.msrb.mxu0 %v8029_v44  ;;  %v8145_v23 = vor.u32 %v9364_v21, %v8142_v56  ;;  %v13131_v44 = vpack.c.bf16 %v3451_v38, %v3451_v38  ;;  %v8089_v38 = vor.u32 %v9349_v52, %v8086_v49  ;;  %v9402_v21 = vld [vmem:[%s14220_s21 + $0xec] sm:$0xf0]  ;;  %v8496_v52 = vld [vmem:[%s14220_s21 + $0x280] sm:$0xf] }
 0x30b   :  { %4513 = vmatpush.bf16.msrb.mxu1 %v8033_v4  ;;  %4535 = vmatpush.bf16.msrb.mxu3 %v8101_v16  ;;  %v9335_v4 = vld [vmem:[%s14219_s19 + $0x54] sm:$0xf0]  ;;  %v8153_v16 = vor.u32 %v9365_v32, %v8150_v22  ;;  %v8273_v32 = vor.u32 %v9398_v33, %v8272_v17  ;;  %v9394_v22 = vld [vmem:[%s14220_s21 + $0xac] sm:$0xf0] }
 0x30c   :  { %4187 = vmatmul.bf16.vlgmr.msra.gmra.mxu3 %v12921_v40  ;;  %v9326_v40 = vld [vmem:[%s14219_s19 + $0xc] sm:$0xf0]  ;;  %v8021_v30 = vor.u32 %v9335_v4, %v8020_v24 }
 0x30d   :  { %v7981_v47 = vor.u32 %v9326_v40, %v7980_v39  ;;  %v8105_v39 = vor.u32 %v9353_v34, %v8102_v36  ;;  %v7988_v40 = vld [vmem:[%s14219_s19 + $0x8] sm:$0xf]  ;;  %v9390_v4 = vld [vmem:[%s14220_s21 + $0x8c] sm:$0xf0]  ;;  %v8208_v34 = vld [vmem:[%s14220_s21 + $0x40] sm:$0xf] }
 0x30e   :  { %4501 = vmatpush.bf16.msrb.mxu2 %v8141_v31  ;;  %4488 = vmatpush.bf16.msrb.mxu0 %v8013_v50  ;;  %v8129_v31 = vor.u32 %v9360_v25, %v8126_v27  ;;  %v9331_v50 = vld [vmem:[%s14219_s19 + $0x34] sm:$0xf0]  ;;  %v9466_v27 = vld [vmem:[%s14220_s21 + $0x2ec] sm:$0xf0]  ;;  %v8400_v36 = vld [vmem:[%s14220_s21 + $0x1c0] sm:$0xf] }
 0x30f   :  { %4514 = vmatpush.bf16.msrb.mxu1 %v8017_v48  ;;  %4536 = vmatpush.bf16.msrb.mxu3 %v8085_v1  ;;  %v8133_v48 = vor.u32 %v9363_v2, %v8132_v12  ;;  %v8137_v1 = vor.u32 %v9361_v26, %v8134_v28  ;;  %v8005_v45 = vor.u32 %v9331_v50, %v8004_v43  ;;  %v8224_v26 = vld [vmem:[%s14220_s21 + $0x60] sm:$0xf]  ;;  %v9386_v28 = vld [vmem:[%s14220_s21 + $0x6c] sm:$0xf0] }
 0x310   :  { %v9434_v43 = vld [vmem:[%s14220_s21 + $0x1ec] sm:$0xf0]  ;;  %v8528_v50 = vld [vmem:[%s14220_s21 + $0x2c0] sm:$0xf] }
 0x311   :  { %v9454_v49 = vld [vmem:[%s14220_s21 + $0x28c] sm:$0xf0] }
 0x312   :  { %4502 = vmatpush.bf16.msrb.mxu2 %v8125_v51  ;;  %4489 = vmatpush.bf16.msrb.mxu0 %v7997_v42  ;;  %v8113_v51 = vor.u32 %v9356_v63, %v8110_v62  ;;  %v9327_v42 = vld [vmem:[%s14219_s19 + $0x14] sm:$0xf0]  ;;  %v8497_v57 = vor.u32 %v9454_v49, %v8496_v52  ;;  %v9406_v52 = vld [vmem:[%s14220_s21 + $0x10c] sm:$0xf0] }
 0x313   :  { %4515 = vmatpush.bf16.msrb.mxu1 %v8001_v60  ;;  %4537 = vmatpush.bf16.msrb.mxu3 %v8069_v41  ;;  %v8117_v60 = vor.u32 %v9359_v59, %v8116_v35  ;;  %v7989_v41 = vor.u32 %v9327_v42, %v7988_v40  ;;  %v9430_v59 = vld [vmem:[%s14220_s21 + $0x1cc] sm:$0xf0]  ;;  %v8384_v42 = vld [vmem:[%s14220_s21 + $0x1a0] sm:$0xf] }
 0x314   :  { %v9378_v40 = vld [vmem:[%s14220_s21 + $0x2c] sm:$0xf0] }
 0x316   :  { %4503 = vmatpush.bf16.msrb.mxu2 %v8109_v9  ;;  %4490 = vmatpush.bf16.msrb.mxu0 %v7981_v47  ;;  %v9337_v9 = vld [vmem:[%s14219_s19 + $0x6c] sm:$0xf]  ;;  %v8025_v47 = vor.u32 %v9333_v54, %v8022_v53  ;;  %v9400_v54 = vld [vmem:[%s14220_s21 + $0xe4] sm:$0xf]  ;;  %v8290_v53 = vld [vmem:[%s14220_s21 + $0xf0] sm:$0xf0] }
 0x317   :  { %4516 = vmatpush.bf16.msrb.mxu1 %v7985_v7  ;;  %4538 = vmatpush.bf16.msrb.mxu3 %v8053_v5  ;;  %v8041_v6 = vor.u32 %v9337_v9, %v8038_v3  ;;  %v9329_v7 = vld [vmem:[%s14219_s19 + $0x2c] sm:$0xf]  ;;  %v8006_v5 = vld [vmem:[%s14219_s19 + $0x38] sm:$0xf0]  ;;  %v8480_v9 = vld [vmem:[%s14220_s21 + $0x260] sm:$0xf] }
 0x318   :  { %v9450_v3 = vld [vmem:[%s14220_s21 + $0x26c] sm:$0xf0] }
 0x319   :  { %4491 = vmatmul.bf16.vlgmr.msrb.gmra.mxu0 %v13114_v15  ;;  %8170 = vmatmul.msk.bf16.vlgmr.msrb.gmra.mxu2 %vm3453_vm4, %v13131_v44 }
 0x31a   :  { %4526 = vmatpush.bf16.msra.mxu2 %v8161_v29  ;;  %4552 = vmatpush.bf16.msra.mxu0 %v8165_v14  ;;  %v8009_v29 = vor.u32 %v9329_v7, %v8006_v5  ;;  %v7993_v14 = vor.u32 %v9325_v8, %v7990_v11  ;;  %v8481_v7 = vor.u32 %v9450_v3, %v8480_v9  ;;  %v9460_v9 = vld [vmem:[%s14220_s21 + $0x2c4] sm:$0xf]  ;;  %v8530_v3 = vld [vmem:[%s14220_s21 + $0x2d0] sm:$0xf0] }
 0x31b   :  { %4578 = vmatpush.bf16.msra.mxu1 %v8169_v18  ;;  %4539 = vmatpush.bf16.msrb.mxu3 %v8037_v19  ;;  %v8288_v18 = vld [vmem:[%s14220_s21 + $0xe0] sm:$0xf]  ;;  %v8293_v5 = vor.u32 %v9400_v54, %v8290_v53 }
 0x31c   :  { %4517 = vmatmul.bf16.vlgmr.msrb.gmra.mxu1 %v13114_v15  ;;  %v8289_v56 = vor.u32 %v9402_v21, %v8288_v18  ;;  %v9418_v18 = vld [vmem:[%s14220_s21 + $0x16c] sm:$0xf0]  ;;  %v8464_v21 = vld [vmem:[%s14220_s21 + $0x240] sm:$0xf] }
 0x31e   :  { %4527 = vmatpush.bf16.msra.mxu2 %v8145_v23  ;;  %4553 = vmatpush.bf16.msra.mxu0 %v8149_v20  ;;  %v8544_v20 = vld [vmem:[%s14220_s21 + $0x2e0] sm:$0xf] }
 0x31f   :  { %4579 = vmatpush.bf16.msra.mxu1 %v8153_v16  ;;  %4540 = vmatpush.bf16.msrb.mxu3 %v8021_v30  ;;  %v8545_v16 = vor.u32 %v9466_v27, %v8544_v20  ;;  %v8416_v30 = vld [vmem:[%s14220_s21 + $0x1e0] sm:$0xf] }
 0x320   :  { %v8417_v63 = vor.u32 %v9434_v43, %v8416_v30  ;;  %v8448_v20 = vld [vmem:[%s14220_s21 + $0x220] sm:$0xf]  ;;  %v9498_v43 = vld [vmem:[%s14220_s21 + $0x3ec] sm:$0xf0] }
 0x322   :  { %4528 = vmatpush.bf16.msra.mxu2 %v8129_v31  ;;  %4554 = vmatpush.bf16.msra.mxu0 %v8133_v48  ;;  %v8225_v31 = vor.u32 %v9386_v28, %v8224_v26  ;;  %v9462_v48 = vld [vmem:[%s14220_s21 + $0x2cc] sm:$0xf0] }
 0x323   :  { %4580 = vmatpush.bf16.msra.mxu1 %v8137_v1  ;;  %4541 = vmatpush.bf16.msrb.mxu3 %v8005_v45  ;;  %v8529_v62 = vor.u32 %v9462_v48, %v8528_v50  ;;  %v9382_v1 = vld [vmem:[%s14220_s21 + $0x4c] sm:$0xf0]  ;;  %v8401_v45 = vor.u32 %v9430_v59, %v8400_v36  ;;  %v8320_v48 = vld [vmem:[%s14220_s21 + $0x120] sm:$0xf]  ;;  %v9388_v36 = vld [vmem:[%s14220_s21 + $0x84] sm:$0xf] }
 0x324   :  { %v8209_v35 = vor.u32 %v9382_v1, %v8208_v34  ;;  %v9438_v1 = vld [vmem:[%s14220_s21 + $0x20c] sm:$0xf0] }
 0x326   :  { %4529 = vmatpush.bf16.msra.mxu2 %v8113_v51  ;;  %4555 = vmatpush.bf16.msra.mxu0 %v8117_v60  ;;  %v8513_v51 = vor.u32 %v9458_v61, %v8512_v37 }
 0x327   :  { %4581 = vmatpush.bf16.msra.mxu1 %v8121_v10  ;;  %4542 = vmatpush.bf16.msrb.mxu3 %v7989_v41  ;;  %v9426_v10 = vld [vmem:[%s14220_s21 + $0x1ac] sm:$0xf0] }
 0x328   :  { %v8385_v46 = vor.u32 %v9426_v10, %v8384_v42  ;;  %v8304_v10 = vld [vmem:[%s14220_s21 + $0x100] sm:$0xf] }
 0x329   :  { %8172 = vmatmul.msk.bf16.vlgmr.msra.gmra.mxu0 %vm3453_vm4, %v13131_v44  ;;  %8171 = vmatmul.msk.bf16.vlgmr.msra.gmra.mxu2 %vm3453_vm4, %v13131_v44 }
 0x32a   :  { %4561 = vmatpush.bf16.msrb.mxu2 %v8105_v39  ;;  %4543 = vmatmul.bf16.vlgmr.msrb.gmra.mxu3 %v13114_v15  ;;  %v8192_v39 = vld [vmem:[%s14220_s21 + $0x20] sm:$0xf] }
 0x32b   :  { %5391 = vmatpush.bf16.msrb.mxu0 %v8289_v56  ;;  %5417 = vmatpush.bf16.msra.mxu3 %v8545_v16  ;;  %v8193_v60 = vor.u32 %v9378_v40, %v8192_v39  ;;  %v8656_v39 = vld [vmem:[%s14220_s21 + $0x3c0] sm:$0xf] }
 0x32c   :  { %8173 = vmatmul.msk.bf16.vlgmr.msra.gmra.mxu1 %vm3453_vm4, %v13131_v44  ;;  %v8240_v44 = vld [vmem:[%s14220_s21 + $0x80] sm:$0xf] }
 0x32d   :  { %v8241_v25 = vor.u32 %v9390_v4, %v8240_v44  ;;  %5404 = vmatpush.bf16.msrb.mxu1 %v8417_v63  ;;  %v8336_v44 = vld [vmem:[%s14220_s21 + $0x140] sm:$0xf]  ;;  %v9414_v4 = vld [vmem:[%s14220_s21 + $0x14c] sm:$0xf0] }
 0x32e   :  { %4562 = vmatpush.bf16.msrb.mxu2 %v8089_v38  ;;  %v8337_v27 = vor.u32 %v9414_v4, %v8336_v44  ;;  %v9410_v63 = vld [vmem:[%s14220_s21 + $0x12c] sm:$0xf0]  ;;  %v8624_v44 = vld [vmem:[%s14220_s21 + $0x380] sm:$0xf] }
 0x32f   :  { %5392 = vmatpush.bf16.msrb.mxu0 %v8273_v32  ;;  %5418 = vmatpush.bf16.msra.mxu3 %v8529_v62  ;;  %v9446_v32 = vld [vmem:[%s14220_s21 + $0x24c] sm:$0xf0]  ;;  %v8432_v62 = vld [vmem:[%s14220_s21 + $0x200] sm:$0xf]  ;;  %v8321_v34 = vor.u32 %v9410_v63, %v8320_v48 }
 0x330   :  { %v8433_v37 = vor.u32 %v9438_v1, %v8432_v62  ;;  %v9486_v4 = vld [vmem:[%s14220_s21 + $0x38c] sm:$0xf0]  ;;  %v8608_v48 = vld [vmem:[%s14220_s21 + $0x360] sm:$0xf]  ;;  %v8178_v1 = vld [vmem:[%s14220_s21 + $0x10] sm:$0xf0] }
 0x331   :  { %5405 = vmatpush.bf16.msrb.mxu1 %v8401_v45  ;;  %v9464_v45 = vld [vmem:[%s14220_s21 + $0x2e4] sm:$0xf]  ;;  %v9482_v63 = vld [vmem:[%s14220_s21 + $0x36c] sm:$0xf0] }
 0x332   :  { %4563 = vmatpush.bf16.msrb.mxu2 %v8073_v55  ;;  %v8176_v55 = vld [vmem:[%s14220_s21] sm:$0xf]  ;;  %v8609_v62 = vor.u32 %v9482_v63, %v8608_v48 }
 0x333   :  { %5419 = vmatpush.bf16.msra.mxu3 %v8513_v51  ;;  %v8546_v51 = vld [vmem:[%s14220_s21 + $0x2f0] sm:$0xf0]  ;;  %v13629_v48 = vld [vmem:[%s14221_s20] sm:$0xf] }
 0x334   :  { %v8549_v42 = vor.u32 %v9464_v45, %v8546_v51  ;;  %v8482_v45 = vld [vmem:[%s14220_s21 + $0x270] sm:$0xf0] }
 0x335   :  { %5406 = vmatpush.bf16.msrb.mxu1 %v8385_v46  ;;  %v8305_v46 = vor.u32 %v9406_v52, %v8304_v10  ;;  %v9416_v52 = vld [vmem:[%s14220_s21 + $0x164] sm:$0xf] }
 0x336   :  { %4564 = vmatpush.bf16.msrb.mxu2 %v8057_v0  ;;  %v9422_v0 = vld [vmem:[%s14220_s21 + $0x18c] sm:$0xf0] }
 0x337   :  { %5420 = vmatpush.bf16.msra.mxu3 %v8497_v57  ;;  %v9384_v57 = vld [vmem:[%s14220_s21 + $0x64] sm:$0xf] }
 0x33a   :  { %4565 = vmatpush.bf16.msrb.mxu2 %v8041_v6  ;;  %v8177_v6 = vor.u32 %v9374_v58, %v8176_v55  ;;  %v8226_v55 = vld [vmem:[%s14220_s21 + $0x70] sm:$0xf0]  ;;  %v9432_v58 = vld [vmem:[%s14220_s21 + $0x1e4] sm:$0xf] }
 0x33b   :  { %5421 = vmatpush.bf16.msra.mxu3 %v8481_v7  ;;  %v8640_v7 = vld [vmem:[%s14220_s21 + $0x3a0] sm:$0xf] }
 0x33e   :  { %4566 = vmatpush.bf16.msrb.mxu2 %v8025_v47  ;;  %v8369_v47 = vor.u32 %v9422_v0, %v8368_v13  ;;  %v8229_v13 = vor.u32 %v9384_v57, %v8226_v55  ;;  %v8418_v0 = vld [vmem:[%s14220_s21 + $0x1f0] sm:$0xf0] }
 0x33f   :  { %v8421_v53 = vor.u32 %v9432_v58, %v8418_v0  ;;  %v8466_v55 = vld [vmem:[%s14220_s21 + $0x250] sm:$0xf0]  ;;  %v8576_v58 = vld [vmem:[%s14220_s21 + $0x320] sm:$0xf] }
 0x340   :  { %5407 = vmatpush.bf16.msrb.mxu1 %v8369_v47  ;;  %v8533_v47 = vor.u32 %v9460_v9, %v8530_v3 }
 0x342   :  { %4567 = vmatpush.bf16.msrb.mxu2 %v8009_v29 }
 0x346   :  { %4568 = vmatpush.bf16.msrb.mxu2 %v7993_v14  ;;  %v8352_v14 = vld [vmem:[%s14220_s21 + $0x160] sm:$0xf] }
 0x347   :  { %v8353_v33 = vor.u32 %v9418_v18, %v8352_v14  ;;  %v9380_v18 = vld [vmem:[%s14220_s21 + $0x44] sm:$0xf] }
 0x349   :  { %4569 = vmatmul.bf16.vlgmr.msrb.gmra.mxu2 %v13114_v15  ;;  %v8256_v15 = vld [vmem:[%s14220_s21 + $0xa0] sm:$0xf]  ;;  %5408 = vmatpush.bf16.msrb.mxu1 %v8353_v33  ;;  %v8402_v33 = vld [vmem:[%s14220_s21 + $0x1d0] sm:$0xf0] }
 0x34a   :  { %v8257_v19 = vor.u32 %v9394_v22, %v8256_v15  ;;  %v9396_v15 = vld [vmem:[%s14220_s21 + $0xc4] sm:$0xf]  ;;  %v8274_v22 = vld [vmem:[%s14220_s21 + $0xd0] sm:$0xf0] }
 0x34c   :  { %5393 = vmatpush.bf16.msrb.mxu0 %v8257_v19  ;;  %v8465_v19 = vor.u32 %v9446_v32, %v8464_v21  ;;  %v8210_v21 = vld [vmem:[%s14220_s21 + $0x50] sm:$0xf0]  ;;  %v9456_v32 = vld [vmem:[%s14220_s21 + $0x2a4] sm:$0xf] }
 0x34d   :  { %5409 = vmatpush.bf16.msrb.mxu1 %v8337_v27  ;;  %v8194_v27 = vld [vmem:[%s14220_s21 + $0x30] sm:$0xf0] }
 0x34e   :  { %5422 = vmatpush.bf16.msra.mxu3 %v8465_v19 }
 0x350   :  { %5394 = vmatpush.bf16.msrb.mxu0 %v8241_v25  ;;  %v9442_v25 = vld [vmem:[%s14220_s21 + $0x22c] sm:$0xf0] }
 0x351   :  { %v8449_v16 = vor.u32 %v9442_v25, %v8448_v20  ;;  %5410 = vmatpush.bf16.msrb.mxu1 %v8321_v34  ;;  %v8625_v20 = vor.u32 %v9486_v4, %v8624_v44  ;;  %v9376_v25 = vld [vmem:[%s14220_s21 + $0x24] sm:$0xf]  ;;  %v8434_v44 = vld [vmem:[%s14220_s21 + $0x210] sm:$0xf0] }
 0x352   :  { %v9372_v34 = vld [vmem:[%s14220_s21 + $0x4] sm:$0xf] }
 0x353   :  { %5423 = vmatpush.bf16.msra.mxu3 %v8449_v16  ;;  %v9424_v16 = vld [vmem:[%s14220_s21 + $0x1a4] sm:$0xf] }
 0x354   :  { %5395 = vmatpush.bf16.msrb.mxu0 %v8225_v31  ;;  %v8672_v31 = vld [vmem:[%s14220_s21 + $0x3e0] sm:$0xf] }
 0x355   :  { %v13262_v23 = vpop.f32.mrf.mxu0  ;;  %v13264_v24 = vpop.f32.mrf.mxu1  ;;  %v8673_v50 = vor.u32 %v9498_v43, %v8672_v31  ;;  %5411 = vmatpush.bf16.msrb.mxu1 %v8305_v46  ;;  %v9444_v46 = vld [vmem:[%s14220_s21 + $0x244] sm:$0xf] }
 0x356   :  { %v8469_v9 = vor.u32 %v9444_v46, %v8466_v55 }
 0x357   :  { %5430 = vmatpush.bf16.msra.mxu2 %v8673_v50  ;;  %5424 = vmatpush.bf16.msra.mxu3 %v8433_v37  ;;  %v8370_v37 = vld [vmem:[%s14220_s21 + $0x190] sm:$0xf0] }
 0x358   :  { %5396 = vmatpush.bf16.msrb.mxu0 %v8209_v35  ;;  %v8242_v35 = vld [vmem:[%s14220_s21 + $0x90] sm:$0xf0] }
 0x359   :  { %v8245_v61 = vor.u32 %v9388_v36, %v8242_v35  ;;  %5456 = vmatpush.bf16.msra.mxu1 %v8421_v53  ;;  %v9420_v36 = vld [vmem:[%s14220_s21 + $0x184] sm:$0xf]  ;;  %v8181_v35 = vor.u32 %v9372_v34, %v8178_v1 }
 0x35a   :  { %v8373_v51 = vor.u32 %v9420_v36, %v8370_v37  ;;  %v9412_v53 = vld [vmem:[%s14220_s21 + $0x144] sm:$0xf]  ;;  %v8626_v37 = vld [vmem:[%s14220_s21 + $0x390] sm:$0xf0] }
 0x35b   :  { %5469 = vmatpush.bf16.msrb.mxu3 %v8549_v42  ;;  %v8592_v42 = vld [vmem:[%s14220_s21 + $0x340] sm:$0xf] }
 0x35c   :  { %5397 = vmatpush.bf16.msrb.mxu0 %v8193_v60  ;;  %v9494_v60 = vld [vmem:[%s14220_s21 + $0x3cc] sm:$0xf0] }
 0x35d   :  { %v3887_v12 = vpop.f32.mrf.mxu0  ;;  %v3913_v2 = vpop.f32.mrf.mxu1  ;;  %v8657_v49 = vor.u32 %v9494_v60, %v8656_v39  ;;  %v9478_v60 = vld [vmem:[%s14220_s21 + $0x34c] sm:$0xf0] }
 0x35e   :  { %v9392_v12 = vld [vmem:[%s14220_s21 + $0xa4] sm:$0xf]  ;;  %v8258_v2 = vld [vmem:[%s14220_s21 + $0xb0] sm:$0xf0]  ;;  %v8593_v10 = vor.u32 %v9478_v60, %v8592_v42 }
 0x35f   :  { %v8261_v30 = vor.u32 %v9392_v12, %v8258_v2  ;;  %5431 = vmatpush.bf16.msra.mxu2 %v8657_v49  ;;  %5470 = vmatpush.bf16.msrb.mxu3 %v8533_v47  ;;  %v8197_v12 = vor.u32 %v9376_v25, %v8194_v27  ;;  %v8386_v2 = vld [vmem:[%s14220_s21 + $0x1b0] sm:$0xf0] }
 0x360   :  { %5398 = vmatpush.bf16.msrb.mxu0 %v8177_v6  ;;  %v8389_v43 = vor.u32 %v9424_v16, %v8386_v2  ;;  %v8354_v49 = vld [vmem:[%s14220_s21 + $0x170] sm:$0xf0] }
 0x361   :  { %v8357_v57 = vor.u32 %v9416_v52, %v8354_v49  ;;  %v8338_v47 = vld [vmem:[%s14220_s21 + $0x150] sm:$0xf0] }
 0x362   :  { %v8658_v2 = vld [vmem:[%s14220_s21 + $0x3d0] sm:$0xf0] }
 0x364   :  { %5443 = vmatpush.bf16.msra.mxu0 %v8293_v5  ;;  %v9490_v5 = vld [vmem:[%s14220_s21 + $0x3ac] sm:$0xf0] }
 0x365   :  { %v8641_v14 = vor.u32 %v9490_v5, %v8640_v7  ;;  %v8341_v7 = vor.u32 %v9412_v53, %v8338_v47  ;;  %v9440_v5 = vld [vmem:[%s14220_s21 + $0x224] sm:$0xf]  ;;  %v8594_v47 = vld [vmem:[%s14220_s21 + $0x350] sm:$0xf0] }
 0x366   :  { %v13332_v41 = vpop.f32.mrf.mxu0  ;;  %v13334_v38 = vpop.f32.mrf.mxu1  ;;  %v9476_v53 = vld [vmem:[%s14220_s21 + $0x344] sm:$0xf] }
 0x367   :  { %5432 = vmatpush.bf16.msra.mxu2 %v8641_v14  ;;  %v8450_v14 = vld [vmem:[%s14220_s21 + $0x230] sm:$0xf0] }
 0x36b   :  { %v13360_v29 = vpop.f32.mrf.mxu2  ;;  %v3924_v8 = vpop.f32.mrf.mxu3  ;;  %5433 = vmatpush.bf16.msra.mxu2 %v8625_v20 }
 0x36c   :  { %v13363_v11 = vadd.f32 %v3924_v8, %v13264_v24  ;;  %v8277_v24 = vor.u32 %v9396_v15, %v8274_v22  ;;  %v8514_v15 = vld [vmem:[%s14220_s21 + $0x2b0] sm:$0xf0] }
 0x36e   :  { %v3939_v56 = vpop.f32.mrf.mxu0  ;;  %v3965_v17 = vpop.f32.mrf.mxu1  ;;  %5444 = vmatpush.bf16.msra.mxu0 %v8277_v24  ;;  %v8517_v24 = vor.u32 %v9456_v32, %v8514_v15  ;;  %v9408_v15 = vld [vmem:[%s14220_s21 + $0x124] sm:$0xf] }
 0x36f   :  { %v9428_v56 = vld [vmem:[%s14220_s21 + $0x1c4] sm:$0xf]  ;;  %5434 = vmatpush.bf16.msra.mxu2 %v8609_v62  ;;  %v3899_v62 = vadd.f32 %v13360_v29, %v13262_v23  ;;  %v8610_v29 = vld [vmem:[%s14220_s21 + $0x370] sm:$0xf0] }
 0x370   :  { %v8405_v19 = vor.u32 %v9428_v56, %v8402_v33  ;;  %5471 = vmatpush.bf16.msrb.mxu3 %v8517_v24  ;;  %v9470_v56 = vld [vmem:[%s14220_s21 + $0x30c] sm:$0xf0]  ;;  %v8674_v33 = vld [vmem:[%s14220_s21 + $0x3f0] sm:$0xf0]  ;;  %v9436_v24 = vld [vmem:[%s14220_s21 + $0x204] sm:$0xf] }
 0x371   :  { %v8437_v25 = vor.u32 %v9436_v24, %v8434_v44  ;;  %v9480_v23 = vld [vmem:[%s14220_s21 + $0x364] sm:$0xf]  ;;  %v8562_v44 = vld [vmem:[%s14220_s21 + $0x310] sm:$0xf0] }
 0x372   :  { %5445 = vmatpush.bf16.msra.mxu0 %v8261_v30  ;;  %5457 = vmatpush.bf16.msra.mxu1 %v8405_v19  ;;  %v8613_v52 = vor.u32 %v9480_v23, %v8610_v29  ;;  %v9468_v24 = vld [vmem:[%s14220_s21 + $0x304] sm:$0xf]  ;;  %v8216_v23 = vld [vmem:[%s14220_s21 + $0x48] sm:$0xf]  ;;  %v9383_v29 = vld [vmem:[%s14220_s21 + $0x54] sm:$0xf0] }
 0x373   :  { %v3900_v26 = vpop.f32.mrf.mxu2  ;;  %v3926_v28 = vpop.f32.mrf.mxu3  ;;  %5435 = vmatpush.bf16.msra.mxu2 %v8593_v10  ;;  %v8296_v10 = vld [vmem:[%s14220_s21 + $0xe8] sm:$0xf] }
 0x374   :  { %v9452_v26 = vld [vmem:[%s14220_s21 + $0x284] sm:$0xf]  ;;  %v8498_v28 = vld [vmem:[%s14220_s21 + $0x290] sm:$0xf0] }
 0x375   :  { %v8501_v50 = vor.u32 %v9452_v26, %v8498_v28  ;;  %v9404_v28 = vld [vmem:[%s14220_s21 + $0x104] sm:$0xf] }
 0x376   :  { %v13425_v59 = vpop.f32.mrf.mxu0  ;;  %5446 = vmatpush.bf16.msra.mxu0 %v8245_v61  ;;  %5458 = vmatpush.bf16.msra.mxu1 %v8389_v43  ;;  %v9448_v61 = vld [vmem:[%s14220_s21 + $0x264] sm:$0xf] }
 0x377   :  { %5472 = vmatpush.bf16.msrb.mxu3 %v8501_v50  ;;  %v8485_v39 = vor.u32 %v9448_v61, %v8482_v45  ;;  %v9488_v43 = vld [vmem:[%s14220_s21 + $0x3a4] sm:$0xf]  ;;  %v8642_v50 = vld [vmem:[%s14220_s21 + $0x3b0] sm:$0xf0]  ;;  %v4150_v61 = vadd.f32 %v13425_v59, %v3899_v62  ;;  %v9403_v59 = vld [vmem:[%s14220_s21 + $0xf4] sm:$0xf0] }
 0x378   :  { %v8645_v63 = vor.u32 %v9488_v43, %v8642_v50 }
 0x379   :  { %v13436_v40 = vpop.f32.mrf.mxu1 }
 0x37a   :  { %5447 = vmatpush.bf16.msra.mxu0 %v8229_v13  ;;  %5459 = vmatpush.bf16.msra.mxu1 %v8373_v51  ;;  %v9474_v13 = vld [vmem:[%s14220_s21 + $0x32c] sm:$0xf0]  ;;  %v4593_v51 = vperm.slane %v13629_v48, 0 }
 0x37b   :  { %v13465_v6 = vpop.f32.mrf.mxu2  ;;  %v3976_v54 = vpop.f32.mrf.mxu3  ;;  %5473 = vmatpush.bf16.msrb.mxu3 %v8485_v39  ;;  %v8577_v3 = vor.u32 %v9474_v13, %v8576_v58  ;;  %v8297_v58 = vor.u32 %v9403_v59, %v8296_v10  ;;  %v8280_v13 = vld [vmem:[%s14220_s21 + $0xc8] sm:$0xf] }
 0x37c   :  { %v13474_v8 = vadd.f32 %v3976_v54, %v13334_v38  ;;  %v8213_v38 = vor.u32 %v9380_v18, %v8210_v21  ;;  %v8560_v18 = vld [vmem:[%s14220_s21 + $0x300] sm:$0xf]  ;;  %v8453_v21 = vor.u32 %v9440_v5, %v8450_v14  ;;  %v3951_v5 = vadd.f32 %v13465_v6, %v13332_v41  ;;  %v9395_v41 = vld [vmem:[%s14220_s21 + $0xb4] sm:$0xf0]  ;;  %v8408_v59 = vld [vmem:[%s14220_s21 + $0x1c8] sm:$0xf] }
 0x37d   :  { %5436 = vmatpush.bf16.msra.mxu2 %v8577_v3  ;;  %v9399_v3 = vld [vmem:[%s14220_s21 + $0xd4] sm:$0xf0] }
 0x37e   :  { %v4151_v17 = vpop.f32.mrf.mxu0  ;;  %5448 = vmatpush.bf16.msra.mxu0 %v8213_v38  ;;  %5460 = vmatpush.bf16.msra.mxu1 %v8357_v57  ;;  %v9496_v38 = vld [vmem:[%s14220_s21 + $0x3e4] sm:$0xf]  ;;  %v8281_v14 = vor.u32 %v9399_v3, %v8280_v13  ;;  %v8200_v13 = vld [vmem:[%s14220_s21 + $0x28] sm:$0xf]  ;;  %v9379_v3 = vld [vmem:[%s14220_s21 + $0x34] sm:$0xf0] }
 0x37f   :  { %5474 = vmatpush.bf16.msrb.mxu3 %v8469_v9  ;;  %v8561_v17 = vor.u32 %v9470_v56, %v8560_v18  ;;  %v8677_v32 = vor.u32 %v9496_v38, %v8674_v33  ;;  %v9472_v18 = vld [vmem:[%s14220_s21 + $0x324] sm:$0xf]  ;;  %v8264_v56 = vld [vmem:[%s14220_s21 + $0xa8] sm:$0xf]  ;;  %v4176_v38 = vadd.f32 %v13436_v40, %v3951_v5 }
 0x380   :  { %v8248_v40 = vld [vmem:[%s14220_s21 + $0x88] sm:$0xf] }
 0x381   :  { %v4177_v22 = vpop.f32.mrf.mxu1  ;;  %5437 = vmatpush.bf16.msra.mxu2 %v8561_v17  ;;  %v8504_v5 = vld [vmem:[%s14220_s21 + $0x288] sm:$0xf] }
 0x382   :  { %5449 = vmatpush.bf16.msra.mxu0 %v8197_v12  ;;  %5461 = vmatpush.bf16.msra.mxu1 %v8341_v7  ;;  %v8322_v22 = vld [vmem:[%s14220_s21 + $0x130] sm:$0xf0]  ;;  %v9492_v12 = vld [vmem:[%s14220_s21 + $0x3c4] sm:$0xf]  ;;  %v8597_v7 = vor.u32 %v9476_v53, %v8594_v47  ;;  %v8392_v47 = vld [vmem:[%s14220_s21 + $0x1a8] sm:$0xf] }
 0x383   :  { %v3952_v30 = vpop.f32.mrf.mxu2  ;;  %v3978_v31 = vpop.f32.mrf.mxu3  ;;  %5475 = vmatpush.bf16.msrb.mxu3 %v8453_v21  ;;  %v8325_v19 = vor.u32 %v9408_v15, %v8322_v22  ;;  %v8661_v26 = vor.u32 %v9492_v12, %v8658_v2  ;;  %v8578_v21 = vld [vmem:[%s14220_s21 + $0x330] sm:$0xf0] }
 0x384   :  { %v8306_v30 = vld [vmem:[%s14220_s21 + $0x110] sm:$0xf0]  ;;  %v8581_v6 = vor.u32 %v9472_v18, %v8578_v21  ;;  %v8201_v18 = vor.u32 %v9379_v3, %v8200_v13  ;;  %v8664_v13 = vld [vmem:[%s14220_s21 + $0x3c8] sm:$0xf]  ;;  %v9495_v3 = vld [vmem:[%s14220_s21 + $0x3d4] sm:$0xf0] }
 0x385   :  { %5482 = vmatpush.bf16.msrb.mxu2 %v8677_v32  ;;  %v8309_v31 = vor.u32 %v9404_v28, %v8306_v30  ;;  %v4595_v32 = vperm.slane %v13629_v48, 2  ;;  %v8552_v30 = vld [vmem:[%s14220_s21 + $0x2e8] sm:$0xf] }
 0x386   :  { %5450 = vmatpush.bf16.msra.mxu0 %v8181_v35  ;;  %5462 = vmatpush.bf16.msra.mxu1 %v8325_v19  ;;  %v9484_v35 = vld [vmem:[%s14220_s21 + $0x384] sm:$0xf]  ;;  %v8265_v19 = vor.u32 %v9395_v41, %v8264_v56  ;;  %v8184_v56 = vld [vmem:[%s14220_s21 + $0x8] sm:$0xf]  ;;  %v9375_v41 = vld [vmem:[%s14220_s21 + $0x14] sm:$0xf0] }
 0x387   :  { %5476 = vmatpush.bf16.msrb.mxu3 %v8437_v25  ;;  %v8629_v39 = vor.u32 %v9484_v35, %v8626_v37  ;;  %v8536_v37 = vld [vmem:[%s14220_s21 + $0x2c8] sm:$0xf] }
 0x389   :  { %5483 = vmatpush.bf16.msrb.mxu2 %v8661_v26  ;;  %v4594_v26 = vperm.slane %v13629_v48, 1 }
 0x38a   :  { %5463 = vmatpush.bf16.msra.mxu1 %v8309_v31  ;;  %v9467_v31 = vld [vmem:[%s14220_s21 + $0x2f4] sm:$0xf0] }
 0x38c   :  { %v13566_v0 = vpop.f32.mrf.mxu2 }
 0x38d   :  { %5484 = vmatpush.bf16.msrb.mxu2 %v8645_v63  ;;  %v4163_v12 = vadd.f32 %v13566_v0, %v13363_v11  ;;  %v8232_v11 = vld [vmem:[%s14220_s21 + $0x68] sm:$0xf]  ;;  %v9387_v0 = vld [vmem:[%s14220_s21 + $0x74] sm:$0xf0] }
 0x38f   :  { %v13568_v54 = vpop.f32.mrf.mxu3 }
 0x391   :  { %5485 = vmatpush.bf16.msrb.mxu2 %v8629_v39 }
 0x394   :  { %v4164_v27 = vpop.f32.mrf.mxu2 }
 0x395   :  { %5486 = vmatpush.bf16.msrb.mxu2 %v8613_v52  ;;  %v9391_v27 = vld [vmem:[%s14220_s21 + $0x94] sm:$0xf0] }
 0x396   :  { %v4492_v4 = vpop.f32.mrf.mxu0  ;;  %v8249_v50 = vor.u32 %v9391_v27, %v8248_v40  ;;  %v9431_v52 = vld [vmem:[%s14220_s21 + $0x1d4] sm:$0xf0]  ;;  %v8472_v27 = vld [vmem:[%s14220_s21 + $0x248] sm:$0xf] }
 0x397   :  { %v4190_v16 = vpop.f32.mrf.mxu3  ;;  %v9419_v40 = vld [vmem:[%s14220_s21 + $0x174] sm:$0xf0] }
 0x398   :  { %v8565_v16 = vor.u32 %v9468_v24, %v8562_v44 }
 0x399   :  { %v13606_v20 = vpop.f32.mrf.mxu1  ;;  %5487 = vmatpush.bf16.msrb.mxu2 %v8597_v7  ;;  %v9427_v7 = vld [vmem:[%s14220_s21 + $0x1b4] sm:$0xf0] }
 0x39a   :  { %v8393_v21 = vor.u32 %v9427_v7, %v8392_v47  ;;  %v8312_v7 = vld [vmem:[%s14220_s21 + $0x108] sm:$0xf] }
 0x39c   :  { %v4505_v36 = vpop.f32.mrf.mxu2 }
 0x39d   :  { %v4506_v45 = vadd.f32 %v4505_v36, %v4492_v4  ;;  %5488 = vmatpush.bf16.msrb.mxu2 %v8581_v6  ;;  %v9435_v36 = vld [vmem:[%s14220_s21 + $0x1f4] sm:$0xf0] }
 0x39e   :  { %v4494_v34 = vpop.f32.mrf.mxu0 }
 0x39f   :  { %v4587_v42 = vadd.f32 %v4506_v45, %v4150_v61  ;;  %v8553_v34 = vor.u32 %v9467_v31, %v8552_v30  ;;  %v9463_v61 = vld [vmem:[%s14220_s21 + $0x2d4] sm:$0xf0]  ;;  %v4596_v31 = vperm.slane %v13629_v48, 3 }
 0x3a0   :  { %v8537_v10 = vor.u32 %v9463_v61, %v8536_v37  ;;  %v9443_v48 = vld [vmem:[%s14220_s21 + $0x234] sm:$0xf0]  ;;  %v8328_v37 = vld [vmem:[%s14220_s21 + $0x128] sm:$0xf] }
 0x3a1   :  { %v4520_v1 = vpop.f32.mrf.mxu1  ;;  %v4601_v60 = vadd.f32 %v4593_v51, %v4587_v42  ;;  %5489 = vmatpush.bf16.msrb.mxu2 %v8565_v16  ;;  %v8233_v51 = vor.u32 %v9387_v0, %v8232_v11  ;;  %v8344_v0 = vld [vmem:[%s14220_s21 + $0x148] sm:$0xf] }
 0x3a2   :  { %v8424_v1 = vld [vmem:[%s14220_s21 + $0x1e8] sm:$0xf] }
 0x3a3   :  { %v4605_v49 = vmax.f32 %v4601_v60, 0.0  ;;  %v8425_v42 = vor.u32 %v9435_v36, %v8424_v1  ;;  %v8680_v1 = vld [vmem:[%s14220_s21 + $0x3e8] sm:$0xf]  ;;  %v9499_v36 = vld [vmem:[%s14220_s21 + $0x3f4] sm:$0xf0] }
 0x3a4   :  { %v4507_v55 = vpop.f32.mrf.mxu2 }
 0x3a5   :  { %v13658_v9 = vpack.c.bf16 %v4605_v49, %v4605_v49  ;;  %v8520_v49 = vld [vmem:[%s14220_s21 + $0x2a8] sm:$0xf]  ;;  %v8217_v55 = vor.u32 %v9383_v29, %v8216_v23  ;;  %v9439_v29 = vld [vmem:[%s14220_s21 + $0x214] sm:$0xf0] }
 0x3a6   :  { %v4557_v46 = vpop.f32.mrf.mxu0 }
 0x3a7   :  { %5399 = vmatmul.bf16.vlgmr.msrb.gmra.mxu0 %v13658_v9 }
 0x3a8   :  { %5495 = vmatpush.bf16.msrb.mxu0 %v8297_v58  ;;  %v8409_v58 = vor.u32 %v9431_v52, %v8408_v59  ;;  %v8250_v59 = vld [vmem:[%s14220_s21 + $0x98] sm:$0xf0] }
 0x3a9   :  { %v13653_v57 = vpop.f32.mrf.mxu1 }
 0x3ac   :  { %5496 = vmatpush.bf16.msrb.mxu0 %v8281_v14  ;;  %v4531_v25 = vpop.f32.mrf.mxu2  ;;  %v9455_v14 = vld [vmem:[%s14220_s21 + $0x294] sm:$0xf0] }
 0x3ad   :  { %v4544_v17 = vpop.f32.mrf.mxu3  ;;  %v4532_v2 = vadd.f32 %v4531_v25, %v13606_v20  ;;  %v8505_v6 = vor.u32 %v9455_v14, %v8504_v5  ;;  %v8360_v25 = vld [vmem:[%s14220_s21 + $0x168] sm:$0xf]  ;;  %v9407_v5 = vld [vmem:[%s14220_s21 + $0x114] sm:$0xf0]  ;;  %v9385_v14 = vld [vmem:[%s14220_s21 + $0x6c] sm:$0xf] }
 0x3ae   :  { %v4558_v33 = vadd.f32 %v4557_v46, %v4544_v17  ;;  %v4559_v15 = vpop.f32.mrf.mxu0  ;;  %v9459_v46 = vld [vmem:[%s14220_s21 + $0x2b4] sm:$0xf0]  ;;  %v8376_v17 = vld [vmem:[%s14220_s21 + $0x188] sm:$0xf] }
 0x3af   :  { %v4588_v43 = vadd.f32 %v4532_v2, %v4163_v12  ;;  %v8521_v53 = vor.u32 %v9459_v46, %v8520_v49  ;;  %v9401_v15 = vld [vmem:[%s14220_s21 + $0xec] sm:$0xf]  ;;  %v9447_v12 = vld [vmem:[%s14220_s21 + $0x254] sm:$0xf0]  ;;  %v8681_v49 = vor.u32 %v9499_v36, %v8680_v1  ;;  %v8186_v36 = vld [vmem:[%s14220_s21 + $0x18] sm:$0xf0] }
 0x3b0   :  { %v4589_v4 = vadd.f32 %v4558_v33, %v4176_v38  ;;  %5497 = vmatpush.bf16.msrb.mxu0 %v8265_v19  ;;  %v9423_v38 = vld [vmem:[%s14220_s21 + $0x194] sm:$0xf0]  ;;  %v8488_v33 = vld [vmem:[%s14220_s21 + $0x268] sm:$0xf]  ;;  %v8185_v19 = vor.u32 %v9375_v41, %v8184_v56  ;;  %v9397_v2 = vld [vmem:[%s14220_s21 + $0xcc] sm:$0xf] }
 0x3b1   :  { %v4585_v22 = vpop.f32.mrf.mxu1  ;;  %v4602_v20 = vadd.f32 %v4594_v26, %v4588_v43  ;;  %v8377_v24 = vor.u32 %v9423_v38, %v8376_v17  ;;  %v8282_v26 = vld [vmem:[%s14220_s21 + $0xd8] sm:$0xf0]  ;;  %v8361_v43 = vor.u32 %v9419_v40, %v8360_v25  ;;  %v9465_v46 = vld [vmem:[%s14220_s21 + $0x2ec] sm:$0xf] }
 0x3b2   :  { %v4603_v28 = vadd.f32 %v4595_v32, %v4589_v4  ;;  %v9451_v32 = vld [vmem:[%s14220_s21 + $0x274] sm:$0xf0]  ;;  %v8298_v22 = vld [vmem:[%s14220_s21 + $0xf8] sm:$0xf0]  ;;  %v8285_v11 = vor.u32 %v9397_v2, %v8282_v26  ;;  %v9433_v56 = vld [vmem:[%s14220_s21 + $0x1ec] sm:$0xf] }
 0x3b3   :  { %v4606_v45 = vmax.f32 %v4602_v20, 0.0  ;;  %v8489_v44 = vor.u32 %v9451_v32, %v8488_v33  ;;  %v8301_v4 = vor.u32 %v9401_v15, %v8298_v22  ;;  %v8266_v20 = vld [vmem:[%s14220_s21 + $0xb8] sm:$0xf0]  ;;  %v9461_v17 = vld [vmem:[%s14220_s21 + $0x2cc] sm:$0xf]  ;;  %v8313_v33 = vor.u32 %v9407_v5, %v8312_v7 }
 0x3b4   :  { %v4607_v63 = vmax.f32 %v4603_v28, 0.0  ;;  %5498 = vmatpush.bf16.msrb.mxu0 %v8249_v50  ;;  %v4533_v39 = vpop.f32.mrf.mxu2  ;;  %v4189_v28 = vadd.f32 %v13568_v54, %v13474_v8  ;;  %v9415_v8 = vld [vmem:[%s14220_s21 + $0x154] sm:$0xf0]  ;;  %v8456_v54 = vld [vmem:[%s14220_s21 + $0x228] sm:$0xf] }
 0x3b5   :  { %v4546_v62 = vpop.f32.mrf.mxu3  ;;  %v13735_v60 = vpack.c.bf16 %v4606_v45, %v4606_v45  ;;  %v8457_v45 = vor.u32 %v9443_v48, %v8456_v54  ;;  %v9411_v39 = vld [vmem:[%s14220_s21 + $0x134] sm:$0xf0]  ;;  %v8426_v41 = vld [vmem:[%s14220_s21 + $0x1f8] sm:$0xf0]  ;;  %v8648_v32 = vld [vmem:[%s14220_s21 + $0x3a8] sm:$0xf] }
 0x3b6   :  { %v13720_v35 = vpack.c.bf16 %v4607_v63, %v4607_v63  ;;  %v8473_v63 = vor.u32 %v9447_v12, %v8472_v27  ;;  %v8538_v38 = vld [vmem:[%s14220_s21 + $0x2d8] sm:$0xf0]  ;;  %v9491_v15 = vld [vmem:[%s14220_s21 + $0x3b4] sm:$0xf0]  ;;  %v9429_v25 = vld [vmem:[%s14220_s21 + $0x1cc] sm:$0xf] }
 0x3b7   :  { %5451 = vmatmul.bf16.vlgmr.msra.gmra.mxu0 %v13658_v9  ;;  %5412 = vmatmul.bf16.vlgmr.msrb.gmra.mxu1 %v13735_v60  ;;  %v8410_v40 = vld [vmem:[%s14220_s21 + $0x1d8] sm:$0xf0]  ;;  %v8649_v27 = vor.u32 %v9491_v15, %v8648_v32  ;;  %v8632_v2 = vld [vmem:[%s14220_s21 + $0x388] sm:$0xf]  ;;  %v9487_v26 = vld [vmem:[%s14220_s21 + $0x394] sm:$0xf0] }
 0x3b8   :  { %5425 = vmatmul.bf16.vlgmr.msra.gmra.mxu3 %v13720_v35  ;;  %5499 = vmatpush.bf16.msrb.mxu0 %v8233_v51  ;;  %v8522_v12 = vld [vmem:[%s14220_s21 + $0x2b8] sm:$0xf0]  ;;  %v8616_v48 = vld [vmem:[%s14220_s21 + $0x368] sm:$0xf]  ;;  %v9413_v5 = vld [vmem:[%s14220_s21 + $0x14c] sm:$0xf] }
 0x3b9   :  { %5521 = vmatpush.bf16.msra.mxu3 %v8553_v34  ;;  %5508 = vmatpush.bf16.msrb.mxu1 %v8425_v42  ;;  %v8345_v34 = vor.u32 %v9415_v8, %v8344_v0  ;;  %v8440_v42 = vld [vmem:[%s14220_s21 + $0x208] sm:$0xf]  ;;  %v8633_v0 = vor.u32 %v9487_v26, %v8632_v2  ;;  %v9453_v8 = vld [vmem:[%s14220_s21 + $0x28c] sm:$0xf]  ;;  %v8506_v54 = vld [vmem:[%s14220_s21 + $0x298] sm:$0xf0] }
 0x3ba   :  { %v8509_v1 = vor.u32 %v9453_v8, %v8506_v54  ;;  %v9409_v32 = vld [vmem:[%s14220_s21 + $0x12c] sm:$0xf]  ;;  %v8330_v15 = vld [vmem:[%s14220_s21 + $0x138] sm:$0xf0] }
 0x3bb   :  { %v9477_v8 = vld [vmem:[%s14220_s21 + $0x34c] sm:$0xf]  ;;  %v8602_v54 = vld [vmem:[%s14220_s21 + $0x358] sm:$0xf0] }
 0x3bc   :  { %5500 = vmatpush.bf16.msrb.mxu0 %v8217_v55  ;;  %v8554_v55 = vld [vmem:[%s14220_s21 + $0x2f8] sm:$0xf0] }
 0x3bd   :  { %5522 = vmatpush.bf16.msra.mxu3 %v8537_v10  ;;  %5509 = vmatpush.bf16.msrb.mxu1 %v8409_v58  ;;  %v9389_v10 = vld [vmem:[%s14220_s21 + $0x8c] sm:$0xf]  ;;  %v8329_v58 = vor.u32 %v9411_v39, %v8328_v37  ;;  %v8490_v39 = vld [vmem:[%s14220_s21 + $0x278] sm:$0xf0] }
 0x3be   :  { %v8253_v47 = vor.u32 %v9389_v10, %v8250_v59  ;;  %v9421_v37 = vld [vmem:[%s14220_s21 + $0x18c] sm:$0xf] }
 0x3c0   :  { %5501 = vmatpush.bf16.msrb.mxu0 %v8201_v18  ;;  %v8557_v18 = vor.u32 %v9465_v46, %v8554_v55  ;;  %v8362_v46 = vld [vmem:[%s14220_s21 + $0x178] sm:$0xf0] }
 0x3c1   :  { %5523 = vmatpush.bf16.msra.mxu3 %v8521_v53  ;;  %5510 = vmatpush.bf16.msrb.mxu1 %v8393_v21  ;;  %v8441_v53 = vor.u32 %v9439_v29, %v8440_v42  ;;  %v8234_v21 = vld [vmem:[%s14220_s21 + $0x78] sm:$0xf0]  ;;  %v8600_v42 = vld [vmem:[%s14220_s21 + $0x348] sm:$0xf] }
 0x3c2   :  { %v8237_v22 = vor.u32 %v9385_v14, %v8234_v21  ;;  %v8346_v14 = vld [vmem:[%s14220_s21 + $0x158] sm:$0xf0]  ;;  %v9441_v21 = vld [vmem:[%s14220_s21 + $0x22c] sm:$0xf] }
 0x3c4   :  { %5502 = vmatpush.bf16.msrb.mxu0 %v8185_v19  ;;  %v8429_v19 = vor.u32 %v9433_v56, %v8426_v41  ;;  %v8458_v56 = vld [vmem:[%s14220_s21 + $0x238] sm:$0xf0]  ;;  %v8568_v41 = vld [vmem:[%s14220_s21 + $0x308] sm:$0xf] }
 0x3c5   :  { %5524 = vmatpush.bf16.msra.mxu3 %v8505_v6  ;;  %5511 = vmatpush.bf16.msrb.mxu1 %v8377_v24  ;;  %v8665_v6 = vor.u32 %v9495_v3, %v8664_v13  ;;  %v9381_v24 = vld [vmem:[%s14220_s21 + $0x4c] sm:$0xf]  ;;  %v8474_v13 = vld [vmem:[%s14220_s21 + $0x258] sm:$0xf0]  ;;  %v8584_v3 = vld [vmem:[%s14220_s21 + $0x328] sm:$0xf] }
 0x3c7   :  { %5503 = vmatmul.bf16.vlgmr.msrb.gmra.mxu0 %v13658_v9  ;;  %5464 = vmatmul.bf16.vlgmr.msra.gmra.mxu1 %v13735_v60 }
 0x3c8   :  { %5477 = vmatmul.bf16.vlgmr.msrb.gmra.mxu3 %v13720_v35  ;;  %5547 = vmatpush.bf16.msra.mxu0 %v8301_v4  ;;  %v8218_v4 = vld [vmem:[%s14220_s21 + $0x58] sm:$0xf0] }
 0x3c9   :  { %5525 = vmatpush.bf16.msra.mxu3 %v8489_v44  ;;  %5512 = vmatpush.bf16.msrb.mxu1 %v8361_v43  ;;  %v8541_v44 = vor.u32 %v9461_v17, %v8538_v38  ;;  %v8349_v17 = vor.u32 %v9413_v5, %v8346_v14  ;;  %v9497_v38 = vld [vmem:[%s14220_s21 + $0x3ec] sm:$0xf]  ;;  %v9510_v5 = vld [vmem:[%s14222_s23 + $0x50] sm:$0xff] }
 0x3ca   :  { %v9522_v14 = vld [vmem:[%s14222_s23 + $0xb0] sm:$0xff] }
 0x3cc   :  { %v4570_v16 = vpop.f32.mrf.mxu2  ;;  %5548 = vmatpush.bf16.msra.mxu0 %v8285_v11  ;;  %v8394_v11 = vld [vmem:[%s14220_s21 + $0x1b8] sm:$0xf0] }
 0x3cd   :  { %v4584_v30 = vadd.f32 %v13653_v57, %v4570_v16  ;;  %v9393_v57 = vld [vmem:[%s14220_s21 + $0xac] sm:$0xf]  ;;  %5526 = vmatpush.bf16.msra.mxu3 %v8473_v63  ;;  %5513 = vmatpush.bf16.msrb.mxu1 %v8345_v34 }
 0x3ce   :  { %v8269_v51 = vor.u32 %v9393_v57, %v8266_v20  ;;  %v9457_v16 = vld [vmem:[%s14220_s21 + $0x2ac] sm:$0xf]  ;;  %v9483_v57 = vld [vmem:[%s14220_s21 + $0x374] sm:$0xf0] }
 0x3cf   :  { %v4590_v50 = vadd.f32 %v4584_v30, %v4189_v28  ;;  %v8221_v28 = vor.u32 %v9381_v24, %v8218_v4  ;;  %v8413_v30 = vor.u32 %v9429_v25, %v8410_v40  ;;  %v8525_v43 = vor.u32 %v9457_v16, %v8522_v12  ;;  %v9425_v63 = vld [vmem:[%s14220_s21 + $0x1ac] sm:$0xf]  ;;  %v8442_v24 = vld [vmem:[%s14220_s21 + $0x218] sm:$0xf0] }
 0x3d0   :  { %5549 = vmatpush.bf16.msra.mxu0 %v8269_v51  ;;  %v9373_v34 = vld [vmem:[%s14220_s21 + $0xc] sm:$0xf]  ;;  %v8333_v4 = vor.u32 %v9409_v32, %v8330_v15  ;;  %v8666_v40 = vld [vmem:[%s14220_s21 + $0x3d8] sm:$0xf0] }
 0x3d1   :  { %v4604_v62 = vadd.f32 %v4596_v31, %v4590_v50  ;;  %5527 = vmatpush.bf16.msra.mxu3 %v8457_v45  ;;  %5514 = vmatpush.bf16.msrb.mxu1 %v8329_v58  ;;  %v9377_v31 = vld [vmem:[%s14220_s21 + $0x2c] sm:$0xf]  ;;  %v8202_v50 = vld [vmem:[%s14220_s21 + $0x38] sm:$0xf0]  ;;  %v8617_v45 = vor.u32 %v9483_v57, %v8616_v48  ;;  %v8189_v29 = vor.u32 %v9373_v34, %v8186_v36 }
 0x3d2   :  { %v8205_v20 = vor.u32 %v9377_v31, %v8202_v50  ;;  %v9449_v51 = vld [vmem:[%s14220_s21 + $0x26c] sm:$0xf]  ;;  %v8314_v12 = vld [vmem:[%s14220_s21 + $0x118] sm:$0xf0] }
 0x3d3   :  { %v4608_v61 = vmax.f32 %v4604_v62, 0.0  ;;  %v8397_v62 = vor.u32 %v9425_v63, %v8394_v11  ;;  %v8493_v59 = vor.u32 %v9449_v51, %v8490_v39  ;;  %v9445_v58 = vld [vmem:[%s14220_s21 + $0x24c] sm:$0xf]  ;;  %v8634_v50 = vld [vmem:[%s14220_s21 + $0x398] sm:$0xf0] }
 0x3d4   :  { %v4572_v23 = vpop.f32.mrf.mxu2  ;;  %5550 = vmatpush.bf16.msra.mxu0 %v8253_v47  ;;  %v8477_v7 = vor.u32 %v9445_v58, %v8474_v13  ;;  %v9493_v25 = vld [vmem:[%s14220_s21 + $0x3cc] sm:$0xf]  ;;  %v8586_v57 = vld [vmem:[%s14220_s21 + $0x338] sm:$0xf0]  ;;  %v9512_v58 = vld [vmem:[%s14222_s23 + $0x60] sm:$0xff] }
 0x3d5   :  { %v13860_v52 = vpack.c.bf16 %v4608_v61, %v4608_v61  ;;  %5528 = vmatpush.bf16.msra.mxu3 %v8441_v53  ;;  %5515 = vmatpush.bf16.msrb.mxu1 %v8313_v33  ;;  %v8378_v61 = vld [vmem:[%s14220_s21 + $0x198] sm:$0xf0]  ;;  %v9479_v23 = vld [vmem:[%s14220_s21 + $0x354] sm:$0xf0]  ;;  %v9405_v16 = vld [vmem:[%s14220_s21 + $0x10c] sm:$0xf]  ;;  %v8669_v2 = vor.u32 %v9493_v25, %v8666_v40 }
 0x3d6   :  { %v8381_v10 = vor.u32 %v9421_v37, %v8378_v61  ;;  %v8601_v55 = vor.u32 %v9479_v23, %v8600_v42  ;;  %v9475_v53 = vld [vmem:[%s14220_s21 + $0x334] sm:$0xf0]  ;;  %v8682_v33 = vld [vmem:[%s14220_s21 + $0x3f8] sm:$0xf0]  ;;  %v8317_v26 = vor.u32 %v9405_v16, %v8314_v12  ;;  %v9481_v11 = vld [vmem:[%s14220_s21 + $0x36c] sm:$0xf] }
 0x3d7   :  { %5438 = vmatmul.bf16.vlgmr.msra.gmra.mxu2 %v13860_v52  ;;  %v9473_v48 = vld [vmem:[%s14220_s21 + $0x32c] sm:$0xf]  ;;  %v8570_v34 = vld [vmem:[%s14220_s21 + $0x318] sm:$0xf0]  ;;  %v9506_v37 = vld [vmem:[%s14222_s23 + $0x30] sm:$0xff] }
 0x3d8   :  { %5534 = vmatpush.bf16.msra.mxu2 %v8681_v49  ;;  %5529 = vmatmul.bf16.vlgmr.msra.gmra.mxu3 %v13720_v35  ;;  %v9417_v49 = vld [vmem:[%s14220_s21 + $0x16c] sm:$0xf]  ;;  %v9507_v36 = vld [vmem:[%s14222_s23 + $0x38] sm:$0xff]  ;;  %v9502_v23 = vld [vmem:[%s14222_s23 + $0x10] sm:$0xff] }
 0x3d9   :  { %5573 = vmatpush.bf16.msrb.mxu3 %v8557_v18  ;;  %5551 = vmatpush.bf16.msra.mxu0 %v8237_v22  ;;  %v8365_v47 = vor.u32 %v9417_v49, %v8362_v46  ;;  %v8585_v18 = vor.u32 %v9475_v53, %v8584_v3  ;;  %v9505_v61 = vld [vmem:[%s14222_s23 + $0x28] sm:$0xff]  ;;  %v9503_v51 = vld [vmem:[%s14222_s23 + $0x18] sm:$0xff] }
 0x3da   :  { %5560 = vmatpush.bf16.msra.mxu1 %v8429_v19  ;;  %v9437_v19 = vld [vmem:[%s14220_s21 + $0x20c] sm:$0xf]  ;;  %v9515_v39 = vld [vmem:[%s14222_s23 + $0x78] sm:$0xff] }
 0x3db   :  { %5516 = vmatmul.bf16.vlgmr.msrb.gmra.mxu1 %v13735_v60  ;;  %v9511_v3 = vld [vmem:[%s14222_s23 + $0x58] sm:$0xff] }
 0x3dc   :  { %5535 = vmatpush.bf16.msra.mxu2 %v8665_v6  ;;  %v9471_v6 = vld [vmem:[%s14220_s21 + $0x314] sm:$0xf0] }
 0x3dd   :  { %5574 = vmatpush.bf16.msrb.mxu3 %v8541_v44  ;;  %5552 = vmatpush.bf16.msra.mxu0 %v8221_v28  ;;  %v8569_v22 = vor.u32 %v9471_v6, %v8568_v41  ;;  %v8685_v44 = vor.u32 %v9497_v38, %v8682_v33  ;;  %v9489_v28 = vld [vmem:[%s14220_s21 + $0x3ac] sm:$0xf]  ;;  %v9523_v53 = vld [vmem:[%s14222_s23 + $0xb8] sm:$0xff]  ;;  %v14144_v41 = vld [vmem:[%s14224_s22] sm:$0xf] }
 0x3de   :  { %5561 = vmatpush.bf16.msra.mxu1 %v8413_v30  ;;  %v8650_v30 = vld [vmem:[%s14220_s21 + $0x3b8] sm:$0xf0]  ;;  %v9508_v38 = vld [vmem:[%s14222_s23 + $0x40] sm:$0xff] }
 0x3df   :  { %v8653_v31 = vor.u32 %v9489_v28, %v8650_v30  ;;  %v9520_v33 = vld [vmem:[%s14222_s23 + $0xa0] sm:$0xff]  ;;  %v9519_v15 = vld [vmem:[%s14222_s23 + $0x98] sm:$0xff] }
 0x3e0   :  { %5536 = vmatpush.bf16.msra.mxu2 %v8649_v27  ;;  %v8445_v27 = vor.u32 %v9437_v19, %v8442_v24  ;;  %v9518_v19 = vld [vmem:[%s14222_s23 + $0x90] sm:$0xff]  ;;  %v9516_v28 = vld [vmem:[%s14222_s23 + $0x80] sm:$0xff]  ;;  %v9531_v30 = vld [vmem:[%s14222_s23 + $0xf8] sm:$0xff] }
 0x3e1   :  { %5575 = vmatpush.bf16.msrb.mxu3 %v8525_v43  ;;  %5553 = vmatpush.bf16.msra.mxu0 %v8205_v20  ;;  %v9485_v43 = vld [vmem:[%s14220_s21 + $0x38c] sm:$0xf]  ;;  %v8589_v20 = vor.u32 %v9473_v48, %v8586_v57 }
 0x3e2   :  { %5562 = vmatpush.bf16.msra.mxu1 %v8397_v62  ;;  %v8637_v63 = vor.u32 %v9485_v43, %v8634_v50  ;;  %v9469_v62 = vld [vmem:[%s14220_s21 + $0x30c] sm:$0xf] }
 0x3e4   :  { %5537 = vmatpush.bf16.msra.mxu2 %v8633_v0 }
 0x3e5   :  { %5576 = vmatpush.bf16.msrb.mxu3 %v8509_v1  ;;  %5554 = vmatpush.bf16.msra.mxu0 %v8189_v29  ;;  %v8573_v1 = vor.u32 %v9469_v62, %v8570_v34  ;;  %v9514_v29 = vld [vmem:[%s14222_s23 + $0x70] sm:$0xff] }
 0x3e6   :  { %5563 = vmatpush.bf16.msra.mxu1 %v8381_v10  ;;  %v9501_v10 = vld [vmem:[%s14222_s23 + $0x8] sm:$0xff] }
 0x3e7   :  { %5490 = vmatmul.bf16.vlgmr.msrb.gmra.mxu2 %v13860_v52 }
 0x3e8   :  { %5538 = vmatpush.bf16.msra.mxu2 %v8617_v45  ;;  %5555 = vmatmul.bf16.vlgmr.msra.gmra.mxu0 %v13658_v9  ;;  %v8461_v9 = vor.u32 %v9441_v21, %v8458_v56  ;;  %v9509_v21 = vld [vmem:[%s14222_s23 + $0x48] sm:$0xff] }
 0x3e9   :  { %5577 = vmatpush.bf16.msrb.mxu3 %v8493_v59  ;;  %5867 = vmatpush.bf16.msrb.mxu0 %v9507_v36  ;;  %v9513_v59 = vld [vmem:[%s14222_s23 + $0x68] sm:$0xff] }
 0x3ea   :  { %5564 = vmatpush.bf16.msra.mxu1 %v8365_v47  ;;  %v9521_v56 = vld [vmem:[%s14222_s23 + $0xa8] sm:$0xff] }
 0x3ec   :  { %5539 = vmatpush.bf16.msra.mxu2 %v8601_v55  ;;  %v9500_v55 = vld [vmem:[%s14222_s23] sm:$0xff] }
 0x3ed   :  { %5578 = vmatpush.bf16.msrb.mxu3 %v8477_v7  ;;  %5868 = vmatpush.bf16.msrb.mxu0 %v9506_v37  ;;  %v4745_v37 = vperm.slane %v14144_v41, 2 }
 0x3ee   :  { %5565 = vmatpush.bf16.msra.mxu1 %v8349_v17 }
 0x3f0   :  { %5540 = vmatpush.bf16.msra.mxu2 %v8585_v18 }
 0x3f1   :  { %5579 = vmatpush.bf16.msrb.mxu3 %v8461_v9  ;;  %5869 = vmatpush.bf16.msrb.mxu0 %v9505_v61  ;;  %v4743_v9 = vperm.slane %v14144_v41, 0 }
 0x3f2   :  { %5566 = vmatpush.bf16.msra.mxu1 %v8333_v4 }
 0x3f4   :  { %5541 = vmatpush.bf16.msra.mxu2 %v8569_v22 }
 0x3f5   :  { %5580 = vmatpush.bf16.msrb.mxu3 %v8445_v27  ;;  %v9517_v27 = vld [vmem:[%s14222_s23 + $0x88] sm:$0xff] }
 0x3f6   :  { %5567 = vmatpush.bf16.msra.mxu1 %v8317_v26 }
 0x3f7   :  { %5542 = vmatmul.bf16.vlgmr.msra.gmra.mxu2 %v13860_v52 }
 0x3f8   :  { %5586 = vmatpush.bf16.msrb.mxu2 %v8685_v44  ;;  %5581 = vmatmul.bf16.vlgmr.msrb.gmra.mxu3 %v13720_v35  ;;  %v8618_v35 = vld [vmem:[%s14220_s21 + $0x378] sm:$0xf0] }
 0x3f9   :  { %5568 = vmatmul.bf16.vlgmr.msra.gmra.mxu1 %v13735_v60  ;;  %v8621_v0 = vor.u32 %v9481_v11, %v8618_v35  ;;  %v8605_v60 = vor.u32 %v9477_v8, %v8602_v54  ;;  %5893 = vmatpush.bf16.msra.mxu3 %v9523_v53  ;;  %v9529_v54 = vld [vmem:[%s14222_s23 + $0xe8] sm:$0xff] }
 0x3fa   :  { %5880 = vmatpush.bf16.msrb.mxu1 %v9515_v39 }
 0x3fc   :  { %5587 = vmatpush.bf16.msrb.mxu2 %v8669_v2 }
 0x3fd   :  { %5894 = vmatpush.bf16.msra.mxu3 %v9522_v14 }
 0x3fe   :  { %5881 = vmatpush.bf16.msrb.mxu1 %v9514_v29 }
 0x400   :  { %5588 = vmatpush.bf16.msrb.mxu2 %v8653_v31  ;;  %v4744_v31 = vperm.slane %v14144_v41, 1 }
 0x401   :  { %5895 = vmatpush.bf16.msra.mxu3 %v9521_v56 }
 0x402   :  { %5882 = vmatpush.bf16.msrb.mxu1 %v9513_v59 }
 0x404   :  { %5589 = vmatpush.bf16.msrb.mxu2 %v8637_v63  ;;  %v9530_v63 = vld [vmem:[%s14222_s23 + $0xf0] sm:$0xff] }
 0x405   :  { %5896 = vmatpush.bf16.msra.mxu3 %v9520_v33 }
 0x406   :  { %5883 = vmatpush.bf16.msrb.mxu1 %v9512_v58 }
 0x408   :  { %5590 = vmatpush.bf16.msrb.mxu2 %v8621_v0 }
 0x409   :  { %5897 = vmatpush.bf16.msra.mxu3 %v9519_v15 }
 0x40a   :  { %5884 = vmatpush.bf16.msrb.mxu1 %v9511_v3 }
 0x40c   :  { %5591 = vmatpush.bf16.msrb.mxu2 %v8605_v60  ;;  %v9528_v60 = vld [vmem:[%s14222_s23 + $0xe0] sm:$0xff] }
 0x40d   :  { %5898 = vmatpush.bf16.msra.mxu3 %v9518_v19 }
 0x40e   :  { %5885 = vmatpush.bf16.msrb.mxu1 %v9510_v5 }
 0x410   :  { %5592 = vmatpush.bf16.msrb.mxu2 %v8589_v20 }
 0x411   :  { %5899 = vmatpush.bf16.msra.mxu3 %v9517_v27 }
 0x412   :  { %5886 = vmatpush.bf16.msrb.mxu1 %v9509_v21 }
 0x414   :  { %5593 = vmatpush.bf16.msrb.mxu2 %v8573_v1  ;;  %v9527_v1 = vld [vmem:[%s14222_s23 + $0xd8] sm:$0xff] }
 0x415   :  { %5900 = vmatpush.bf16.msra.mxu3 %v9516_v28 }
 0x416   :  { %5887 = vmatpush.bf16.msrb.mxu1 %v9508_v38 }
 0x417   :  { %5594 = vmatmul.bf16.vlgmr.msrb.gmra.mxu2 %v13860_v52  ;;  %v9504_v52 = vld [vmem:[%s14222_s23 + $0x20] sm:$0xff] }
 0x418   :  { %5870 = vmatpush.bf16.msrb.mxu0 %v9504_v52  ;;  %5906 = vmatpush.bf16.msra.mxu2 %v9531_v30 }
 0x41c   :  { %5871 = vmatpush.bf16.msrb.mxu0 %v9503_v51  ;;  %5907 = vmatpush.bf16.msra.mxu2 %v9530_v63 }
 0x420   :  { %5872 = vmatpush.bf16.msrb.mxu0 %v9502_v23  ;;  %5908 = vmatpush.bf16.msra.mxu2 %v9529_v54  ;;  %v9525_v23 = vld [vmem:[%s14222_s23 + $0xc8] sm:$0xff] }
 0x424   :  { %v5400_v45 = vpop.f32.mrf.mxu0  ;;  %5873 = vmatpush.bf16.msrb.mxu0 %v9501_v10  ;;  %5909 = vmatpush.bf16.msra.mxu2 %v9528_v60  ;;  %v9524_v10 = vld [vmem:[%s14222_s23 + $0xc0] sm:$0xff] }
 0x425   :  { %v5401_v22 = vadd.f32 %v5400_v45, %v4743_v9  ;;  %v9526_v45 = vld [vmem:[%s14222_s23 + $0xd0] sm:$0xff] }
 0x428   :  { %5874 = vmatpush.bf16.msrb.mxu0 %v9500_v55  ;;  %5910 = vmatpush.bf16.msra.mxu2 %v9527_v1 }
 0x42c   :  { %v5402_v42 = vpop.f32.mrf.mxu0  ;;  %5911 = vmatpush.bf16.msra.mxu2 %v9526_v45 }
 0x430   :  { %5912 = vmatpush.bf16.msra.mxu2 %v9525_v23 }
 0x434   :  { %v5452_v49 = vpop.f32.mrf.mxu0  ;;  %v5413_v46 = vpop.f32.mrf.mxu1  ;;  %5913 = vmatpush.bf16.msra.mxu2 %v9524_v10 }
 0x435   :  { %v5414_v44 = vadd.f32 %v5413_v46, %v5401_v22  ;;  %v5453_v35 = vadd.f32 %v5452_v49, %v4744_v31 }
 0x43b   :  { %v5426_v13 = vpop.f32.mrf.mxu3 }
 0x43c   :  { %v5454_v47 = vpop.f32.mrf.mxu0  ;;  %v5415_v7 = vpop.f32.mrf.mxu1  ;;  %v5427_v40 = vadd.f32 %v5426_v13, %v5414_v44 }
 0x43d   :  { %v4746_v7 = vperm.slane %v14144_v41, 3  ;;  %v5919_v41 = vld [vmem:[%s14225_s4] sm:$0xff] }
 0x43e   :  { %vm5920_vm5 = vcmp.gt.f32.partialorder %v5919_v41, 0.0 }
 0x443   :  { %v5428_v18 = vpop.f32.mrf.mxu3 }
 0x444   :  { %v5504_v6 = vpop.f32.mrf.mxu0  ;;  %v5465_v17 = vpop.f32.mrf.mxu1 }
 0x445   :  { %v5466_v0 = vadd.f32 %v5465_v17, %v5453_v35  ;;  %v5505_v39 = vadd.f32 %v5504_v6, %v4745_v37 }
 0x44b   :  { %v5478_v32 = vpop.f32.mrf.mxu3 }
 0x44c   :  { %v5506_v24 = vpop.f32.mrf.mxu0  ;;  %v5467_v4 = vpop.f32.mrf.mxu1  ;;  %v5479_v57 = vadd.f32 %v5478_v32, %v5466_v0 }
 0x44d   :  { %v9537_v24 = vld [vmem:[%s14223_s24] ss:$0 sm:$0xff] }
 0x453   :  { %v5480_v25 = vpop.f32.mrf.mxu3 }
 0x454   :  { %v9540_v25 = vmov -1e+10  }
 0x458   :  { %v5517_v26 = vpop.f32.mrf.mxu1 }
 0x459   :  { %v5518_v42 = vadd.f32 %v5517_v26, %v5505_v39 }
 0x45a   :  { %v5439_v16 = vpop.f32.mrf.mxu2 }
 0x45b   :  { %v5440_v12 = vadd.f32 %v5439_v16, %v5427_v40  ;;  %v5530_v50 = vpop.f32.mrf.mxu3  ;;  %v5921_v40 = vsel %vm5920_vm5, 0.0, %v9540_v25 }
 0x45c   :  { %v5531_v29 = vadd.f32 %v5530_v50, %v5518_v42 }
 0x45d   :  { %v5599_v2 = vmax.f32 %v5440_v12, 0.0  ;;  %v5923_v12 = vsel %vm5922_vm6, %v5921_v40, 0.0 }
 0x45f   :  { %v5603_v43 = vpack.c.bf16 %v5599_v2, %v5599_v2 }
 0x460   :  { %v5519_v8 = vpop.f32.mrf.mxu1 }
 0x461   :  { %5875 = vmatmul.bf16.vlgmr.msrb.gmra.mxu0 %v5603_v43 }
 0x462   :  { %v5441_v11 = vpop.f32.mrf.mxu2 }
 0x463   :  { %v5532_v48 = vpop.f32.mrf.mxu3 }
 0x465   :  { %v5556_v62 = vpop.f32.mrf.mxu0 }
 0x466   :  { %v5557_v5 = vadd.f32 %v5556_v62, %v4746_v7 }
 0x46a   :  { %v5491_v20 = vpop.f32.mrf.mxu2 }
 0x46b   :  { %v5492_v34 = vadd.f32 %v5491_v20, %v5479_v57 }
 0x46d   :  { %v5600_v36 = vmax.f32 %v5492_v34, 0.0  ;;  %v5558_v51 = vpop.f32.mrf.mxu0 }
 0x46f   :  { %v5604_v61 = vpack.c.bf16 %v5600_v36, %v5600_v36 }
 0x471   :  { %5888 = vmatmul.bf16.vlgmr.msrb.gmra.mxu1 %v5604_v61 }
 0x472   :  { %v5493_v52 = vpop.f32.mrf.mxu2 }
 0x476   :  { %v5569_v49 = vpop.f32.mrf.mxu1 }
 0x477   :  { %v5570_v14 = vadd.f32 %v5569_v49, %v5557_v5 }
 0x47a   :  { %v5543_v59 = vpop.f32.mrf.mxu2 }
 0x47b   :  { %v5544_v46 = vadd.f32 %v5543_v59, %v5531_v29  ;;  %v5582_v58 = vpop.f32.mrf.mxu3 }
 0x47c   :  { %v5583_v18 = vadd.f32 %v5582_v58, %v5570_v14 }
 0x47d   :  { %v5601_v55 = vmax.f32 %v5544_v46, 0.0 }
 0x47e   :  { %v5571_v53 = vpop.f32.mrf.mxu1 }
 0x47f   :  { %v5605_v13 = vpack.c.bf16 %v5601_v55, %v5601_v55 }
 0x481   :  { %5901 = vmatmul.bf16.vlgmr.msra.gmra.mxu3 %v5605_v13 }
 0x482   :  { %v5545_v3 = vpop.f32.mrf.mxu2 }
 0x483   :  { %v5584_v47 = vpop.f32.mrf.mxu3 }
 0x49a   :  { %v5595_v21 = vpop.f32.mrf.mxu2 }
 0x49b   :  { %v5596_v56 = vadd.f32 %v5595_v21, %v5583_v18 }
 0x49d   :  { %v5602_v6 = vmax.f32 %v5596_v56, 0.0 }
 0x49f   :  { %v5606_v17 = vpack.c.bf16 %v5602_v6, %v5602_v6 }
 0x4a1   :  { %5914 = vmatmul.bf16.vlgmr.msra.gmra.mxu2 %v5606_v17 }
 0x4a2   :  { %v5597_v38 = vpop.f32.mrf.mxu2 }
 0x4de   :  { %v5876_v33 = vpop.f32.mrf.mxu0 }
 0x4df   :  { %v5877_v44 = vadd.f32 %v9537_v24, %v5876_v33 }
 0x4e6   :  { %v5878_v9 = vpop.f32.mrf.mxu0 }
 0x4ee   :  { %v5889_v32 = vpop.f32.mrf.mxu1 }
 0x4ef   :  { %v5890_v4 = vadd.f32 %v5889_v32, %v5877_v44 }
 0x4f6   :  { %v5891_v15 = vpop.f32.mrf.mxu1 }
 0x504   :  { %v5902_v22 = vpop.f32.mrf.mxu3 }
 0x505   :  { %v5903_v27 = vadd.f32 %v5902_v22, %v5890_v4 }
 0x50c   :  { %v5904_v19 = vpop.f32.mrf.mxu3 }
 0x524   :  { %v5915_v16 = vpop.f32.mrf.mxu2 }
 0x525   :  { %v5916_v2 = vadd.f32 %v5915_v16, %v5903_v27 }
 0x527   :  { %v5924_v26 = vadd.f32 %v5923_v12, %v5916_v2 }
 0x529   :  { %5925 = vst [vmem:[%s14226_s25] sm:$0xff] %v5924_v26 }
 0x52c   :  { %v5917_v28 = vpop.f32.mrf.mxu2 }

</bundles_post_ra>
